<compile_context>
chip_gen: v6e
topology: v6e:2x2x1
jax: 0.10.0
libtpu: 0.0.40
codegen_flags: <defaults>
</compile_context>

<pallas_src>
import jax
import jax.numpy as jnp
from jax import lax
from jax.experimental import pallas as pl
from jax.experimental.pallas import tpu as pltpu


def _flash_residual_kernel(x_ref, q_ref, k_ref, v_ref, o_ref,
                           m_scr, l_scr, acc_scr):
    # Blocks: x_ref/q_ref (1, tq, D) | k_ref/v_ref (1, tk, D) | o_ref (1, tq, D)
    # Scratch (f32): m/l (tq, 1), acc (tq, D).  q_ref is pre-scaled by 1/sqrt(D)
    # and already in the MXU dtype, so the kv loop does no casts of Q/K/V.
    kv = pl.program_id(2)

    @pl.when(kv == 0)
    def _init():
        m_scr[...] = jnp.full_like(m_scr, -jnp.inf)
        l_scr[...] = jnp.zeros_like(l_scr)
        acc_scr[...] = jnp.zeros_like(acc_scr)

    # Scores: contract the D axes directly (no explicit transpose of K).
    s = lax.dot_general(
        q_ref[0], k_ref[0],
        dimension_numbers=(((1,), (1,)), ((), ())),
        preferred_element_type=jnp.float32)                     # (tq, tk)

    # Online (numerically stable) softmax update.
    m_prev = m_scr[...]
    m_new = jnp.maximum(m_prev, jnp.max(s, axis=-1, keepdims=True))
    alpha = jnp.exp(m_prev - m_new)
    p = jnp.exp(s - m_new)
    l_scr[...] = alpha * l_scr[...] + jnp.sum(p, axis=-1, keepdims=True)
    acc_scr[...] = alpha * acc_scr[...] + jnp.dot(
        p.astype(v_ref.dtype), v_ref[0], preferred_element_type=jnp.float32)
    m_scr[...] = m_new

    @pl.when(kv == pl.num_programs(2) - 1)
    def _finalize():
        # Exact reciprocal: runs once per q tile, negligible cost, full accuracy.
        inv_l = pl.reciprocal(l_scr[...], approx=False)
        out = acc_scr[...] * inv_l + x_ref[0].astype(jnp.float32)  # Residual2 add
        o_ref[0] = out.astype(o_ref.dtype)


def residual2(x, x2, x3, wq, wk, wv, *, tq=256, tk=256):
    """out = cross_attention(x, x2, x3; Wq, Wk, Wv) + x  (attention + residual fused)."""
    B, N, D = x.shape
    assert x2.shape == (B, N, D) and x3.shape == (B, N, D)
    assert wq.shape == (D, D) and wk.shape == (D, D) and wv.shape == (D, D)

    tq = min(tq, N)
    tk = min(tk, N)
    assert N % tq == 0 and N % tk == 0, "sequence length must divide tile sizes"

    mx_dtype = x.dtype  # native MXU dtype (bf16 stays bf16)

    # Hoisted projections: single large matmuls fill the MXU far better than
    # per-tile (tq, D) x (D, D) projections inside the kv loop.
    scale = 1.0 / jnp.sqrt(jnp.float32(D))
    q = (jnp.einsum("bnd,de->bne", x, wq,
                    preferred_element_type=jnp.float32) * scale).astype(mx_dtype)
    k = jnp.einsum("bnd,de->bne", x2, wk).astype(mx_dtype)
    v = jnp.einsum("bnd,de->bne", x3, wv).astype(mx_dtype)

    grid = (B, N // tq, N // tk)

    x_spec = pl.BlockSpec((1, tq, D), lambda b, qi, ki: (b, qi, 0))
    q_spec = pl.BlockSpec((1, tq, D), lambda b, qi, ki: (b, qi, 0))
    kv_spec = pl.BlockSpec((1, tk, D), lambda b, qi, ki: (b, ki, 0))
    o_spec = pl.BlockSpec((1, tq, D), lambda b, qi, ki: (b, qi, 0))

    return pl.pallas_call(
        _flash_residual_kernel,
        out_shape=jax.ShapeDtypeStruct((B, N, D), x.dtype),
        grid_spec=pltpu.PrefetchScalarGridSpec(
            num_scalar_prefetch=0,
            grid=grid,
            in_specs=[x_spec, q_spec, kv_spec, kv_spec],
            out_specs=o_spec,
            scratch_shapes=[
                pltpu.VMEM((tq, 1), jnp.float32),  # running max
                pltpu.VMEM((tq, 1), jnp.float32),  # running denominator
                pltpu.VMEM((tq, D), jnp.float32),  # output accumulator
            ],
        ),
        compiler_params=pltpu.CompilerParams(
            dimension_semantics=("parallel", "parallel", "arbitrary"),
            vmem_limit_bytes=48 * 1024 * 1024,  # ample headroom on every generation
        ),
    )(x, q, k, v)


def _reference(x, x2, x3, wq, wk, wv):
    # Plain-JAX reference of the same instantiation, all math in f32.
    xf, x2f, x3f = (t.astype(jnp.float32) for t in (x, x2, x3))
    q = jnp.einsum("bnd,de->bne", xf, wq.astype(jnp.float32))
    k = jnp.einsum("bnd,de->bne", x2f, wk.astype(jnp.float32))
    v = jnp.einsum("bnd,de->bne", x3f, wv.astype(jnp.float32))
    s = jnp.einsum("bnd,bmd->bnm", q, k) / jnp.sqrt(jnp.float32(q.shape[-1]))
    p = jax.nn.softmax(s, axis=-1)
    out = jnp.einsum("bnm,bmd->bnd", p, v)
    return (out + xf).astype(x.dtype)


if __name__ == "__main__":
    key = jax.random.PRNGKey(0)
    kx, kx2, kx3, kq, kk, kv_ = jax.random.split(key, 6)

    # Small but tiling-exercising shapes: with tq = tk = 256 this gives a
    # (B=2, 2, 2) grid (4 parallel steps for megacore) and a lane-dense D=128.
    B, N, D = 2, 512, 128
    x = jax.random.normal(kx, (B, N, D), dtype=jnp.bfloat16)
    x2 = jax.random.normal(kx2, (B, N, D), dtype=jnp.bfloat16)
    x3 = jax.random.normal(kx3, (B, N, D), dtype=jnp.bfloat16)

    # Deterministic "fn" parameters (synthetic; Residual2 itself has none).
    wq = (jax.random.normal(kq, (D, D), dtype=jnp.float32) * 0.1).astype(jnp.bfloat16)
    wk = (jax.random.normal(kk, (D, D), dtype=jnp.float32) * 0.1).astype(jnp.bfloat16)
    wv = (jax.random.normal(kv_, (D, D), dtype=jnp.float32) * 0.1).astype(jnp.bfloat16)

    out = jax.block_until_ready(residual2(x, x2, x3, wq, wk, wv))
    ref = _reference(x, x2, x3, wq, wk, wv)

    assert out.shape == x.shape and out.dtype == x.dtype
    # bf16 activations/weights: compare against the f32 reference with a
    # bf16-appropriate tolerance (errors would be O(1) if the kernel were wrong).
    err = jnp.max(jnp.abs(out.astype(jnp.float32) - ref.astype(jnp.float32)))
    assert jnp.allclose(out.astype(jnp.float32), ref.astype(jnp.float32),
                        atol=1e-1, rtol=5e-2), float(err)

    print("KERNEL_OK")
</pallas_src>

<mosaic_0001>
module attributes {stable_mosaic.version = 11 : i64} {
  func.func @_flash_residual_kernel(%arg0: i32, %arg1: i32, %arg2: i32, %arg3: memref<1x256x128xbf16, #tpu.memory_space<vmem>>, %arg4: memref<1x256x128xbf16, #tpu.memory_space<vmem>>, %arg5: memref<1x256x128xbf16, #tpu.memory_space<vmem>>, %arg6: memref<1x256x128xbf16, #tpu.memory_space<vmem>>, %arg7: memref<1x256x128xbf16, #tpu.memory_space<vmem>>, %arg8: memref<256x1xf32, #tpu.memory_space<vmem>>, %arg9: memref<256x1xf32, #tpu.memory_space<vmem>>, %arg10: memref<256x128xf32, #tpu.memory_space<vmem>>) attributes {dimension_semantics = [#tpu.dimension_semantics<parallel>, #tpu.dimension_semantics<parallel>, #tpu.dimension_semantics<arbitrary>], iteration_bounds = array<i64: 2, 2, 2>, scalar_prefetch = 0 : i64, scratch_operands = 3 : i64, tpu.core_type = #tpu.core_type<tc>, window_params = [{transform_indices = @transform_0, window_bounds = array<i64: 1, 256, 128>}, {transform_indices = @transform_1, window_bounds = array<i64: 1, 256, 128>}, {transform_indices = @transform_2, window_bounds = array<i64: 1, 256, 128>}, {transform_indices = @transform_3, window_bounds = array<i64: 1, 256, 128>}, {transform_indices = @transform_4, window_bounds = array<i64: 1, 256, 128>}]} {
    %c0_i32 = arith.constant 0 : i32
    %0 = arith.cmpi eq, %arg2, %c0_i32 : i32
    %1 = arith.extui %0 : i1 to i32
    %c0_i32_0 = arith.constant 0 : i32
    %2 = arith.cmpi ne, %1, %c0_i32_0 : i32
    scf.if %2 {
      %cst_25 = arith.constant 0xFF800000 : f32
      %36 = vector.broadcast %cst_25 : f32 to vector<256x1xf32>
      %c0_26 = arith.constant 0 : index
      %c0_27 = arith.constant 0 : index
      %37 = vector.load %arg8[%c0_26, %c0_27] : memref<256x1xf32, #tpu.memory_space<vmem>>, vector<256x1xf32>
      tpu.vector_store %arg8[%c0_26, %c0_27], %36 {strides = array<i32>} : memref<256x1xf32, #tpu.memory_space<vmem>>, vector<256x1xf32>,
      %cst_28 = arith.constant 0.000000e+00 : f32
      %38 = vector.broadcast %cst_28 : f32 to vector<256x1xf32>
      %c0_29 = arith.constant 0 : index
      %c0_30 = arith.constant 0 : index
      %39 = vector.load %arg9[%c0_29, %c0_30] : memref<256x1xf32, #tpu.memory_space<vmem>>, vector<256x1xf32>
      tpu.vector_store %arg9[%c0_29, %c0_30], %38 {strides = array<i32>} : memref<256x1xf32, #tpu.memory_space<vmem>>, vector<256x1xf32>,
      %cst_31 = arith.constant 0.000000e+00 : f32
      %40 = vector.broadcast %cst_31 : f32 to vector<256x128xf32>
      %c0_32 = arith.constant 0 : index
      %c0_33 = arith.constant 0 : index
      %41 = vector.load %arg10[%c0_32, %c0_33] : memref<256x128xf32, #tpu.memory_space<vmem>>, vector<256x128xf32>
      tpu.vector_store %arg10[%c0_32, %c0_33], %40 {strides = array<i32>} : memref<256x128xf32, #tpu.memory_space<vmem>>, vector<256x128xf32>,
    } else {
    }
    %c0 = arith.constant 0 : index
    %c0_1 = arith.constant 0 : index
    %c0_2 = arith.constant 0 : index
    %3 = vector.load %arg4[%c0, %c0_1, %c0_2] : memref<1x256x128xbf16, #tpu.memory_space<vmem>>, vector<1x256x128xbf16>
    %4 = vector.shape_cast %3 : vector<1x256x128xbf16> to vector<256x128xbf16>
    %c0_3 = arith.constant 0 : index
    %c0_4 = arith.constant 0 : index
    %c0_5 = arith.constant 0 : index
    %5 = vector.load %arg5[%c0_3, %c0_4, %c0_5] : memref<1x256x128xbf16, #tpu.memory_space<vmem>>, vector<1x256x128xbf16>
    %6 = vector.shape_cast %5 : vector<1x256x128xbf16> to vector<256x128xbf16>
    %cst = arith.constant dense<0.000000e+00> : vector<256x256xf32>
    %7 = tpu.matmul %4, %6, %cst {dimension_numbers = #tpu.dot_dimension_numbers<[1], [1], [0], [0], [0, 0, 1, 0], [], []>} : vector<256x128xbf16>, vector<256x128xbf16>, vector<256x256xf32> -> vector<256x256xf32>
    %c0_6 = arith.constant 0 : index
    %c0_7 = arith.constant 0 : index
    %8 = vector.load %arg8[%c0_6, %c0_7] : memref<256x1xf32, #tpu.memory_space<vmem>>, vector<256x1xf32>
    %cst_8 = arith.constant dense<0xFF800000> : vector<256xf32>
    %9 = vector.multi_reduction <maximumf>, %7, %cst_8 [1] : vector<256x256xf32> to vector<256xf32>
    %10 = vector.shape_cast %9 : vector<256xf32> to vector<256x1xf32>
    %11 = arith.maximumf %8, %10 : vector<256x1xf32>
    %12 = arith.subf %8, %11 : vector<256x1xf32>
    %13 = math.exp %12 : vector<256x1xf32>
    %14 = vector.broadcast %11 : vector<256x1xf32> to vector<256x256xf32>
    %15 = arith.subf %7, %14 : vector<256x256xf32>
    %16 = math.exp %15 : vector<256x256xf32>
    %c0_9 = arith.constant 0 : index
    %c0_10 = arith.constant 0 : index
    %17 = vector.load %arg9[%c0_9, %c0_10] : memref<256x1xf32, #tpu.memory_space<vmem>>, vector<256x1xf32>
    %18 = arith.mulf %13, %17 : vector<256x1xf32>
    %cst_11 = arith.constant dense<0.000000e+00> : vector<256xf32>
    %19 = vector.multi_reduction <add>, %16, %cst_11 [1] : vector<256x256xf32> to vector<256xf32>
    %20 = vector.shape_cast %19 : vector<256xf32> to vector<256x1xf32>
    %21 = arith.addf %18, %20 : vector<256x1xf32>
    %c0_12 = arith.constant 0 : index
    %c0_13 = arith.constant 0 : index
    %22 = vector.load %arg9[%c0_12, %c0_13] : memref<256x1xf32, #tpu.memory_space<vmem>>, vector<256x1xf32>
    tpu.vector_store %arg9[%c0_12, %c0_13], %21 {strides = array<i32>} : memref<256x1xf32, #tpu.memory_space<vmem>>, vector<256x1xf32>,
    %c0_14 = arith.constant 0 : index
    %c0_15 = arith.constant 0 : index
    %23 = vector.load %arg10[%c0_14, %c0_15] : memref<256x128xf32, #tpu.memory_space<vmem>>, vector<256x128xf32>
    %24 = vector.broadcast %13 : vector<256x1xf32> to vector<256x128xf32>
    %25 = arith.mulf %24, %23 : vector<256x128xf32>
    %26 = arith.truncf %16 : vector<256x256xf32> to vector<256x256xbf16>
    %c0_16 = arith.constant 0 : index
    %c0_17 = arith.constant 0 : index
    %c0_18 = arith.constant 0 : index
    %27 = vector.load %arg6[%c0_16, %c0_17, %c0_18] : memref<1x256x128xbf16, #tpu.memory_space<vmem>>, vector<1x256x128xbf16>
    %28 = vector.shape_cast %27 : vector<1x256x128xbf16> to vector<256x128xbf16>
    %cst_19 = arith.constant dense<0.000000e+00> : vector<256x128xf32>
    %29 = tpu.matmul %26, %28, %cst_19 {dimension_numbers = #tpu.dot_dimension_numbers<[1], [0], [0], [1], [0, 0, 1, 1], [], []>} : vector<256x256xbf16>, vector<256x128xbf16>, vector<256x128xf32> -> vector<256x128xf32>
    %30 = arith.addf %25, %29 : vector<256x128xf32>
    %c0_20 = arith.constant 0 : index
    %c0_21 = arith.constant 0 : index
    %31 = vector.load %arg10[%c0_20, %c0_21] : memref<256x128xf32, #tpu.memory_space<vmem>>, vector<256x128xf32>
    tpu.vector_store %arg10[%c0_20, %c0_21], %30 {strides = array<i32>} : memref<256x128xf32, #tpu.memory_space<vmem>>, vector<256x128xf32>,
    %c0_22 = arith.constant 0 : index
    %c0_23 = arith.constant 0 : index
    %32 = vector.load %arg8[%c0_22, %c0_23] : memref<256x1xf32, #tpu.memory_space<vmem>>, vector<256x1xf32>
    tpu.vector_store %arg8[%c0_22, %c0_23], %11 {strides = array<i32>} : memref<256x1xf32, #tpu.memory_space<vmem>>, vector<256x1xf32>,
    %c1_i32 = arith.constant 1 : i32
    %33 = arith.cmpi eq, %arg2, %c1_i32 : i32
    %34 = arith.extui %33 : i1 to i32
    %c0_i32_24 = arith.constant 0 : i32
    %35 = arith.cmpi ne, %34, %c0_i32_24 : i32
    scf.if %35 {
      %c0_25 = arith.constant 0 : index
      %c0_26 = arith.constant 0 : index
      %36 = vector.load %arg9[%c0_25, %c0_26] : memref<256x1xf32, #tpu.memory_space<vmem>>, vector<256x1xf32>
      %37 = tpu.reciprocal %36 : vector<256x1xf32> -> vector<256x1xf32>
      %c0_27 = arith.constant 0 : index
      %c0_28 = arith.constant 0 : index
      %38 = vector.load %arg10[%c0_27, %c0_28] : memref<256x128xf32, #tpu.memory_space<vmem>>, vector<256x128xf32>
      %39 = vector.broadcast %37 : vector<256x1xf32> to vector<256x128xf32>
      %40 = arith.mulf %38, %39 : vector<256x128xf32>
      %c0_29 = arith.constant 0 : index
      %c0_30 = arith.constant 0 : index
      %c0_31 = arith.constant 0 : index
      %41 = vector.load %arg3[%c0_29, %c0_30, %c0_31] : memref<1x256x128xbf16, #tpu.memory_space<vmem>>, vector<1x256x128xbf16>
      %42 = vector.shape_cast %41 : vector<1x256x128xbf16> to vector<256x128xbf16>
      %43 = arith.extf %42 : vector<256x128xbf16> to vector<256x128xf32>
      %44 = arith.addf %40, %43 : vector<256x128xf32>
      %45 = arith.truncf %44 : vector<256x128xf32> to vector<256x128xbf16>
      %c0_32 = arith.constant 0 : index
      %c0_33 = arith.constant 0 : index
      %c0_34 = arith.constant 0 : index
      %46 = vector.load %arg7[%c0_32, %c0_33, %c0_34] : memref<1x256x128xbf16, #tpu.memory_space<vmem>>, vector<1x256x128xbf16>
      %47 = vector.shape_cast %46 : vector<1x256x128xbf16> to vector<256x128xbf16>
      %48 = vector.shape_cast %45 : vector<256x128xbf16> to vector<1x256x128xbf16>
      tpu.vector_store %arg7[%c0_32, %c0_33, %c0_34], %48 {strides = array<i32>} : memref<1x256x128xbf16, #tpu.memory_space<vmem>>, vector<1x256x128xbf16>,
    } else {
    }
    return
  }
  func.func @transform_0(%arg0: i32, %arg1: i32, %arg2: i32) -> (i32, i32, i32) {
    %c0_i32 = arith.constant 0 : i32
    %c0_i32_0 = arith.constant 0 : i32
    return %arg0, %arg1, %c0_i32 : i32, i32, i32
  }
  func.func @transform_1(%arg0: i32, %arg1: i32, %arg2: i32) -> (i32, i32, i32) {
    %c0_i32 = arith.constant 0 : i32
    %c0_i32_0 = arith.constant 0 : i32
    return %arg0, %arg1, %c0_i32 : i32, i32, i32
  }
  func.func @transform_2(%arg0: i32, %arg1: i32, %arg2: i32) -> (i32, i32, i32) {
    %c0_i32 = arith.constant 0 : i32
    %c0_i32_0 = arith.constant 0 : i32
    return %arg0, %arg2, %c0_i32 : i32, i32, i32
  }
  func.func @transform_3(%arg0: i32, %arg1: i32, %arg2: i32) -> (i32, i32, i32) {
    %c0_i32 = arith.constant 0 : i32
    %c0_i32_0 = arith.constant 0 : i32
    return %arg0, %arg2, %c0_i32 : i32, i32, i32
  }
  func.func @transform_4(%arg0: i32, %arg1: i32, %arg2: i32) -> (i32, i32, i32) {
    %c0_i32 = arith.constant 0 : i32
    %c0_i32_0 = arith.constant 0 : i32
    return %arg0, %arg1, %c0_i32 : i32, i32, i32
  }
}

</mosaic_0001>

<bundles_post_ra>
// kernel: tpu_custom_call.1
= control target key start
LH: loop header
LB: loop body
LE: loop exit
PB: predicated region body
PF: predicated region fallthrough
CT: control target
= control target key end

     0   :  { %s5938_s0 = inlined_call_operand.hbm [shape: bf16[2,512,128], index: 0, kind: input, shape index: {}]   ;;  %s5939_s1 = inlined_call_operand.hbm [shape: bf16[2,512,128], index: 1, kind: input, shape index: {}]   ;;  %s5940_s2 = inlined_call_operand.hbm [shape: bf16[2,512,128], index: 2, kind: input, shape index: {}]   ;;  %s5941_s3 = inlined_call_operand.hbm [shape: bf16[2,512,128], index: 3, kind: input, shape index: {}]   ;;  %s5942_s4 = inlined_call_operand.hbm [shape: bf16[2,512,128], index: 4, kind: output, shape index: {}]  }
   0x1   :  { %6052 = sst [smem:[#allocation104_spill]] %s5938_s0 }
   0x2   :  { %6053 = sst [smem:[#allocation105_spill]] %s5939_s1 }
   0x3   :  { %6054 = sst [smem:[#allocation106_spill]] %s5942_s4 }
   0x4   :  { %9 = vsyncpa [#allocation6], 0 }
   0x5   :  { %11 = vsyncpa [#allocation6 + $0x1], 0 }
   0x6   :  { %12 = vsyncpa [#allocation9], 0 }
   0x7   :  { %14 = vsyncpa [#allocation9 + $0x1], 0 }
   0x8   :  { %15 = vsyncpa [#allocation12], 0 }
   0x9   :  { %17 = vsyncpa [#allocation12 + $0x1], 0 }
   0xa   :  { %18 = vsyncpa [#allocation7], 0 }
   0xb   :  { %20 = vsyncpa [#allocation7 + $0x1], 0  ;;  %s4364_s15 = smov 0   ;;  %s4366_s16 = smov 0  }
   0xc   :  { %s4368_s17 = smov 0   ;;  %s4370_s18 = smov 0  }
   0xd   :  { %s4372_s19 = smov 0   ;;  %s4374_s20 = smov 0  }
   0xe   :  { %s4376_s21 = smov 0   ;;  %s4378_s22 = smov 0  }
   0xf   :  { %s4380_s23 = smov 0   ;;  %s4382_s24 = smov 0  }
  0x10   :  { %s4384_s25 = smov 0   ;;  %s4386_s26 = smov 0  }
  0x11   :  { %s4388_s27 = smov 0  }
  0x12 LB: > { %6055 = sst [smem:[#allocation19_spill]] %s4288_s18  ;;  %s4430_s28 = sadd.s32 4294967295, %s4324_s27   ;;  %s4324_s27 = sphi %s4388_s27, %s26_s27   ;;  %s4320_s26 = sphi %s4386_s26, %s6318_s26   ;;  %s4316_s25 = sphi %s4384_s25, %s6317_s25   ;;  %s4312_s24 = sphi %s4382_s24, %s6316_s24   ;;  %s4308_s23 = sphi %s4380_s23, %s6315_s23   ;;  %s4304_s22 = sphi %s4378_s22, %s6314_s22   ;;  %s4300_s21 = sphi %s4376_s21, %s6326_s21   ;;  %s4296_s20 = sphi %s4374_s20, %s6325_s20   ;;  %s4292_s19 = sphi %s4372_s19, %s6324_s19   ;;  %s4288_s18 = sphi %s4370_s18, %s6323_s18   ;;  %s4284_s17 = sphi %s4368_s17, %s6322_s17   ;;  %s4280_s16 = sphi %s4366_s16, %s6321_s16   ;;  %s4276_s15 = sphi %s4364_s15, %s6320_s15  }
  0x13   : > { %6056 = sst [smem:[#allocation20_spill]] %s4300_s21  ;;  %s3136_s29 = sadd.s32 4294967294, %s4324_s27  }
  0x14   : > { %6057 = sst [smem:[#allocation21_spill]] %s4304_s22  ;;  %s38_s30 = sadd.s32 1, %s4312_s24 }
  0x15   : > { %6058 = sst [smem:[#allocation22_spill]] %s4308_s23  ;;  %s41_s5 = sadd.s32 1, %s4316_s25 }
  0x16   : > { %6059 = sst [smem:[#allocation23_spill]] %s4312_s24  ;;  %p39_p0 = scmp.ge.s32.totalorder %s38_s30, 2 }
  0x17   : > { %6060 = sst [smem:[#allocation24_spill]] %s4316_s25  ;;  %s45_s6 = sadd.s32 1, %s4320_s26 }
  0x18   : > { %6061 = sst [smem:[#allocation25_spill]] %s4320_s26  ;;  %s54_s7 = sadd.s32 1, %s4296_s20 }
  0x19   : > { %p61_p1 = scmp.ne.s32.totalorder %s4296_s20, %s4292_s19  ;;  %s6328_s30 = smov (%p39_p0, %s38_s30), 0 }
  0x1a   : > { %6062 = sst [smem:[#allocation26_spill]] %s6328_s30  ;;  %s6330_s5 = smov (!%p39_p0, %s41_s5), %s4316_s25 }
  0x1b   : > { %p5959_p2 = scmp.eq.s32.totalorder %s4324_s27, 0  ;;  %p67_p3 = scmp.ne.s32.totalorder %s4292_s19, %s4288_s18 }
  0x1c   : > { %p43_p4 = scmp.ge.s32.totalorder %s6330_s5, 2  ;;  %p5955_p5 = scmp.eq.s32.totalorder %s4430_s28, 0 }
  0x1d   : > { %p4451_p6 = por %p5959_p2, %p61_p1  ;;  %s106_s9 = ssub.s32 %s4312_s24, %s6328_s30 }
  0x1e   : > { %s6332_s5 = smov (%p43_p4, %s6330_s5), 0  ;;  %s6334_s6 = smov (!%p43_p4, %s45_s6), %s4320_s26 }
  0x1f   : > { %6064 = sst [smem:[#allocation27_spill]] %s6332_s5  ;;  %s50_s10 = ssub.s32 %s4316_s25, %s6332_s5 }
  0x20   : > { %p4467_p7 = por %p5955_p5, %p67_p3  ;;  %p47_p8 = scmp.ge.s32.totalorder %s6334_s6, 2 }
  0x21   : > { %p177_p9 = scmp.eq.s32.totalorder %s4430_s28, 7  ;;  %p183_p10 = scmp.eq.s32.totalorder %s3136_s29, 7 }
  0x22   : > { %s6065_s11 = scalar_select %p4467_p7, 1, 0 }
  0x23   : > { %s6336_s6 = smov (%p47_p8, %s6334_s6), 0  ;;  %p4477_p11 = por %p177_p9, %p61_p1 }
  0x24   : > { %6066 = sst [smem:[#allocation28_spill]] %s6065_s11  ;;  %p4484_p12 = por %p183_p10, %p67_p3 }
  0x25   : > { %6067 = sst [smem:[#allocation29_spill]] %s6336_s6  ;;  %s49_s14 = ssub.s32 %s4320_s26, %s6336_s6 }
  0x26   : > { %s6068_s12 = scalar_select %p4477_p11, 1, 0 }
  0x27   : > { %s6070_s13 = scalar_select %p4484_p12, 1, 0 }
  0x28   : > { %6069 = sst [smem:[#allocation30_spill]] %s6068_s12  ;;  %p5954_p13 = scmp.lt.s32.totalorder %s4324_s27, 8 }
  0x29   : > { %6071 = sst [smem:[#allocation31_spill]] %s6070_s13  ;;  %s51_s5 = sor.u32 %s50_s10, %s49_s14 }
  0x2a   : > { %s4491_s29 = sor.u32 %s106_s9, %s49_s14  ;;  %p52_p0 = scmp.eq.s32.totalorder %s51_s5, 0 }
  0x2b   : > { %p108_p4 = scmp.eq.s32.totalorder %s4491_s29, 0  ;;  %s5949_s30 = sand.u32 1, %s4296_s20  }
  0x2c   : > { %s3140_s4 = sshll.u32 %s4316_s25, 5  ;;  %s4501_s18 = sshll.u32 %s5949_s30, 7 }
  0x2d   : > { %s4497_s23 = scalar_select %p52_p0, %s4296_s20, %s54_s7  }
  0x2e   : > { %s3141_s12 = sshll.u32 %s4320_s26, 6  ;;  %p4510_p1 = pnand %p5954_p13, %p4451_p6 }
  0x2f   : > { %6072 = sst [smem:[#allocation32_spill]] %s4497_s23  ;;  %s4504_s22 = sadd.s32 %s3141_s12, %s3140_s4 }
  0x30   : > { %s3142_s5 = sshll.u32 %s4504_s22, 6  ;;  %s226_s7 = sand.u32 1, %s4324_s27  }
  0x31   : > { %s6074_s1 = sld [smem:[#allocation105_spill]]  ;;  %s230_s6 = scalar_lea.vmem [#allocation8], %s4501_s18 }
  0x32   : > { %s239_s4 = sshll.u32 %s230_s6, 4  ;;  %s3148_s26 = sshll.u32 %s4312_s24, 5  ;;  %s240_s4 = int_to_ptr.vmem [resolvable:$true] %s239_s4 }
  0x33   : > { %s4523_s8 = sadd.s32 %s3148_s26, %s3141_s12  ;;  %s4525_s25 = scalar_lea.sflag [#allocation9], %s226_s7 }
  0x34   : > { %p4066_p3 = pneg %p4510_p1  ;;  %s4077_s23 = scalar_lea.vmem %s240_s4, 2048 }
  0x35   : > { %p4078_p6 = scmp.ne.s32.totalorder %s240_s4, %s4077_s23  ;;  %s4326_s13 = smov [#allocation8]  }
  0x36   : > { %s4082_s21 = sshll.u32 %s4326_s13, 4  ;;  %s4083_s21 = int_to_ptr.vmem [resolvable:$false] %s4082_s21 }
  0x37   : > { %s238_s30 = scalar_lea.hbm %s6074_s1, %s3142_s5  ;;  %p4080_p8 = pnand %p4078_p6, %p4066_p3 }
  0x38   : > { %s4084_s10 = scalar_lea.vmem %s4083_s21, 4096  ;;  %p4085_p10 = scmp.lt.s32.totalorder %s240_s4, %s4083_s21 }
  0x39   : > { %p4081_p9 = pneg %p4080_p8  ;;  %p4086_p0 = scmp.lt.s32.totalorder %s4084_s10, %s4077_s23 }
  0x3b   : > { %p4087_p13 = por %p4086_p0, %p4085_p10 }
  0x3d   : > { %p4088_p5 = pnand %p4087_p13, %p4081_p9 }
  0x3f   : > { %4091 = shalt.err (!%p4088_p5)
}
  0x40   : > { %s4327_s26 = smov 64   ;;  %s4328_s6 = smov 4  }
  0x41   : > { %3631 = dma.hbm_to_vmem [thread:$0]  (!%p4510_p1), %s238_s30, 2048, %s240_s4, %s4525_s25, %s4327_s26, %s4327_s26, %s4328_s6  }
  0x42   : > { %p3155_p6 = scmp.ge.s32.totalorder %s4324_s27, 1  ;;  %p293_p13 = scmp.lt.s32.totalorder %s4324_s27, 9 }
  0x43   : > { %s6076_s0 = sld [smem:[#allocation104_spill]]  ;;  %s207_s14 = scalar_lea.vmem [#allocation5], %s4501_s18 }
  0x44   : > { %p4541_p5 = pnand %p3155_p6, %p293_p13  ;;  %s216_s10 = sshll.u32 %s207_s14, 4  ;;  %s217_s10 = int_to_ptr.vmem [resolvable:$true] %s216_s10 }
  0x45   : > { %s6077_s1 = sand.u32 1, %s4296_s20   ;;  %s4105_s11 = scalar_lea.vmem %s217_s10, 2048 }
  0x46   : > { %s204_s24 = scalar_lea.sflag [#allocation6], %s6077_s1  ;;  %p4106_p8 = scmp.ne.s32.totalorder %s217_s10, %s4105_s11 }
  0x47   : > { %s4329_s30 = smov [#allocation5]  }
  0x48   : > { %p4108_p9 = pnand %p4106_p8, %p4066_p3  ;;  %s4110_s4 = sshll.u32 %s4329_s30, 4  ;;  %s4111_s4 = int_to_ptr.vmem [resolvable:$false] %s4110_s4 }
  0x49   : > { %s215_s7 = scalar_lea.hbm %s6076_s0, %s3142_s5  ;;  %s4112_s21 = scalar_lea.vmem %s4111_s4, 4096 }
  0x4a   : > { %p4109_p10 = pneg %p4108_p9  ;;  %p4113_p0 = scmp.lt.s32.totalorder %s217_s10, %s4111_s4 }
  0x4b   : > { %p4114_p6 = scmp.lt.s32.totalorder %s4112_s21, %s4105_s11 }
  0x4d   : > { %p4115_p13 = por %p4114_p6, %p4113_p0 }
  0x4f   : > { %p4116_p2 = pnand %p4115_p13, %p4109_p10 }
  0x51   : > { %4119 = shalt.err (!%p4116_p2)
}
  0x52   : > { %3628 = dma.hbm_to_vmem [thread:$0]  (!%p4510_p1), %s215_s7, 2048, %s217_s10, %s204_s24, %s4327_s26, %s4327_s26, %s4328_s6  }
  0x53   : > { %s110_s1 = sadd.s32 1, %s4284_s17  ;;  %p117_p2 = scmp.ne.s32.totalorder %s4284_s17, %s4280_s16 }
  0x54   : > { %s4565_s18 = scalar_select %p108_p4, %s4284_s17, %s110_s1  }
  0x55   : > { %p123_p3 = scmp.ne.s32.totalorder %s4280_s16, %s4276_s15  ;;  %s251_s22 = sand.u32 1, %s4284_s17  }
  0x56   : > { %s6078_s11 = sshll.u32 %s4523_s8, 6  ;;  %p6079_p8 = scmp.eq.s32.totalorder %s4324_s27, 0 }
  0x57   : > { %s261_s21 = scalar_lea.hbm %s5940_s2, %s6078_s11  ;;  %p6080_p10 = scmp.eq.s32.totalorder %s4430_s28, 0 }
  0x58   : > { %p119_p9 = por %p117_p2, %p6079_p8  ;;  %s3147_s24 = sshll.u32 %s251_s22, 7 }
  0x59   : > { %p4581_p0 = por %p123_p3, %p6080_p10  ;;  %p6082_p1 = scmp.lt.s32.totalorder %s4324_s27, 8 }
  0x5a   : > { %s253_s15 = scalar_lea.vmem [#allocation10], %s3147_s24  ;;  %s4330_s14 = smov [#allocation10]  }
  0x5b   : > { %p4587_p6 = pnand %p6082_p1, %p119_p9  ;;  %s262_s13 = sshll.u32 %s253_s15, 4  ;;  %s263_s13 = int_to_ptr.vmem [resolvable:$true] %s262_s13 }
  0x5c   : > { %s4133_s7 = scalar_lea.vmem %s263_s13, 2048  ;;  %s4138_s10 = sshll.u32 %s4330_s14, 4  ;;  %s4139_s10 = int_to_ptr.vmem [resolvable:$false] %s4138_s10 }
  0x5d   : > { %p4122_p4 = pneg %p4587_p6  ;;  %p4134_p13 = scmp.ne.s32.totalorder %s263_s13, %s4133_s7 }
  0x5e   : > { %s4140_s30 = scalar_lea.vmem %s4139_s10, 4096  ;;  %p4141_p8 = scmp.lt.s32.totalorder %s263_s13, %s4139_s10 }
  0x5f   : > { %p4136_p2 = pnand %p4134_p13, %p4122_p4  ;;  %p4142_p9 = scmp.lt.s32.totalorder %s4140_s30, %s4133_s7 }
  0x61   : > { %p4137_p3 = pneg %p4136_p2  ;;  %p4143_p10 = por %p4142_p9, %p4141_p8 }
  0x63   : > { %p4144_p1 = pnand %p4143_p10, %p4137_p3 }
  0x65   : > { %4147 = shalt.err (!%p4144_p1)
}
  0x66   : > { %3634 = dma.hbm_to_vmem [thread:$0]  (!%p4587_p6), %s261_s21, 2048, %s263_s13, %s4525_s25, %s4327_s26, %s4327_s26, %s4328_s6  }
  0x67   : > { %s6084_s4 = smov %s6078_s11  ;;  %s276_s5 = scalar_lea.vmem [#allocation11], %s3147_s24 }
  0x68   : > { %s284_s9 = scalar_lea.hbm %s5941_s3, %s6084_s4  ;;  %s285_s15 = sshll.u32 %s276_s5, 4  ;;  %s286_s15 = int_to_ptr.vmem [resolvable:$true] %s285_s15 }
  0x69   : > { %s273_s7 = scalar_lea.sflag [#allocation12], %s251_s22  ;;  %s4161_s14 = scalar_lea.vmem %s286_s15, 2048 }
  0x6a   : > { %p4162_p13 = scmp.ne.s32.totalorder %s286_s15, %s4161_s14  ;;  %s4331_s10 = smov [#allocation11]  }
  0x6b   : > { %s4166_s30 = sshll.u32 %s4331_s10, 4  ;;  %s4167_s30 = int_to_ptr.vmem [resolvable:$false] %s4166_s30 }
  0x6c   : > { %p4164_p2 = pnand %p4162_p13, %p4122_p4  ;;  %s4168_s0 = scalar_lea.vmem %s4167_s30, 4096 }
  0x6d   : > { %p4169_p8 = scmp.lt.s32.totalorder %s286_s15, %s4167_s30  ;;  %p4170_p9 = scmp.lt.s32.totalorder %s4168_s0, %s4161_s14 }
  0x6e   : > { %p4165_p3 = pneg %p4164_p2 }
  0x6f   : > { %p4171_p10 = por %p4170_p9, %p4169_p8 }
  0x71   : > { %p4172_p1 = pnand %p4171_p10, %p4165_p3 }
  0x73   : > { %4175 = shalt.err (!%p4172_p1)
}
  0x74   : > { %3637 = dma.hbm_to_vmem [thread:$0]  (!%p4587_p6), %s284_s9, 2048, %s286_s15, %s273_s7, %s4327_s26, %s4327_s26, %s4328_s6  }
  0x75   : > { %297 = sbr.rel (%p4541_p5) target bundleno = 1404 (0x57c), region = 36 }
  0x7a   : > { %s4618_s8 = sand.u32 1, %s4292_s19  }
  0x7b   : > { %s3156_s22 = sshll.u32 %s4618_s8, 7  ;;  %s300_s0 = scalar_lea.sflag [#allocation6], %s4618_s8 }
  0x7c   : > { %s4622_s21 = scalar_lea.vmem [#allocation5], %s3156_s22 }
  0x7d   : > { %4255 = dma.done.wait (%p4467_p7), %s300_s0, 2048  }
  0x7e   : > { %4257 = vsyncadd (%p4467_p7), %s300_s0, 4294965248  ;;  %s308_s26 = sand.u32 1, %s4430_s28   ;;  %s4629_s23 = scalar_lea.vmem [#allocation8], %s3156_s22 }
  0x7f   : > { %s309_s6 = scalar_lea.sflag [#allocation9], %s308_s26 }
  0x80   : > { %4259 = dma.done.wait (%p4467_p7), %s309_s6, 2048  }
  0x81   : > { %4261 = vsyncadd (%p4467_p7), %s309_s6, 4294965248  ;;  %s319_s24 = sand.u32 1, %s4280_s16  }
  0x82   : > { %s3158_s29 = sshll.u32 %s319_s24, 7 }
  0x83   : > { %s4636_s13 = scalar_lea.vmem [#allocation10], %s3158_s29 }
  0x84   : > { %4263 = dma.done.wait (%p4581_p0), %s309_s6, 2048  }
  0x85   : > { %4265 = vsyncadd (%p4581_p0), %s309_s6, 4294965248  ;;  %s327_s28 = scalar_lea.sflag [#allocation12], %s319_s24  ;;  %s4642_s4 = scalar_lea.vmem [#allocation11], %s3158_s29 }
  0x86   : > { %4267 = dma.done.wait (%p4581_p0), %s327_s28, 2048  }
  0x87   : > { %4269 = vsyncadd (%p4581_p0), %s327_s28, 4294965248  ;;  %s4648_s1 = scalar_lea.vmem [#allocation13], %s3156_s22  ;;  %s6086_s11 = sld [smem:[#allocation20_spill]] }
  0x8d   : > { %p3161_p7 = scmp.ne.s32.totalorder %s6086_s11, 0 }
  0x8f   : > { %379 = sbr.rel (%p3161_p7) target bundleno = 197 (0xc5), region = 56 }
  0x94   : > { %vm380_vm0 = vcmask 7168   ;;  %v4332_v0 = vmov -inf   ;;  %v4333_v1 = vmov 0.0  }
  0x95   : > { %381 = vst.msk [vmem:[#allocation2] sm:$0xff] %vm380_vm0, %v4332_v0  ;;  %382 = vst.msk [vmem:[#allocation2 + $0x8] sm:$0xff] %vm380_vm0, %v4332_v0 }
  0x96   : > { %383 = vst.msk [vmem:[#allocation2 + $0x10] sm:$0xff] %vm380_vm0, %v4332_v0  ;;  %384 = vst.msk [vmem:[#allocation2 + $0x18] sm:$0xff] %vm380_vm0, %v4332_v0 }
  0x97   : > { %385 = vst.msk [vmem:[#allocation2 + $0x20] sm:$0xff] %vm380_vm0, %v4332_v0  ;;  %386 = vst.msk [vmem:[#allocation2 + $0x28] sm:$0xff] %vm380_vm0, %v4332_v0 }
  0x98   : > { %387 = vst.msk [vmem:[#allocation2 + $0x30] sm:$0xff] %vm380_vm0, %v4332_v0  ;;  %388 = vst.msk [vmem:[#allocation2 + $0x38] sm:$0xff] %vm380_vm0, %v4332_v0 }
  0x99   : > { %389 = vst.msk [vmem:[#allocation2 + $0x40] sm:$0xff] %vm380_vm0, %v4332_v0  ;;  %390 = vst.msk [vmem:[#allocation2 + $0x48] sm:$0xff] %vm380_vm0, %v4332_v0 }
  0x9a   : > { %391 = vst.msk [vmem:[#allocation2 + $0x50] sm:$0xff] %vm380_vm0, %v4332_v0  ;;  %392 = vst.msk [vmem:[#allocation2 + $0x58] sm:$0xff] %vm380_vm0, %v4332_v0 }
  0x9b   : > { %393 = vst.msk [vmem:[#allocation2 + $0x60] sm:$0xff] %vm380_vm0, %v4332_v0  ;;  %394 = vst.msk [vmem:[#allocation2 + $0x68] sm:$0xff] %vm380_vm0, %v4332_v0 }
  0x9c   : > { %395 = vst.msk [vmem:[#allocation2 + $0x70] sm:$0xff] %vm380_vm0, %v4332_v0  ;;  %396 = vst.msk [vmem:[#allocation2 + $0x78] sm:$0xff] %vm380_vm0, %v4332_v0 }
  0x9d   : > { %397 = vst.msk [vmem:[#allocation2 + $0x80] sm:$0xff] %vm380_vm0, %v4332_v0  ;;  %398 = vst.msk [vmem:[#allocation2 + $0x88] sm:$0xff] %vm380_vm0, %v4332_v0 }
  0x9e   : > { %399 = vst.msk [vmem:[#allocation2 + $0x90] sm:$0xff] %vm380_vm0, %v4332_v0  ;;  %400 = vst.msk [vmem:[#allocation2 + $0x98] sm:$0xff] %vm380_vm0, %v4332_v0 }
  0x9f   : > { %401 = vst.msk [vmem:[#allocation2 + $0xa0] sm:$0xff] %vm380_vm0, %v4332_v0  ;;  %402 = vst.msk [vmem:[#allocation2 + $0xa8] sm:$0xff] %vm380_vm0, %v4332_v0 }
  0xa0   : > { %403 = vst.msk [vmem:[#allocation2 + $0xb0] sm:$0xff] %vm380_vm0, %v4332_v0  ;;  %404 = vst.msk [vmem:[#allocation2 + $0xb8] sm:$0xff] %vm380_vm0, %v4332_v0 }
  0xa1   : > { %405 = vst.msk [vmem:[#allocation2 + $0xc0] sm:$0xff] %vm380_vm0, %v4332_v0  ;;  %406 = vst.msk [vmem:[#allocation2 + $0xc8] sm:$0xff] %vm380_vm0, %v4332_v0 }
  0xa2   : > { %407 = vst.msk [vmem:[#allocation2 + $0xd0] sm:$0xff] %vm380_vm0, %v4332_v0  ;;  %408 = vst.msk [vmem:[#allocation2 + $0xd8] sm:$0xff] %vm380_vm0, %v4332_v0 }
  0xa3   : > { %409 = vst.msk [vmem:[#allocation2 + $0xe0] sm:$0xff] %vm380_vm0, %v4332_v0  ;;  %410 = vst.msk [vmem:[#allocation2 + $0xe8] sm:$0xff] %vm380_vm0, %v4332_v0 }
  0xa4   : > { %411 = vst.msk [vmem:[#allocation2 + $0xf0] sm:$0xff] %vm380_vm0, %v4332_v0  ;;  %412 = vst.msk [vmem:[#allocation2 + $0xf8] sm:$0xff] %vm380_vm0, %v4332_v0 }
  0xa5   : > { %413 = vst.msk [vmem:[#allocation3] sm:$0xff] %vm380_vm0, %v4333_v1  ;;  %414 = vst.msk [vmem:[#allocation3 + $0x8] sm:$0xff] %vm380_vm0, %v4333_v1 }
  0xa6   : > { %415 = vst.msk [vmem:[#allocation3 + $0x10] sm:$0xff] %vm380_vm0, %v4333_v1  ;;  %416 = vst.msk [vmem:[#allocation3 + $0x18] sm:$0xff] %vm380_vm0, %v4333_v1 }
  0xa7   : > { %417 = vst.msk [vmem:[#allocation3 + $0x20] sm:$0xff] %vm380_vm0, %v4333_v1  ;;  %418 = vst.msk [vmem:[#allocation3 + $0x28] sm:$0xff] %vm380_vm0, %v4333_v1 }
  0xa8   : > { %419 = vst.msk [vmem:[#allocation3 + $0x30] sm:$0xff] %vm380_vm0, %v4333_v1  ;;  %420 = vst.msk [vmem:[#allocation3 + $0x38] sm:$0xff] %vm380_vm0, %v4333_v1 }
  0xa9   : > { %421 = vst.msk [vmem:[#allocation3 + $0x40] sm:$0xff] %vm380_vm0, %v4333_v1  ;;  %422 = vst.msk [vmem:[#allocation3 + $0x48] sm:$0xff] %vm380_vm0, %v4333_v1 }
  0xaa   : > { %423 = vst.msk [vmem:[#allocation3 + $0x50] sm:$0xff] %vm380_vm0, %v4333_v1  ;;  %424 = vst.msk [vmem:[#allocation3 + $0x58] sm:$0xff] %vm380_vm0, %v4333_v1 }
  0xab   : > { %425 = vst.msk [vmem:[#allocation3 + $0x60] sm:$0xff] %vm380_vm0, %v4333_v1  ;;  %426 = vst.msk [vmem:[#allocation3 + $0x68] sm:$0xff] %vm380_vm0, %v4333_v1 }
  0xac   : > { %427 = vst.msk [vmem:[#allocation3 + $0x70] sm:$0xff] %vm380_vm0, %v4333_v1  ;;  %428 = vst.msk [vmem:[#allocation3 + $0x78] sm:$0xff] %vm380_vm0, %v4333_v1 }
  0xad   : > { %429 = vst.msk [vmem:[#allocation3 + $0x80] sm:$0xff] %vm380_vm0, %v4333_v1  ;;  %430 = vst.msk [vmem:[#allocation3 + $0x88] sm:$0xff] %vm380_vm0, %v4333_v1 }
  0xae   : > { %431 = vst.msk [vmem:[#allocation3 + $0x90] sm:$0xff] %vm380_vm0, %v4333_v1  ;;  %432 = vst.msk [vmem:[#allocation3 + $0x98] sm:$0xff] %vm380_vm0, %v4333_v1 }
  0xaf   : > { %433 = vst.msk [vmem:[#allocation3 + $0xa0] sm:$0xff] %vm380_vm0, %v4333_v1  ;;  %434 = vst.msk [vmem:[#allocation3 + $0xa8] sm:$0xff] %vm380_vm0, %v4333_v1 }
  0xb0   : > { %435 = vst.msk [vmem:[#allocation3 + $0xb0] sm:$0xff] %vm380_vm0, %v4333_v1  ;;  %436 = vst.msk [vmem:[#allocation3 + $0xb8] sm:$0xff] %vm380_vm0, %v4333_v1 }
  0xb1   : > { %437 = vst.msk [vmem:[#allocation3 + $0xc0] sm:$0xff] %vm380_vm0, %v4333_v1  ;;  %438 = vst.msk [vmem:[#allocation3 + $0xc8] sm:$0xff] %vm380_vm0, %v4333_v1 }
  0xb2   : > { %439 = vst.msk [vmem:[#allocation3 + $0xd0] sm:$0xff] %vm380_vm0, %v4333_v1  ;;  %440 = vst.msk [vmem:[#allocation3 + $0xd8] sm:$0xff] %vm380_vm0, %v4333_v1 }
  0xb3   : > { %441 = vst.msk [vmem:[#allocation3 + $0xe0] sm:$0xff] %vm380_vm0, %v4333_v1  ;;  %442 = vst.msk [vmem:[#allocation3 + $0xe8] sm:$0xff] %vm380_vm0, %v4333_v1 }
  0xb4   : > { %443 = vst.msk [vmem:[#allocation3 + $0xf0] sm:$0xff] %vm380_vm0, %v4333_v1  ;;  %444 = vst.msk [vmem:[#allocation3 + $0xf8] sm:$0xff] %vm380_vm0, %v4333_v1 }
  0xb5   : > { %445 = vst [vmem:[#allocation4 + $0xb0] sm:$0xff] %v4333_v1  ;;  %446 = vst [vmem:[#allocation4] sm:$0xff] %v4333_v1 }
  0xb6   : > { %447 = vst [vmem:[#allocation4 + $0xd8] sm:$0xff] %v4333_v1  ;;  %448 = vst [vmem:[#allocation4 + $0x18] sm:$0xff] %v4333_v1 }
  0xb7   : > { %449 = vst [vmem:[#allocation4 + $0x50] sm:$0xff] %v4333_v1  ;;  %450 = vst [vmem:[#allocation4 + $0x68] sm:$0xff] %v4333_v1 }
  0xb8   : > { %451 = vst [vmem:[#allocation4 + $0x30] sm:$0xff] %v4333_v1  ;;  %452 = vst [vmem:[#allocation4 + $0x48] sm:$0xff] %v4333_v1 }
  0xb9   : > { %453 = vst [vmem:[#allocation4 + $0x80] sm:$0xff] %v4333_v1  ;;  %454 = vst [vmem:[#allocation4 + $0x88] sm:$0xff] %v4333_v1 }
  0xba   : > { %455 = vst [vmem:[#allocation4 + $0xe8] sm:$0xff] %v4333_v1  ;;  %456 = vst [vmem:[#allocation4 + $0xb8] sm:$0xff] %v4333_v1 }
  0xbb   : > { %457 = vst [vmem:[#allocation4 + $0x60] sm:$0xff] %v4333_v1  ;;  %458 = vst [vmem:[#allocation4 + $0xf0] sm:$0xff] %v4333_v1 }
  0xbc   : > { %459 = vst [vmem:[#allocation4 + $0x8] sm:$0xff] %v4333_v1  ;;  %460 = vst [vmem:[#allocation4 + $0x78] sm:$0xff] %v4333_v1 }
  0xbd   : > { %461 = vst [vmem:[#allocation4 + $0x38] sm:$0xff] %v4333_v1  ;;  %462 = vst [vmem:[#allocation4 + $0x58] sm:$0xff] %v4333_v1 }
  0xbe   : > { %463 = vst [vmem:[#allocation4 + $0x40] sm:$0xff] %v4333_v1  ;;  %464 = vst [vmem:[#allocation4 + $0xc8] sm:$0xff] %v4333_v1 }
  0xbf   : > { %465 = vst [vmem:[#allocation4 + $0xe0] sm:$0xff] %v4333_v1  ;;  %466 = vst [vmem:[#allocation4 + $0x90] sm:$0xff] %v4333_v1 }
  0xc0   : > { %467 = vst [vmem:[#allocation4 + $0x70] sm:$0xff] %v4333_v1  ;;  %468 = vst [vmem:[#allocation4 + $0xc0] sm:$0xff] %v4333_v1 }
  0xc1   : > { %469 = vst [vmem:[#allocation4 + $0xa8] sm:$0xff] %v4333_v1  ;;  %470 = vst [vmem:[#allocation4 + $0xd0] sm:$0xff] %v4333_v1 }
  0xc2   : > { %471 = vst [vmem:[#allocation4 + $0x10] sm:$0xff] %v4333_v1  ;;  %472 = vst [vmem:[#allocation4 + $0x28] sm:$0xff] %v4333_v1 }
  0xc3   : > { %473 = vst [vmem:[#allocation4 + $0xa0] sm:$0xff] %v4333_v1  ;;  %474 = vst [vmem:[#allocation4 + $0xf8] sm:$0xff] %v4333_v1 }
  0xc4   : > { %475 = vst [vmem:[#allocation4 + $0x20] sm:$0xff] %v4333_v1  ;;  %476 = vst [vmem:[#allocation4 + $0x98] sm:$0xff] %v4333_v1 }
  0xc5 PF: > { %v3758_v2 = vld [vmem:[%s4636_s13 + $0x78] sm:$0xff]   ;;  %v3760_v4 = vld [vmem:[%s4636_s13 + $0x70] sm:$0xff]   ;;  %v3762_v6 = vld [vmem:[%s4636_s13 + $0x68] sm:$0xff]   ;;  %v4334_v47 = vmov 0   ;;  %vm1726_vm1 = vcmask 7168   ;;  %s6303_s12 = sld [smem:[#allocation20_spill]] }
  0xc6   : > { %v3759_v3 = vld [vmem:[%s4636_s13 + $0x38] sm:$0xff]   ;;  %3455 = vmatprep.subr.bf16.mxu0 %v3758_v2  ;;  %v3761_v5 = vld [vmem:[%s4636_s13 + $0x30] sm:$0xff]   ;;  %v3763_v7 = vld [vmem:[%s4636_s13 + $0x28] sm:$0xff]   ;;  %3756 = vset.pattern.permute.xlu0 %v4334_v47 }
  0xc7   : > { %3456 = vmatpush3.bf16.xpose.msra.mxu0 %v3759_v3  ;;  %v3764_v8 = vld [vmem:[%s4636_s13 + $0x60] sm:$0xff]   ;;  %v3766_v11 = vld [vmem:[%s4636_s13 + $0x58] sm:$0xff]   ;;  %v3768_v13 = vld [vmem:[%s4636_s13 + $0x50] sm:$0xff]   ;;  %3757 = vset.pattern.permute.xlu1 %v4334_v47 }
  0xc8   : > { %3457 = vmatprep.subr.bf16.mxu0 %v3760_v4  ;;  %v3774_v9 = vld [vmem:[%s4629_s23] sm:$0xff]   ;;  %v3767_v12 = vld [vmem:[%s4636_s13 + $0x18] sm:$0xff]   ;;  %v3769_v14 = vld [vmem:[%s4636_s13 + $0x10] sm:$0xff]  }
  0xc9   : > { %3471 = vmatprep.mubr.bf16.mxu0 %v3774_v9  ;;  %v3765_v10 = vld [vmem:[%s4636_s13 + $0x20] sm:$0xff]   ;;  %v3770_v15 = vld [vmem:[%s4636_s13 + $0x48] sm:$0xff]   ;;  %v3776_v20 = vld [vmem:[%s4629_s23 + $0x10] sm:$0xff]  }
  0xca   : > { %v3771_v16 = vld [vmem:[%s4636_s13 + $0x8] sm:$0xff]   ;;  %v3772_v17 = vld [vmem:[%s4636_s13 + $0x40] sm:$0xff]   ;;  %v3777_v21 = vld [vmem:[%s4629_s23 + $0x18] sm:$0xff]  }
  0xcb   : > { %v3773_v18 = vld [vmem:[%s4636_s13] sm:$0xff]   ;;  %v3775_v19 = vld [vmem:[%s4629_s23 + $0x8] sm:$0xff]   ;;  %v3780_v24 = vld [vmem:[%s4629_s23 + $0x30] sm:$0xff]   ;;  %p3210_p5 = scmp.ne.s32.totalorder %s6303_s12, 1 }
  0xcc   : > { %v3778_v22 = vld [vmem:[%s4629_s23 + $0x20] sm:$0xff]   ;;  %v3779_v23 = vld [vmem:[%s4629_s23 + $0x28] sm:$0xff]   ;;  %v3781_v25 = vld [vmem:[%s4629_s23 + $0x38] sm:$0xff]  }
  0xcd   : > { %v3782_v26 = vld [vmem:[%s4629_s23 + $0x40] sm:$0xff]   ;;  %v3783_v27 = vld [vmem:[%s4629_s23 + $0x48] sm:$0xff]   ;;  %v3784_v28 = vld [vmem:[%s4629_s23 + $0x50] sm:$0xff]  }
  0xce   : > { %v3785_v29 = vld [vmem:[%s4629_s23 + $0x58] sm:$0xff]   ;;  %v3786_v30 = vld [vmem:[%s4629_s23 + $0x60] sm:$0xff]   ;;  %v3787_v31 = vld [vmem:[%s4629_s23 + $0x68] sm:$0xff]  }
  0xcf   : > { %3458 = vmatpush3.bf16.xpose.msra.mxu0 %v3761_v5  ;;  %v3788_v32 = vld [vmem:[%s4629_s23 + $0x70] sm:$0xff]   ;;  %v3789_v33 = vld [vmem:[%s4629_s23 + $0x78] sm:$0xff]  }
  0xd0   : > { %3459 = vmatprep.subr.bf16.mxu0 %v3762_v6 }
  0xd7   : > { %3460 = vmatpush3.bf16.xpose.msra.mxu0 %v3763_v7 }
  0xd8   : > { %3461 = vmatprep.subr.bf16.mxu0 %v3764_v8 }
  0xdf   : > { %3462 = vmatpush3.bf16.xpose.msra.mxu0 %v3765_v10 }
  0xe0   : > { %3463 = vmatprep.subr.bf16.mxu0 %v3766_v11 }
  0xe7   : > { %3464 = vmatpush3.bf16.xpose.msra.mxu0 %v3767_v12 }
  0xe8   : > { %3465 = vmatprep.subr.bf16.mxu0 %v3768_v13 }
  0xef   : > { %3466 = vmatpush3.bf16.xpose.msra.mxu0 %v3769_v14 }
  0xf0   : > { %3467 = vmatprep.subr.bf16.mxu0 %v3770_v15 }
  0xf7   : > { %3468 = vmatpush3.bf16.xpose.msra.mxu0 %v3771_v16 }
  0xf8   : > { %3469 = vmatprep.subr.bf16.mxu0 %v3772_v17 }
  0xff   : > { %3470 = vmatpush3.bf16.xpose.msra.mxu0 %v3773_v18 }
 0x106   : > { %3472 = vmatmul.mubr.bf16.vlgmr.msra.gmra.mxu0 %v3774_v9 }
 0x107   : > { %3473 = vmatprep.mubr.bf16.mxu0 %v3775_v19 }
 0x10e   : > { %3474 = vmatmul.mubr.bf16.gmra.mxu0 %v3775_v19 }
 0x10f   : > { %3475 = vmatprep.mubr.bf16.mxu0 %v3776_v20 }
 0x116   : > { %3476 = vmatmul.mubr.bf16.gmra.mxu0 %v3776_v20 }
 0x117   : > { %3477 = vmatprep.mubr.bf16.mxu0 %v3777_v21 }
 0x11e   : > { %3478 = vmatmul.mubr.bf16.gmra.mxu0 %v3777_v21 }
 0x11f   : > { %3479 = vmatprep.mubr.bf16.mxu0 %v3778_v22 }
 0x126   : > { %3480 = vmatmul.mubr.bf16.gmra.mxu0 %v3778_v22 }
 0x127   : > { %3481 = vmatprep.mubr.bf16.mxu0 %v3779_v23 }
 0x12e   : > { %3482 = vmatmul.mubr.bf16.gmra.mxu0 %v3779_v23 }
 0x12f   : > { %3483 = vmatprep.mubr.bf16.mxu0 %v3780_v24 }
 0x136   : > { %3484 = vmatmul.mubr.bf16.gmra.mxu0 %v3780_v24 }
 0x137   : > { %3485 = vmatprep.mubr.bf16.mxu0 %v3781_v25 }
 0x13e   : > { %3486 = vmatmul.mubr.bf16.gmra.mxu0 %v3781_v25 }
 0x13f   : > { %3487 = vmatprep.mubr.bf16.mxu0 %v3782_v26 }
 0x146   : > { %3488 = vmatmul.mubr.bf16.gmra.mxu0 %v3782_v26 }
 0x147   : > { %3489 = vmatprep.mubr.bf16.mxu0 %v3783_v27 }
 0x14e   : > { %3490 = vmatmul.mubr.bf16.gmra.mxu0 %v3783_v27 }
 0x14f   : > { %3491 = vmatprep.mubr.bf16.mxu0 %v3784_v28 }
 0x156   : > { %3492 = vmatmul.mubr.bf16.gmra.mxu0 %v3784_v28 }
 0x157   : > { %3493 = vmatprep.mubr.bf16.mxu0 %v3785_v29 }
 0x15e   : > { %3494 = vmatmul.mubr.bf16.gmra.mxu0 %v3785_v29 }
 0x15f   : > { %3495 = vmatprep.mubr.bf16.mxu0 %v3786_v30 }
 0x166   : > { %3496 = vmatmul.mubr.bf16.gmra.mxu0 %v3786_v30 }
 0x167   : > { %3497 = vmatprep.mubr.bf16.mxu0 %v3787_v31 }
 0x16e   : > { %3498 = vmatmul.mubr.bf16.gmra.mxu0 %v3787_v31 }
 0x16f   : > { %3499 = vmatprep.mubr.bf16.mxu0 %v3788_v32 }
 0x176   : > { %3500 = vmatmul.mubr.bf16.gmra.mxu0 %v3788_v32 }
 0x177   : > { %3501 = vmatprep.mubr.bf16.mxu0 %v3789_v33 }
 0x17e   : > { %3502 = vmatmul.mubr.bf16.gmra.mxu0 %v3789_v33 }
 0x1c6   : > { %v4811_v34 = vpop.f32.mrf.mxu0 }
 0x1c8   : > { %v4813_v35 = vpop.f32.mrf.mxu0 }
 0x1c9   : > { %v958_v36 = vmax.f32 %v4811_v34, %v4813_v35 }
 0x1ca   : > { %v4817_v37 = vpop.f32.mrf.mxu0 }
 0x1cb   : > { %959 = vmax.xlane.f32.xlu0 %v958_v36 }
 0x1cc   : > { %v4819_v38 = vpop.f32.mrf.mxu0 }
 0x1cd   : > { %v961_v39 = vmax.f32 %v4817_v37, %v4819_v38 }
 0x1ce   : > { %v4823_v40 = vpop.f32.mrf.mxu0 }
 0x1cf   : > { %962 = vmax.xlane.f32.xlu0 %v961_v39 }
 0x1d0   : > { %v4825_v41 = vpop.f32.mrf.mxu0 }
 0x1d1   : > { %v964_v42 = vmax.f32 %v4823_v40, %v4825_v41 }
 0x1d2   : > { %v4829_v43 = vpop.f32.mrf.mxu0 }
 0x1d3   : > { %965 = vmax.xlane.f32.xlu1 %v964_v42 }
 0x1d4   : > { %v4831_v44 = vpop.f32.mrf.mxu0 }
 0x1d5   : > { %v967_v45 = vmax.f32 %v4829_v43, %v4831_v44 }
 0x1d6   : > { %v4835_v46 = vpop.f32.mrf.mxu0 }
 0x1d7   : > { %968 = vmax.xlane.f32.xlu1 %v967_v45 }
 0x1d8   : > { %v4837_v48 = vpop.f32.mrf.mxu0 }
 0x1d9   : > { %v970_v49 = vmax.f32 %v4835_v46, %v4837_v48 }
 0x1da   : > { %v4841_v50 = vpop.f32.mrf.mxu0 }
 0x1db   : > { %971 = vmax.xlane.f32.xlu0 %v970_v49 }
 0x1dc   : > { %v4843_v51 = vpop.f32.mrf.mxu0 }
 0x1dd   : > { %v973_v52 = vmax.f32 %v4841_v50, %v4843_v51 }
 0x1de   : > { %v4847_v53 = vpop.f32.mrf.mxu0 }
 0x1df   : > { %974 = vmax.xlane.f32.xlu1 %v973_v52 }
 0x1e0   : > { %v4849_v54 = vpop.f32.mrf.mxu0 }
 0x1e1   : > { %v976_v55 = vmax.f32 %v4847_v53, %v4849_v54 }
 0x1e2   : > { %v4853_v56 = vpop.f32.mrf.mxu0 }
 0x1e3   : > { %977 = vmax.xlane.f32.xlu0 %v976_v55 }
 0x1e4   : > { %v4855_v57 = vpop.f32.mrf.mxu0 }
 0x1e5   : > { %v979_v58 = vmax.f32 %v4853_v56, %v4855_v57 }
 0x1e6   : > { %v4859_v59 = vpop.f32.mrf.mxu0 }
 0x1e7   : > { %980 = vmax.xlane.f32.xlu1 %v979_v58 }
 0x1e8   : > { %v4861_v60 = vpop.f32.mrf.mxu0 }
 0x1e9   : > { %v982_v61 = vmax.f32 %v4859_v59, %v4861_v60 }
 0x1ea   : > { %v4865_v62 = vpop.f32.mrf.mxu0 }
 0x1eb   : > { %983 = vmax.xlane.f32.xlu0 %v982_v61 }
 0x1ec   : > { %v4867_v63 = vpop.f32.mrf.mxu0 }
 0x1ed   : > { %v985_v0 = vmax.f32 %v4865_v62, %v4867_v63 }
 0x1ee   : > { %v4871_v1 = vpop.f32.mrf.mxu0 }
 0x1ef   : > { %986 = vmax.xlane.f32.xlu1 %v985_v0 }
 0x1f0   : > { %v4873_v2 = vpop.f32.mrf.mxu0 }
 0x1f1   : > { %v988_v3 = vmax.f32 %v4871_v1, %v4873_v2 }
 0x1f2   : > { %v4877_v4 = vpop.f32.mrf.mxu0 }
 0x1f3   : > { %989 = vmax.xlane.f32.xlu0 %v988_v3 }
 0x1f4   : > { %v4879_v5 = vpop.f32.mrf.mxu0 }
 0x1f5   : > { %v991_v6 = vmax.f32 %v4877_v4, %v4879_v5 }
 0x1f6   : > { %v4883_v7 = vpop.f32.mrf.mxu0 }
 0x1f7   : > { %6087 = vst [vmem:[#allocation33_spill] sm:$0xff] %v4883_v7  ;;  %992 = vmax.xlane.f32.xlu1 %v991_v6 }
 0x1f8   : > { %v4885_v8 = vpop.f32.mrf.mxu0 }
 0x1f9   : > { %6088 = vst [vmem:[#allocation34_spill] sm:$0xff] %v4885_v8  ;;  %v994_v9 = vmax.f32 %v4883_v7, %v4885_v8  ;;  %v5165_v8 = vld [vmem:[#allocation2 + $0x80] sm:$0xff] }
 0x1fa   : > { %v4889_v10 = vpop.f32.mrf.mxu0  ;;  %6134 = vst [vmem:[#allocation80_spill] sm:$0xff] %v5165_v8 }
 0x1fb   : > { %6089 = vst [vmem:[#allocation35_spill] sm:$0xff] %v4889_v10  ;;  %995 = vmax.xlane.f32.xlu0 %v994_v9 }
 0x1fc   : > { %v4891_v11 = vpop.f32.mrf.mxu0 }
 0x1fd   : > { %6090 = vst [vmem:[#allocation36_spill] sm:$0xff] %v4891_v11  ;;  %v997_v12 = vmax.f32 %v4889_v10, %v4891_v11 }
 0x1fe   : > { %v4895_v13 = vpop.f32.mrf.mxu0 }
 0x1ff   : > { %6091 = vst [vmem:[#allocation37_spill] sm:$0xff] %v4895_v13  ;;  %998 = vmax.xlane.f32.xlu1 %v997_v12 }
 0x200   : > { %v4897_v14 = vpop.f32.mrf.mxu0 }
 0x201   : > { %6092 = vst [vmem:[#allocation38_spill] sm:$0xff] %v4897_v14  ;;  %v1000_v15 = vmax.f32 %v4895_v13, %v4897_v14  ;;  %v5154_v13 = vld [vmem:[#allocation2 + $0x78] sm:$0xff] }
 0x202   : > { %v4901_v16 = vpop.f32.mrf.mxu0  ;;  %6132 = vst [vmem:[#allocation78_spill] sm:$0xff] %v5154_v13 }
 0x203   : > { %6093 = vst [vmem:[#allocation39_spill] sm:$0xff] %v4901_v16  ;;  %1001 = vmax.xlane.f32.xlu0 %v1000_v15 }
 0x204   : > { %v4903_v17 = vpop.f32.mrf.mxu0 }
 0x205   : > { %6094 = vst [vmem:[#allocation40_spill] sm:$0xff] %v4903_v17  ;;  %v1003_v18 = vmax.f32 %v4901_v16, %v4903_v17 }
 0x206   : > { %v4907_v19 = vpop.f32.mrf.mxu0 }
 0x207   : > { %6095 = vst [vmem:[#allocation41_spill] sm:$0xff] %v4907_v19  ;;  %1004 = vmax.xlane.f32.xlu1 %v1003_v18 }
 0x208   : > { %v4909_v20 = vpop.f32.mrf.mxu0 }
 0x209   : > { %6096 = vst [vmem:[#allocation42_spill] sm:$0xff] %v4909_v20  ;;  %v1006_v21 = vmax.f32 %v4907_v19, %v4909_v20  ;;  %v5143_v20 = vld [vmem:[#allocation2 + $0x70] sm:$0xff] }
 0x20a   : > { %v4913_v22 = vpop.f32.mrf.mxu0  ;;  %6130 = vst [vmem:[#allocation76_spill] sm:$0xff] %v5143_v20 }
 0x20b   : > { %6097 = vst [vmem:[#allocation43_spill] sm:$0xff] %v4913_v22  ;;  %1007 = vmax.xlane.f32.xlu0 %v1006_v21 }
 0x20c   : > { %v4915_v23 = vpop.f32.mrf.mxu0 }
 0x20d   : > { %6098 = vst [vmem:[#allocation44_spill] sm:$0xff] %v4915_v23  ;;  %v1009_v24 = vmax.f32 %v4913_v22, %v4915_v23  ;;  %v5122_v22 = vld [vmem:[#allocation2 + $0x60] sm:$0xff] }
 0x20e   : > { %v4919_v25 = vpop.f32.mrf.mxu0  ;;  %6126 = vst [vmem:[#allocation72_spill] sm:$0xff] %v5122_v22 }
 0x20f   : > { %6099 = vst [vmem:[#allocation45_spill] sm:$0xff] %v4919_v25  ;;  %1010 = vmax.xlane.f32.xlu1 %v1009_v24 }
 0x210   : > { %v4921_v26 = vpop.f32.mrf.mxu0 }
 0x211   : > { %6100 = vst [vmem:[#allocation46_spill] sm:$0xff] %v4921_v26  ;;  %v1012_v27 = vmax.f32 %v4919_v25, %v4921_v26  ;;  %v5102_v25 = vld [vmem:[#allocation2 + $0x50] sm:$0xff] }
 0x212   : > { %v4925_v28 = vpop.f32.mrf.mxu0 }
 0x213   : > { %6101 = vst [vmem:[#allocation47_spill] sm:$0xff] %v4925_v28  ;;  %1013 = vmax.xlane.f32.xlu0 %v1012_v27 }
 0x214   : > { %v4927_v29 = vpop.f32.mrf.mxu0 }
 0x215   : > { %6102 = vst [vmem:[#allocation48_spill] sm:$0xff] %v4927_v29  ;;  %v1015_v30 = vmax.f32 %v4925_v28, %v4927_v29  ;;  %v5072_v28 = vld [vmem:[#allocation2 + $0x38] sm:$0xff] }
 0x216   : > { %v4931_v31 = vpop.f32.mrf.mxu0 }
 0x217   : > { %6103 = vst [vmem:[#allocation49_spill] sm:$0xff] %v4931_v31  ;;  %1016 = vmax.xlane.f32.xlu1 %v1015_v30 }
 0x218   : > { %v4933_v32 = vpop.f32.mrf.mxu0 }
 0x219   : > { %6104 = vst [vmem:[#allocation50_spill] sm:$0xff] %v4933_v32  ;;  %v1018_v33 = vmax.f32 %v4931_v31, %v4933_v32  ;;  %v3803_v31 = vld [vmem:[%s4642_s4 + $0x8] sm:$0xff]  }
 0x21a   : > { %v4937_v36 = vpop.f32.mrf.mxu0 }
 0x21b   : > { %6105 = vst [vmem:[#allocation51_spill] sm:$0xff] %v4937_v36  ;;  %1019 = vmax.xlane.f32.xlu1 %v1018_v33 }
 0x21c   : > { %v4939_v39 = vpop.f32.mrf.mxu0 }
 0x21d   : > { %6106 = vst [vmem:[#allocation52_spill] sm:$0xff] %v4939_v39  ;;  %v1021_v42 = vmax.f32 %v4937_v36, %v4939_v39  ;;  %v5132_v36 = vld [vmem:[#allocation2 + $0x68] sm:$0xff] }
 0x21e   : > { %v4943_v45 = vpop.f32.mrf.mxu0  ;;  %6127 = vst [vmem:[#allocation73_spill] sm:$0xff] %v5132_v36 }
 0x21f   : > { %6107 = vst [vmem:[#allocation53_spill] sm:$0xff] %v4943_v45  ;;  %1022 = vmax.xlane.f32.xlu0 %v1021_v42 }
 0x220   : > { %v4945_v47 = vpop.f32.mrf.mxu0 }
 0x221   : > { %6108 = vst [vmem:[#allocation54_spill] sm:$0xff] %v4945_v47  ;;  %v1024_v49 = vmax.f32 %v4943_v45, %v4945_v47  ;;  %v3799_v45 = vld [vmem:[%s4642_s4 + $0x18] sm:$0xff]  }
 0x222   : > { %v4949_v52 = vpop.f32.mrf.mxu0 }
 0x223   : > { %6109 = vst [vmem:[#allocation55_spill] sm:$0xff] %v4949_v52  ;;  %1025 = vmax.xlane.f32.xlu1 %v1024_v49 }
 0x224   : > { %v4951_v55 = vpop.f32.mrf.mxu0 }
 0x225   : > { %6110 = vst [vmem:[#allocation56_spill] sm:$0xff] %v4951_v55  ;;  %v1027_v58 = vmax.f32 %v4949_v52, %v4951_v55  ;;  %v5112_v52 = vld [vmem:[#allocation2 + $0x58] sm:$0xff] }
 0x226   : > { %v4955_v61 = vpop.f32.mrf.mxu0  ;;  %6124 = vst [vmem:[#allocation70_spill] sm:$0xff] %v5112_v52 }
 0x227   : > { %6111 = vst [vmem:[#allocation57_spill] sm:$0xff] %v4955_v61  ;;  %1028 = vmax.xlane.f32.xlu0 %v1027_v58 }
 0x228   : > { %v4957_v0 = vpop.f32.mrf.mxu0 }
 0x229   : > { %6112 = vst [vmem:[#allocation58_spill] sm:$0xff] %v4957_v0  ;;  %v1030_v3 = vmax.f32 %v4955_v61, %v4957_v0  ;;  %v3795_v0 = vld [vmem:[%s4642_s4 + $0x28] sm:$0xff]  }
 0x22a   : > { %v4961_v6 = vpop.f32.mrf.mxu0 }
 0x22b   : > { %6113 = vst [vmem:[#allocation59_spill] sm:$0xff] %v4961_v6  ;;  %1031 = vmax.xlane.f32.xlu0 %v1030_v3 }
 0x22c   : > { %v4963_v9 = vpop.f32.mrf.mxu0 }
 0x22d   : > { %6114 = vst [vmem:[#allocation60_spill] sm:$0xff] %v4963_v9  ;;  %v1033_v12 = vmax.f32 %v4961_v6, %v4963_v9  ;;  %v5092_v6 = vld [vmem:[#allocation2 + $0x48] sm:$0xff] }
 0x22e   : > { %v4967_v15 = vpop.f32.mrf.mxu0 }
 0x22f   : > { %6115 = vst [vmem:[#allocation61_spill] sm:$0xff] %v4967_v15  ;;  %1034 = vmax.xlane.f32.xlu1 %v1033_v12 }
 0x230   : > { %v4969_v18 = vpop.f32.mrf.mxu0 }
 0x231   : > { %6116 = vst [vmem:[#allocation62_spill] sm:$0xff] %v4969_v18  ;;  %v1036_v21 = vmax.f32 %v4967_v15, %v4969_v18  ;;  %v3791_v18 = vld [vmem:[%s4642_s4 + $0x38] sm:$0xff]   ;;  %v3793_v15 = vld [vmem:[%s4642_s4 + $0x30] sm:$0xff]  }
 0x232   : > { %v4973_v24 = vpop.f32.mrf.mxu0 }
 0x233   : > { %6117 = vst [vmem:[#allocation63_spill] sm:$0xff] %v4973_v24  ;;  %1037 = vmax.xlane.f32.xlu1 %v1036_v21  ;;  %v3790_v21 = vld [vmem:[%s4642_s4 + $0x78] sm:$0xff]  }
 0x234   : > { %v4975_v27 = vpop.f32.mrf.mxu0  ;;  %3503 = vmatprep.subr.bf16.mxu1 %v3790_v21 }
 0x235   : > { %6118 = vst [vmem:[#allocation64_spill] sm:$0xff] %v4975_v27  ;;  %v1039_v30 = vmax.f32 %v4973_v24, %v4975_v27  ;;  %3504 = vmatpush3.bf16.msra.mxu1 %v3791_v18  ;;  %v3798_v18 = vld [vmem:[%s4642_s4 + $0x58] sm:$0xff]   ;;  %v3805_v24 = vld [vmem:[%s4642_s4] sm:$0xff]  }
 0x236   : > { %v4979_v33 = vpop.f32.mrf.mxu0 }
 0x237   : > { %6119 = vst [vmem:[#allocation65_spill] sm:$0xff] %v4979_v33  ;;  %1040 = vmax.xlane.f32.xlu0 %v1039_v30  ;;  %v3792_v30 = vld [vmem:[%s4642_s4 + $0x70] sm:$0xff]  }
 0x238   : > { %v4981_v42 = vpop.f32.mrf.mxu0  ;;  %3505 = vmatprep.subr.bf16.mxu1 %v3792_v30  ;;  %v3797_v30 = vld [vmem:[%s4642_s4 + $0x20] sm:$0xff]  }
 0x239   : > { %6120 = vst [vmem:[#allocation66_spill] sm:$0xff] %v4981_v42  ;;  %v1042_v49 = vmax.f32 %v4979_v33, %v4981_v42  ;;  %3506 = vmatpush3.bf16.msra.mxu1 %v3793_v15  ;;  %v4995_v42 = vld [vmem:[#allocation2] sm:$0xff] }
 0x23a   : > { %v4985_v58 = vpop.f32.mrf.mxu0  ;;  %v3796_v15 = vld [vmem:[%s4642_s4 + $0x60] sm:$0xff]  }
 0x23b   : > { %6121 = vst [vmem:[#allocation67_spill] sm:$0xff] %v4985_v58  ;;  %1043 = vmax.xlane.f32.xlu0 %v1042_v49  ;;  %v3794_v49 = vld [vmem:[%s4642_s4 + $0x68] sm:$0xff]  }
 0x23c   : > { %v4987_v3 = vpop.f32.mrf.mxu0  ;;  %3507 = vmatprep.subr.bf16.mxu1 %v3794_v49  ;;  %v5014_v49 = vld [vmem:[#allocation2 + $0x10] sm:$0xff] }
 0x23d   : > { %6122 = vst [vmem:[#allocation68_spill] sm:$0xff] %v4987_v3  ;;  %v1045_v12 = vmax.f32 %v4985_v58, %v4987_v3  ;;  %3508 = vmatpush3.bf16.msra.mxu1 %v3795_v0  ;;  %v3800_v0 = vld [vmem:[%s4642_s4 + $0x50] sm:$0xff]  }
 0x23e   : > { %3509 = vmatprep.subr.bf16.mxu1 %v3796_v15  ;;  %v5026_v15 = vld [vmem:[#allocation2 + $0x18] sm:$0xff]  ;;  %v3801_v58 = vld [vmem:[%s4642_s4 + $0x10] sm:$0xff]   ;;  %v5134_v17 = vpop.f32.mrf.mxu0 }
 0x23f   : > { %1046 = vmax.xlane.f32.xlu1 %v1045_v12  ;;  %v5002_v12 = vld [vmem:[#allocation2 + $0x8] sm:$0xff]  ;;  %6128 = vst [vmem:[#allocation74_spill] sm:$0xff] %v5134_v17 }
 0x240   : > { %v5145_v19 = vpop.f32.mrf.mxu0 }
 0x241   : > { %3510 = vmatpush3.bf16.msra.mxu1 %v3797_v30  ;;  %v3802_v30 = vld [vmem:[%s4642_s4 + $0x48] sm:$0xff]   ;;  %6131 = vst [vmem:[#allocation77_spill] sm:$0xff] %v5145_v19 }
 0x242   : > { %3511 = vmatprep.subr.bf16.mxu1 %v3798_v18  ;;  %v5038_v18 = vld [vmem:[#allocation2 + $0x20] sm:$0xff]  ;;  %v5156_v11 = vpop.f32.mrf.mxu0 }
 0x243   : > { %6133 = vst [vmem:[#allocation79_spill] sm:$0xff] %v5156_v11 }
 0x244   : > { %v5167_v7 = vpop.f32.mrf.mxu0 }
 0x245   : > { %3512 = vmatpush3.bf16.msra.mxu1 %v3799_v45  ;;  %v3804_v45 = vld [vmem:[%s4642_s4 + $0x40] sm:$0xff]   ;;  %6135 = vst [vmem:[#allocation81_spill] sm:$0xff] %v5167_v7 }
 0x246   : > { %3513 = vmatprep.subr.bf16.mxu1 %v3800_v0  ;;  %v5050_v0 = vld [vmem:[#allocation2 + $0x28] sm:$0xff] }
 0x249   : > { %3514 = vmatpush3.bf16.msra.mxu1 %v3801_v58 }
 0x24a   : > { %3515 = vmatprep.subr.bf16.mxu1 %v3802_v30 }
 0x24d   : > { %3516 = vmatpush3.bf16.msra.mxu1 %v3803_v31  ;;  %v5082_v31 = vld [vmem:[#allocation2 + $0x40] sm:$0xff] }
 0x24e   : > { %3517 = vmatprep.subr.bf16.mxu1 %v3804_v45 }
 0x251   : > { %3518 = vmatpush3.bf16.msra.mxu1 %v3805_v24 }
 0x254   : > { %v960_v33 = vpop.xlane.xlu0 %959 }
 0x255   : > { %v5000_v61 = vmax.f32 %v4995_v42, %v960_v33 }
 0x257   : > { %2368 = vst.msk [vmem:[#allocation2] sm:$0xff] %vm1726_vm1, %v5000_v61  ;;  %1184 = vperm.xlu0 %3756, %v5000_v61  }
 0x258   : > { %v963_v21 = vpop.xlane.xlu0 %962 }
 0x259   : > { %v5012_v33 = vmax.f32 %v5002_v12, %v963_v21 }
 0x25b   : > { %2369 = vst.msk [vmem:[#allocation2 + $0x8] sm:$0xff] %vm1726_vm1, %v5012_v33  ;;  %1189 = vperm.xlu1 %3757, %v5012_v33  }
 0x25c   : > { %v966_v47 = vpop.xlane.xlu1 %965 }
 0x25d   : > { %v5024_v21 = vmax.f32 %v5014_v49, %v966_v47 }
 0x25f   : > { %2370 = vst.msk [vmem:[#allocation2 + $0x10] sm:$0xff] %vm1726_vm1, %v5024_v21  ;;  %1194 = vperm.xlu1 %3757, %v5024_v21  }
 0x260   : > { %v969_v3 = vpop.xlane.xlu1 %968 }
 0x261   : > { %v5036_v47 = vmax.f32 %v5026_v15, %v969_v3 }
 0x263   : > { %2371 = vst.msk [vmem:[#allocation2 + $0x18] sm:$0xff] %vm1726_vm1, %v5036_v47  ;;  %1199 = vperm.xlu1 %3757, %v5036_v47  }
 0x264   : > { %v972_v32 = vpop.xlane.xlu0 %971 }
 0x265   : > { %v5048_v3 = vmax.f32 %v5038_v18, %v972_v32  ;;  %v5062_v32 = vld [vmem:[#allocation2 + $0x30] sm:$0xff] }
 0x267   : > { %2372 = vst.msk [vmem:[#allocation2 + $0x20] sm:$0xff] %vm1726_vm1, %v5048_v3  ;;  %1204 = vperm.xlu0 %3756, %v5048_v3  }
 0x268   : > { %v975_v27 = vpop.xlane.xlu1 %974 }
 0x269   : > { %v5060_v29 = vmax.f32 %v5050_v0, %v975_v27 }
 0x26b   : > { %2373 = vst.msk [vmem:[#allocation2 + $0x28] sm:$0xff] %vm1726_vm1, %v5060_v29  ;;  %1209 = vperm.xlu0 %3756, %v5060_v29  }
 0x26c   : > { %v978_v30 = vpop.xlane.xlu0 %977 }
 0x26d   : > { %v5070_v58 = vmax.f32 %v5062_v32, %v978_v30 }
 0x26f   : > { %2374 = vst.msk [vmem:[#allocation2 + $0x30] sm:$0xff] %vm1726_vm1, %v5070_v58  ;;  %1214 = vperm.xlu1 %3757, %v5070_v58  }
 0x270   : > { %v981_v24 = vpop.xlane.xlu1 %980 }
 0x271   : > { %v5080_v45 = vmax.f32 %v5072_v28, %v981_v24 }
 0x273   : > { %2375 = vst.msk [vmem:[#allocation2 + $0x38] sm:$0xff] %vm1726_vm1, %v5080_v45  ;;  %1219 = vperm.xlu1 %3757, %v5080_v45  }
 0x274   : > { %v984_v27 = vpop.xlane.xlu0 %983 }
 0x275   : > { %v5090_v9 = vmax.f32 %v5082_v31, %v984_v27 }
 0x277   : > { %2376 = vst.msk [vmem:[#allocation2 + $0x40] sm:$0xff] %vm1726_vm1, %v5090_v9  ;;  %1224 = vperm.xlu0 %3756, %v5090_v9  }
 0x278   : > { %v987_v30 = vpop.xlane.xlu1 %986 }
 0x279   : > { %v5100_v26 = vmax.f32 %v5092_v6, %v987_v30 }
 0x27b   : > { %2377 = vst.msk [vmem:[#allocation2 + $0x48] sm:$0xff] %vm1726_vm1, %v5100_v26  ;;  %1229 = vperm.xlu0 %3756, %v5100_v26  }
 0x27c   : > { %v990_v24 = vpop.xlane.xlu0 %989 }
 0x27d   : > { %v5110_v55 = vmax.f32 %v5102_v25, %v990_v24 }
 0x27f   : > { %6123 = vst [vmem:[#allocation69_spill] sm:$0xff] %v5110_v55  ;;  %2378 = vst.msk [vmem:[#allocation2 + $0x50] sm:$0xff] %vm1726_vm1, %v5110_v55  ;;  %1234 = vperm.xlu1 %3757, %v5110_v55   ;;  %v5225_v55 = vld [vmem:[#allocation2 + $0xb0] sm:$0xff] }
 0x280   : > { %v993_v27 = vpop.xlane.xlu1 %992  ;;  %6145 = vst [vmem:[#allocation91_spill] sm:$0xff] %v5225_v55 }
 0x281   : > { %v5120_v23 = vmax.f32 %v5112_v52, %v993_v27  ;;  %v1048_v52 = vmax.f32 %v5134_v17, %v5145_v19 }
 0x283   : > { %6125 = vst [vmem:[#allocation71_spill] sm:$0xff] %v5120_v23  ;;  %2379 = vst.msk [vmem:[#allocation2 + $0x58] sm:$0xff] %vm1726_vm1, %v5120_v23  ;;  %1239 = vperm.xlu1 %3757, %v5120_v23  }
 0x284   : > { %v996_v30 = vpop.xlane.xlu0 %995 }
 0x285   : > { %v5130_v39 = vmax.f32 %v5122_v22, %v996_v30  ;;  %v5178_v22 = vld [vmem:[#allocation2 + $0x88] sm:$0xff] }
 0x286   : > { %6137 = vst [vmem:[#allocation83_spill] sm:$0xff] %v5178_v22 }
 0x287   : > { %2380 = vst.msk [vmem:[#allocation2 + $0x60] sm:$0xff] %vm1726_vm1, %v5130_v39 }
 0x288   : > { %v999_v24 = vpop.xlane.xlu1 %998 }
 0x289   : > { %v5141_v16 = vmax.f32 %v5132_v36, %v999_v24 }
 0x28b   : > { %6129 = vst [vmem:[#allocation75_spill] sm:$0xff] %v5141_v16  ;;  %2381 = vst.msk [vmem:[#allocation2 + $0x68] sm:$0xff] %vm1726_vm1, %v5141_v16 }
 0x28c   : > { %v1002_v14 = vpop.xlane.xlu0 %1001 }
 0x28d   : > { %v5152_v27 = vmax.f32 %v5143_v20, %v1002_v14  ;;  %v1051_v20 = vmax.f32 %v5156_v11, %v5167_v7 }
 0x28f   : > { %2382 = vst.msk [vmem:[#allocation2 + $0x70] sm:$0xff] %vm1726_vm1, %v5152_v27 }
 0x290   : > { %v1005_v10 = vpop.xlane.xlu1 %1004 }
 0x291   : > { %v5163_v30 = vmax.f32 %v5154_v13, %v1005_v10  ;;  %v5187_v13 = vld [vmem:[#allocation2 + $0x90] sm:$0xff]  ;;  %v5196_v10 = vld [vmem:[#allocation2 + $0x98] sm:$0xff] }
 0x292   : > { %6138 = vst [vmem:[#allocation84_spill] sm:$0xff] %v5187_v13  ;;  %6139 = vst [vmem:[#allocation85_spill] sm:$0xff] %v5196_v10 }
 0x293   : > { %2383 = vst.msk [vmem:[#allocation2 + $0x78] sm:$0xff] %vm1726_vm1, %v5163_v30 }
 0x294   : > { %v1008_v36 = vpop.xlane.xlu0 %1007 }
 0x295   : > { %v5174_v24 = vmax.f32 %v5165_v8, %v1008_v36  ;;  %v5205_v36 = vld [vmem:[#allocation2 + $0xa0] sm:$0xff] }
 0x296   : > { %6141 = vst [vmem:[#allocation87_spill] sm:$0xff] %v5205_v36 }
 0x297   : > { %6136 = vst [vmem:[#allocation82_spill] sm:$0xff] %v5174_v24  ;;  %2384 = vst.msk [vmem:[#allocation2 + $0x80] sm:$0xff] %vm1726_vm1, %v5174_v24 }
 0x298   : > { %v1011_v23 = vpop.xlane.xlu1 %1010 }
 0x299   : > { %v5185_v14 = vmax.f32 %v5178_v22, %v1011_v23 }
 0x29a   : > { %1052 = vmax.xlane.f32.xlu0 %v1051_v20 }
 0x29b   : > { %2385 = vst.msk [vmem:[#allocation2 + $0x88] sm:$0xff] %vm1726_vm1, %v5185_v14 }
 0x29c   : > { %v1014_v7 = vpop.xlane.xlu0 %1013 }
 0x29d   : > { %v5194_v11 = vmax.f32 %v5187_v13, %v1014_v7  ;;  %v5216_v13 = vld [vmem:[#allocation2 + $0xa8] sm:$0xff] }
 0x29e   : > { %6143 = vst [vmem:[#allocation89_spill] sm:$0xff] %v5216_v13 }
 0x29f   : > { %2386 = vst.msk [vmem:[#allocation2 + $0x90] sm:$0xff] %vm1726_vm1, %v5194_v11 }
 0x2a0   : > { %v1017_v20 = vpop.xlane.xlu1 %1016 }
 0x2a1   : > { %v5203_v23 = vmax.f32 %v5196_v10, %v1017_v20  ;;  %v5234_v20 = vld [vmem:[#allocation2 + $0xb8] sm:$0xff] }
 0x2a2   : > { %6147 = vst [vmem:[#allocation93_spill] sm:$0xff] %v5234_v20 }
 0x2a3   : > { %6140 = vst [vmem:[#allocation86_spill] sm:$0xff] %v5203_v23  ;;  %2387 = vst.msk [vmem:[#allocation2 + $0x98] sm:$0xff] %vm1726_vm1, %v5203_v23 }
 0x2a4   : > { %v1020_v7 = vpop.xlane.xlu1 %1019 }
 0x2a5   : > { %v5214_v8 = vmax.f32 %v5205_v36, %v1020_v7  ;;  %v5254_v36 = vld [vmem:[#allocation2 + $0xc8] sm:$0xff] }
 0x2a6   : > { %6150 = vst [vmem:[#allocation96_spill] sm:$0xff] %v5254_v36 }
 0x2a7   : > { %6142 = vst [vmem:[#allocation88_spill] sm:$0xff] %v5214_v8  ;;  %1049 = vmax.xlane.f32.xlu1 %v1048_v52  ;;  %2388 = vst.msk [vmem:[#allocation2 + $0xa0] sm:$0xff] %vm1726_vm1, %v5214_v8 }
 0x2a8   : > { %v1023_v22 = vpop.xlane.xlu0 %1022 }
 0x2a9   : > { %v5223_v10 = vmax.f32 %v5216_v13, %v1023_v22  ;;  %v5244_v13 = vld [vmem:[#allocation2 + $0xc0] sm:$0xff] }
 0x2aa   : > { %6149 = vst [vmem:[#allocation95_spill] sm:$0xff] %v5244_v13 }
 0x2ab   : > { %6144 = vst [vmem:[#allocation90_spill] sm:$0xff] %v5223_v10  ;;  %2389 = vst.msk [vmem:[#allocation2 + $0xa8] sm:$0xff] %vm1726_vm1, %v5223_v10 }
 0x2ac   : > { %v1026_v7 = vpop.xlane.xlu1 %1025 }
 0x2ad   : > { %v5232_v52 = vmax.f32 %v5225_v55, %v1026_v7 }
 0x2af   : > { %6146 = vst [vmem:[#allocation92_spill] sm:$0xff] %v5232_v52  ;;  %2390 = vst.msk [vmem:[#allocation2 + $0xb0] sm:$0xff] %vm1726_vm1, %v5232_v52 }
 0x2b0   : > { %1244 = vperm.xlu0 %3756, %v5130_v39   ;;  %v1029_v22 = vpop.xlane.xlu0 %1028 }
 0x2b1   : > { %v5242_v19 = vmax.f32 %v5234_v20, %v1029_v22 }
 0x2b3   : > { %6148 = vst [vmem:[#allocation94_spill] sm:$0xff] %v5242_v19  ;;  %2391 = vst.msk [vmem:[#allocation2 + $0xb8] sm:$0xff] %vm1726_vm1, %v5242_v19 }
 0x2b4   : > { %1249 = vperm.xlu0 %3756, %v5141_v16   ;;  %v1032_v17 = vpop.xlane.xlu0 %1031  ;;  %v5265_v16 = vld [vmem:[#allocation2 + $0xd0] sm:$0xff] }
 0x2b5   : > { %v5252_v55 = vmax.f32 %v5244_v13, %v1032_v17  ;;  %6152 = vst [vmem:[#allocation98_spill] sm:$0xff] %v5265_v16 }
 0x2b7   : > { %2392 = vst.msk [vmem:[#allocation2 + $0xc0] sm:$0xff] %vm1726_vm1, %v5252_v55 }
 0x2b8   : > { %1264 = vperm.xlu1 %3757, %v5174_v24   ;;  %1254 = vperm.xlu0 %3756, %v5152_v27   ;;  %v1035_v7 = vpop.xlane.xlu1 %1034  ;;  %v5276_v24 = vld [vmem:[#allocation2 + $0xd8] sm:$0xff] }
 0x2b9   : > { %v5263_v20 = vmax.f32 %v5254_v36, %v1035_v7  ;;  %6153 = vst [vmem:[#allocation99_spill] sm:$0xff] %v5276_v24 }
 0x2bb   : > { %6151 = vst [vmem:[#allocation97_spill] sm:$0xff] %v5263_v20  ;;  %2393 = vst.msk [vmem:[#allocation2 + $0xc8] sm:$0xff] %vm1726_vm1, %v5263_v20 }
 0x2bc   : > { %1289 = vperm.xlu1 %3757, %v5223_v10   ;;  %1259 = vperm.xlu0 %3756, %v5163_v30   ;;  %v1038_v22 = vpop.xlane.xlu1 %1037  ;;  %v5287_v10 = vld [vmem:[#allocation2 + $0xe0] sm:$0xff] }
 0x2bd   : > { %v5274_v13 = vmax.f32 %v5265_v16, %v1038_v22  ;;  %6155 = vst [vmem:[#allocation101_spill] sm:$0xff] %v5287_v10 }
 0x2bf   : > { %2394 = vst.msk [vmem:[#allocation2 + $0xd0] sm:$0xff] %vm1726_vm1, %v5274_v13 }
 0x2c0   : > { %1299 = vperm.xlu1 %3757, %v5242_v19   ;;  %1269 = vperm.xlu0 %3756, %v5185_v14   ;;  %v1041_v17 = vpop.xlane.xlu0 %1040  ;;  %v5298_v19 = vld [vmem:[#allocation2 + $0xe8] sm:$0xff] }
 0x2c1   : > { %v5285_v36 = vmax.f32 %v5276_v24, %v1041_v17  ;;  %6156 = vst [vmem:[#allocation102_spill] sm:$0xff] %v5298_v19 }
 0x2c3   : > { %6154 = vst [vmem:[#allocation100_spill] sm:$0xff] %v5285_v36  ;;  %2395 = vst.msk [vmem:[#allocation2 + $0xd8] sm:$0xff] %vm1726_vm1, %v5285_v36 }
 0x2c4   : > { %1309 = vperm.xlu1 %3757, %v5263_v20   ;;  %1274 = vperm.xlu0 %3756, %v5194_v11   ;;  %v1044_v7 = vpop.xlane.xlu0 %1043 }
 0x2c5   : > { %v5296_v16 = vmax.f32 %v5287_v10, %v1044_v7 }
 0x2c7   : > { %2396 = vst.msk [vmem:[#allocation2 + $0xe0] sm:$0xff] %vm1726_vm1, %v5296_v16 }
 0x2c8   : > { %1319 = vperm.xlu1 %3757, %v5285_v36   ;;  %1279 = vperm.xlu0 %3756, %v5203_v23   ;;  %v1047_v22 = vpop.xlane.xlu1 %1046 }
 0x2c9   : > { %v5307_v24 = vmax.f32 %v5298_v19, %v1047_v22 }
 0x2cb   : > { %6157 = vst [vmem:[#allocation103_spill] sm:$0xff] %v5307_v24  ;;  %2397 = vst.msk [vmem:[#allocation2 + $0xe8] sm:$0xff] %vm1726_vm1, %v5307_v24 }
 0x2cc   : > { %1329 = vperm.xlu1 %3757, %v5307_v24   ;;  %1284 = vperm.xlu0 %3756, %v5214_v8  }
 0x2d0   : > { %1294 = vperm.xlu0 %3756, %v5232_v52  }
 0x2d2   : > { %v1185_v17 = vpop.permute.xlu0 %1184 }
 0x2d3   : > { %v1342_v10 = vsub.f32 %v4811_v34, %v1185_v17  ;;  %v1343_v36 = vsub.f32 %v4813_v35, %v1185_v17 }
 0x2d4   : > { %1304 = vperm.xlu0 %3756, %v5252_v55  }
 0x2d5   : > { %v1406_v22 = vmul.f32 1.442695, %v1342_v10  ;;  %v1408_v20 = vmul.f32 1.442695, %v1343_v36 }
 0x2d6   : > { %v1190_v23 = vpop.permute.xlu1 %1189 }
 0x2d7   : > { %3806 = vpow2.f32 %v1406_v22  ;;  %v1344_v7 = vsub.f32 %v4817_v37, %v1190_v23  ;;  %v1345_v19 = vsub.f32 %v4819_v38, %v1190_v23 }
 0x2d8   : > { %3808 = vpow2.f32 %v1408_v20  ;;  %1314 = vperm.xlu0 %3756, %v5274_v13  }
 0x2d9   : > { %v1410_v24 = vmul.f32 1.442695, %v1344_v7  ;;  %v1412_v52 = vmul.f32 1.442695, %v1345_v19 }
 0x2da   : > { %v1195_v8 = vpop.permute.xlu1 %1194 }
 0x2db   : > { %3810 = vpow2.f32 %v1410_v24  ;;  %v1346_v34 = vsub.f32 %v4823_v40, %v1195_v8  ;;  %v1347_v35 = vsub.f32 %v4825_v41, %v1195_v8 }
 0x2dc   : > { %3812 = vpow2.f32 %v1412_v52  ;;  %1324 = vperm.xlu0 %3756, %v5296_v16  }
 0x2dd   : > { %v1414_v10 = vmul.f32 1.442695, %v1346_v34  ;;  %v1416_v36 = vmul.f32 1.442695, %v1347_v35 }
 0x2de   : > { %v1200_v17 = vpop.permute.xlu1 %1199 }
 0x2df   : > { %3814 = vpow2.f32 %v1414_v10  ;;  %v1348_v37 = vsub.f32 %v4829_v43, %v1200_v17  ;;  %v1349_v38 = vsub.f32 %v4831_v44, %v1200_v17 }
 0x2e0   : > { %3816 = vpow2.f32 %v1416_v36 }
 0x2e1   : > { %v1418_v23 = vmul.f32 1.442695, %v1348_v37  ;;  %v1420_v19 = vmul.f32 1.442695, %v1349_v38 }
 0x2e2   : > { %v1205_v20 = vpop.permute.xlu0 %1204 }
 0x2e3   : > { %3818 = vpow2.f32 %v1418_v23  ;;  %v1350_v40 = vsub.f32 %v4835_v46, %v1205_v20  ;;  %v1351_v41 = vsub.f32 %v4837_v48, %v1205_v20 }
 0x2e4   : > { %v3807_v8 = vpop.eup %3806  ;;  %3820 = vpow2.f32 %v1420_v19 }
 0x2e5   : > { %v3809_v24 = vpop.eup %3808  ;;  %v1422_v52 = vmul.f32 1.442695, %v1350_v40  ;;  %v1424_v7 = vmul.f32 1.442695, %v1351_v41 }
 0x2e6   : > { %v1210_v22 = vpop.permute.xlu0 %1209  ;;  %v5329_v34 = vadd.f32 %v3809_v24, %v3807_v8 }
 0x2e7   : > { %3822 = vpow2.f32 %v1422_v52  ;;  %v1352_v43 = vsub.f32 %v4841_v50, %v1210_v22  ;;  %v1353_v44 = vsub.f32 %v4843_v51, %v1210_v22 }
 0x2e8   : > { %v3811_v35 = vpop.eup %3810  ;;  %3824 = vpow2.f32 %v1424_v7 }
 0x2e9   : > { %v3813_v10 = vpop.eup %3812  ;;  %v1426_v36 = vmul.f32 1.442695, %v1352_v43  ;;  %v1428_v46 = vmul.f32 1.442695, %v1353_v44  ;;  %v1983_v17 = vpack.c.bf16 %v3811_v35, %v3807_v8 }
 0x2ea   : > { %v1215_v48 = vpop.permute.xlu1 %1214  ;;  %v1984_v37 = vpack.c.bf16 %v3813_v10, %v3809_v24  ;;  %v5333_v38 = vadd.f32 %v3813_v10, %v3811_v35 }
 0x2eb   : > { %3826 = vpow2.f32 %v1426_v36  ;;  %v1354_v23 = vsub.f32 %v4847_v53, %v1215_v48  ;;  %v1355_v19 = vsub.f32 %v4849_v54, %v1215_v48 }
 0x2ec   : > { %v3815_v20 = vpop.eup %3814  ;;  %3828 = vpow2.f32 %v1428_v46  ;;  %2175 = vmatprep.mubr.bf16.mxu1 %v1984_v37 }
 0x2ed   : > { %v3817_v50 = vpop.eup %3816  ;;  %v1430_v51 = vmul.f32 1.442695, %v1354_v23  ;;  %v1432_v40 = vmul.f32 1.442695, %v1355_v19  ;;  %2176 = vmatmul.mubr.bf16.vlgmr.msra.gmra.mxu1 %v1983_v17 }
 0x2ee   : > { %v1220_v41 = vpop.permute.xlu1 %1219  ;;  %v5337_v52 = vadd.f32 %v3817_v50, %v3815_v20 }
 0x2ef   : > { %3830 = vpow2.f32 %v1430_v51  ;;  %v1356_v8 = vsub.f32 %v4853_v56, %v1220_v41  ;;  %v1357_v24 = vsub.f32 %v4855_v57, %v1220_v41 }
 0x2f0   : > { %v3819_v7 = vpop.eup %3818  ;;  %3832 = vpow2.f32 %v1432_v40 }
 0x2f1   : > { %v3821_v53 = vpop.eup %3820  ;;  %v1434_v22 = vmul.f32 1.442695, %v1356_v8  ;;  %v1436_v54 = vmul.f32 1.442695, %v1357_v24  ;;  %v1985_v43 = vpack.c.bf16 %v3819_v7, %v3815_v20 }
 0x2f2   : > { %v1225_v44 = vpop.permute.xlu0 %1224  ;;  %v1986_v35 = vpack.c.bf16 %v3821_v53, %v3817_v50  ;;  %v5341_v10 = vadd.f32 %v3821_v53, %v3819_v7 }
 0x2f3   : > { %3834 = vpow2.f32 %v1434_v22  ;;  %v1358_v36 = vsub.f32 %v4859_v59, %v1225_v44  ;;  %v1359_v46 = vsub.f32 %v4861_v60, %v1225_v44 }
 0x2f4   : > { %v3823_v17 = vpop.eup %3822  ;;  %3836 = vpow2.f32 %v1436_v54  ;;  %2183 = vmatprep.mubr.bf16.mxu1 %v1986_v35 }
 0x2f5   : > { %v3825_v56 = vpop.eup %3824  ;;  %v1438_v57 = vmul.f32 1.442695, %v1358_v36  ;;  %v1440_v48 = vmul.f32 1.442695, %v1359_v46  ;;  %2184 = vmatmul.mubr.bf16.gmra.mxu1 %v1985_v43 }
 0x2f6   : > { %v1230_v37 = vpop.permute.xlu0 %1229  ;;  %v5345_v23 = vadd.f32 %v3825_v56, %v3823_v17 }
 0x2f7   : > { %3838 = vpow2.f32 %v1438_v57  ;;  %v1360_v19 = vsub.f32 %v4865_v62, %v1230_v37  ;;  %v1361_v20 = vsub.f32 %v4867_v63, %v1230_v37 }
 0x2f8   : > { %v3827_v50 = vpop.eup %3826  ;;  %3840 = vpow2.f32 %v1440_v48 }
 0x2f9   : > { %v3829_v59 = vpop.eup %3828  ;;  %v1442_v51 = vmul.f32 1.442695, %v1360_v19  ;;  %v1444_v60 = vmul.f32 1.442695, %v1361_v20  ;;  %v1987_v40 = vpack.c.bf16 %v3827_v50, %v3823_v17 }
 0x2fa   : > { %v1235_v41 = vpop.permute.xlu1 %1234  ;;  %v1988_v8 = vpack.c.bf16 %v3829_v59, %v3825_v56  ;;  %v5349_v24 = vadd.f32 %v3829_v59, %v3827_v50 }
 0x2fb   : > { %3842 = vpow2.f32 %v1442_v51  ;;  %v1362_v7 = vsub.f32 %v4871_v1, %v1235_v41  ;;  %v1363_v53 = vsub.f32 %v4873_v2, %v1235_v41 }
 0x2fc   : > { %v3831_v22 = vpop.eup %3830  ;;  %3844 = vpow2.f32 %v1444_v60  ;;  %2191 = vmatprep.mubr.bf16.mxu1 %v1988_v8 }
 0x2fd   : > { %v3833_v62 = vpop.eup %3832  ;;  %v1446_v63 = vmul.f32 1.442695, %v1362_v7  ;;  %v1448_v54 = vmul.f32 1.442695, %v1363_v53  ;;  %2192 = vmatmul.mubr.bf16.gmra.mxu1 %v1987_v40 }
 0x2fe   : > { %v1240_v43 = vpop.permute.xlu1 %1239  ;;  %v5353_v44 = vadd.f32 %v3833_v62, %v3831_v22 }
 0x2ff   : > { %3846 = vpow2.f32 %v1446_v63  ;;  %v1364_v35 = vsub.f32 %v4877_v4, %v1240_v43  ;;  %v1365_v36 = vsub.f32 %v4879_v5, %v1240_v43  ;;  %v6158_v63 = vsub.f32 %v4995_v42, %v5000_v61 }
 0x300   : > { %v3835_v46 = vpop.eup %3834  ;;  %3848 = vpow2.f32 %v1448_v54  ;;  %v6159_v43 = vsub.f32 %v5002_v12, %v5012_v33  ;;  %v6163_v61 = vsub.f32 %v5050_v0, %v5060_v29  ;;  %v6164_v12 = vsub.f32 %v5062_v32, %v5070_v58  ;;  %v5400_v32 = vld [vmem:[#allocation2 + $0xf8] sm:$0xff] }
 0x301   : > { %v3837_v1 = vpop.eup %3836  ;;  %v1450_v17 = vmul.f32 1.442695, %v1364_v35  ;;  %v1452_v2 = vmul.f32 1.442695, %v1365_v36  ;;  %v1989_v56 = vpack.c.bf16 %v3835_v46, %v3831_v22  ;;  %v1118_v54 = vmul.f32 1.442695, %v6158_v63 }
 0x302   : > { %v1990_v57 = vpack.c.bf16 %v3837_v1, %v3833_v62  ;;  %v5357_v48 = vadd.f32 %v3837_v1, %v3835_v46  ;;  %v1120_v35 = vmul.f32 1.442695, %v6159_v43  ;;  %v6160_v36 = vsub.f32 %v5014_v49, %v5024_v21  ;;  %v6183_v63 = vld [vmem:[#allocation82_spill] sm:$0xff] }
 0x303   : > { %3850 = vpow2.f32 %v1450_v17  ;;  %v6161_v1 = vsub.f32 %v5026_v15, %v5036_v47  ;;  %v1128_v42 = vmul.f32 1.442695, %v6163_v61  ;;  %v1130_v33 = vmul.f32 1.442695, %v6164_v12  ;;  %v6189_v61 = vld [vmem:[#allocation85_spill] sm:$0xff] }
 0x304   : > { %v3839_v37 = vpop.eup %3838  ;;  %3852 = vpow2.f32 %v1452_v2  ;;  %2199 = vmatprep.mubr.bf16.mxu1 %v1990_v57  ;;  %v1122_v46 = vmul.f32 1.442695, %v6160_v36  ;;  %v6162_v2 = vsub.f32 %v5038_v18, %v5048_v3  ;;  %v6165_v49 = vsub.f32 %v5072_v28, %v5080_v45  ;;  %v6168_v3 = vld [vmem:[#allocation69_spill] sm:$0xff]  ;;  %v6170_v28 = vld [vmem:[#allocation70_spill] sm:$0xff]  ;;  %v6171_v45 = vld [vmem:[#allocation71_spill] sm:$0xff] }
 0x305   : > { %v3841_v19 = vpop.eup %3840  ;;  %2200 = vmatmul.mubr.bf16.gmra.mxu1 %v1989_v56  ;;  %v1124_v17 = vmul.f32 1.442695, %v6161_v1  ;;  %3854 = vpow2.f32 %v1118_v54  ;;  %v6166_v15 = vsub.f32 %v5082_v31, %v5090_v9  ;;  %v6167_v29 = vsub.f32 %v5092_v6, %v5100_v26  ;;  %v6173_v9 = vld [vmem:[#allocation72_spill] sm:$0xff]  ;;  %v6175_v26 = vld [vmem:[#allocation73_spill] sm:$0xff]  ;;  %v6176_v6 = vld [vmem:[#allocation75_spill] sm:$0xff] }
 0x306   : > { %v5359_v20 = vadd.f32 %v3841_v19, %v3839_v37  ;;  %v1126_v56 = vmul.f32 1.442695, %v6162_v2  ;;  %3856 = vpow2.f32 %v1120_v35  ;;  %v1132_v21 = vmul.f32 1.442695, %v6165_v49  ;;  %v6185_v35 = vld [vmem:[#allocation83_spill] sm:$0xff]  ;;  %v6187_v1 = vld [vmem:[#allocation84_spill] sm:$0xff] }
 0x307   : > { %3858 = vpow2.f32 %v1122_v46  ;;  %v1134_v47 = vmul.f32 1.442695, %v6166_v15  ;;  %v1136_v18 = vmul.f32 1.442695, %v6167_v29  ;;  %v6169_v0 = vsub.f32 %v5102_v25, %v6168_v3 }
 0x308   : > { %v3843_v4 = vpop.eup %3842  ;;  %3860 = vpow2.f32 %v1124_v17  ;;  %v6172_v57 = vsub.f32 %v6170_v28, %v6171_v45  ;;  %v6174_v31 = vsub.f32 %v6173_v9, %v5130_v39  ;;  %v6188_v17 = vsub.f32 %v6187_v1, %v5194_v11  ;;  %v6196_v11 = vld [vmem:[#allocation33_spill] sm:$0xff]  ;;  %v6212_v1 = vld [vmem:[#allocation94_spill] sm:$0xff] }
 0x309   : > { %v3845_v50 = vpop.eup %3844  ;;  %v1991_v5 = vpack.c.bf16 %v3843_v4, %v3839_v37  ;;  %3862 = vpow2.f32 %v1126_v56  ;;  %v1138_v58 = vmul.f32 1.442695, %v6169_v0  ;;  %v6197_v0 = vld [vmem:[#allocation34_spill] sm:$0xff]  ;;  %v6199_v45 = vld [vmem:[#allocation89_spill] sm:$0xff] }
 0x30a   : > { %v1992_v59 = vpack.c.bf16 %v3845_v50, %v3841_v19  ;;  %v5361_v51 = vadd.f32 %v3845_v50, %v3843_v4  ;;  %3864 = vpow2.f32 %v1128_v42  ;;  %v1140_v37 = vmul.f32 1.442695, %v6172_v57  ;;  %v6190_v42 = vld [vmem:[#allocation86_spill] sm:$0xff] }
 0x30b   : > { %3866 = vpow2.f32 %v1130_v33  ;;  %v1142_v19 = vmul.f32 1.442695, %v6174_v31  ;;  %v6177_v50 = vsub.f32 %v6175_v26, %v6176_v6  ;;  %v1154_v2 = vmul.f32 1.442695, %v6188_v17  ;;  %v6200_v57 = vld [vmem:[#allocation90_spill] sm:$0xff]  ;;  %v5461_v26 = vld [vmem:[#allocation2 + $0xf0] sm:$0xff] }
 0x30c   : > { %v3847_v60 = vpop.eup %3846  ;;  %2207 = vmatprep.mubr.bf16.mxu1 %v1992_v59  ;;  %3868 = vpow2.f32 %v1132_v21  ;;  %v6178_v59 = vld [vmem:[#allocation76_spill] sm:$0xff]  ;;  %v6191_v12 = vsub.f32 %v6189_v61, %v6190_v42 }
 0x30d   : > { %v3849_v40 = vpop.eup %3848  ;;  %2208 = vmatmul.mubr.bf16.gmra.mxu1 %v1991_v5  ;;  %3870 = vpow2.f32 %v1134_v47  ;;  %v1144_v5 = vmul.f32 1.442695, %v6177_v50  ;;  %v6194_v21 = vld [vmem:[#allocation88_spill] sm:$0xff]  ;;  %v6203_v50 = vld [vmem:[#allocation91_spill] sm:$0xff] }
 0x30e   : > { %v5363_v41 = vadd.f32 %v3849_v40, %v3847_v60  ;;  %3872 = vpow2.f32 %v1136_v18  ;;  %v1156_v33 = vmul.f32 1.442695, %v6191_v12 }
 0x30f   : > { %3874 = vpow2.f32 %v1138_v58 }
 0x310   : > { %v3851_v8 = vpop.eup %3850  ;;  %3876 = vpow2.f32 %v1140_v37  ;;  %v6201_v37 = vsub.f32 %v6199_v45, %v6200_v57 }
 0x311   : > { %v3853_v7 = vpop.eup %3852  ;;  %v1993_v53 = vpack.c.bf16 %v3851_v8, %v3847_v60  ;;  %v6179_v60 = vsub.f32 %v6178_v59, %v5152_v27  ;;  %3878 = vpow2.f32 %v1142_v19 }
 0x312   : > { %v1994_v22 = vpack.c.bf16 %v3853_v7, %v3849_v40  ;;  %v5365_v62 = vadd.f32 %v3853_v7, %v3851_v8  ;;  %v6180_v8 = vld [vmem:[#allocation78_spill] sm:$0xff]  ;;  %v5428_v27 = vpop.eup %3854  ;;  %3880 = vpow2.f32 %v1144_v5  ;;  %v1160_v9 = vmul.f32 1.442695, %v6201_v37  ;;  %v6204_v5 = vld [vmem:[#allocation92_spill] sm:$0xff] }
 0x313   : > { %v1146_v40 = vmul.f32 1.442695, %v6179_v60  ;;  %v6181_v7 = vsub.f32 %v6180_v8, %v5163_v30  ;;  %v6186_v30 = vsub.f32 %v6185_v35, %v5185_v14  ;;  %v5433_v46 = vpop.eup %3856  ;;  %v6193_v14 = vld [vmem:[#allocation87_spill] sm:$0xff]  ;;  %v6205_v59 = vsub.f32 %v6203_v50, %v6204_v5 }
 0x314   : > { %2215 = vmatprep.mubr.bf16.mxu1 %v1994_v22  ;;  %v6182_v22 = vld [vmem:[#allocation80_spill] sm:$0xff]  ;;  %v5438_v56 = vpop.eup %3858  ;;  %v6195_v15 = vsub.f32 %v6193_v14, %v6194_v21  ;;  %v6216_v14 = vld [vmem:[#allocation97_spill] sm:$0xff] }
 0x315   : > { %2216 = vmatmul.mubr.bf16.gmra.mxu1 %v1993_v53  ;;  %v1148_v39 = vmul.f32 1.442695, %v6181_v7  ;;  %v6184_v54 = vsub.f32 %v6182_v22, %v6183_v63  ;;  %v1152_v36 = vmul.f32 1.442695, %v6186_v30  ;;  %3882 = vpow2.f32 %v1146_v40  ;;  %v5444_v49 = vpop.eup %3860  ;;  %v6207_v7 = vld [vmem:[#allocation35_spill] sm:$0xff]  ;;  %v6208_v22 = vld [vmem:[#allocation36_spill] sm:$0xff] }
 0x316   : > { %6192 = vst [vmem:[#allocation69_spill] sm:$0xff] %v5444_v49  ;;  %v1158_v47 = vmul.f32 1.442695, %v6195_v15  ;;  %v5449_v18 = vpop.eup %3862  ;;  %v1162_v60 = vmul.f32 1.442695, %v6205_v59 }
 0x317   : > { %v1150_v43 = vmul.f32 1.442695, %v6184_v54  ;;  %3884 = vpow2.f32 %v1148_v39  ;;  %v5453_v28 = vpop.eup %3864 }
 0x318   : > { %6198 = vst [vmem:[#allocation70_spill] sm:$0xff] %v5453_v28  ;;  %v5458_v31 = vpop.eup %3866 }
 0x319   : > { %3886 = vpow2.f32 %v1150_v43  ;;  %v5463_v6 = vpop.eup %3868 }
 0x31a   : > { %3888 = vpow2.f32 %v1152_v36  ;;  %6202 = vst [vmem:[#allocation71_spill] sm:$0xff] %v5463_v6  ;;  %v5468_v8 = vpop.eup %3870  ;;  %v6211_v36 = vld [vmem:[#allocation93_spill] sm:$0xff] }
 0x31b   : > { %3890 = vpow2.f32 %v1154_v2  ;;  %6206 = vst [vmem:[#allocation72_spill] sm:$0xff] %v5468_v8  ;;  %v5472_v43 = vpop.eup %3872  ;;  %v6213_v17 = vsub.f32 %v6211_v36, %v6212_v1  ;;  %v6227_v1 = vld [vmem:[#allocation40_spill] sm:$0xff] }
 0x31c   : > { %3892 = vpow2.f32 %v1156_v33  ;;  %6209 = vst [vmem:[#allocation73_spill] sm:$0xff] %v5472_v43  ;;  %v5477_v30 = vpop.eup %3874  ;;  %v6215_v33 = vld [vmem:[#allocation96_spill] sm:$0xff] }
 0x31d   : > { %3894 = vpow2.f32 %v1158_v47  ;;  %6210 = vst [vmem:[#allocation75_spill] sm:$0xff] %v5477_v30  ;;  %v1164_v2 = vmul.f32 1.442695, %v6213_v17  ;;  %v5483_v12 = vpop.eup %3876  ;;  %v6217_v21 = vsub.f32 %v6215_v33, %v6216_v14  ;;  %v6230_v14 = vld [vmem:[#allocation52_spill] sm:$0xff] }
 0x31e   : > { %6214 = vst [vmem:[#allocation76_spill] sm:$0xff] %v5483_v12 }
 0x31f   : > { %v1168_v15 = vmul.f32 1.442695, %v6217_v21 }
 0x323   : > { %v1053_v4 = vpop.xlane.xlu0 %1052 }
 0x324   : > { %v5412_v25 = vmax.f32 %v5400_v32, %v1053_v4 }
 0x326   : > { %2399 = vst.msk [vmem:[#allocation2 + $0xf8] sm:$0xff] %vm1726_vm1, %v5412_v25  ;;  %1339 = vperm.xlu1 %3757, %v5412_v25  }
 0x32a   : > { %1793 = vperm.xlu1 %3757, %v5428_v27  }
 0x32b   : > { %v1245_v29 = vpop.permute.xlu0 %1244 }
 0x32c   : > { %v1366_v3 = vsub.f32 %v6196_v11, %v1245_v29  ;;  %v1367_v58 = vsub.f32 %v6197_v0, %v1245_v29  ;;  %v5493_v11 = vpop.eup %3878 }
 0x32d   : > { %6218 = vst [vmem:[#allocation78_spill] sm:$0xff] %v5493_v11  ;;  %v5497_v37 = vpop.eup %3880 }
 0x32e   : > { %v1454_v19 = vmul.f32 1.442695, %v1366_v3  ;;  %v1456_v4 = vmul.f32 1.442695, %v1367_v58  ;;  %1803 = vperm.xlu1 %3757, %v5438_v56   ;;  %v6219_v3 = vld [vmem:[#allocation37_spill] sm:$0xff]  ;;  %v6220_v58 = vld [vmem:[#allocation38_spill] sm:$0xff]  ;;  %v5501_v5 = vpop.eup %3882 }
 0x32f   : > { %v1250_v40 = vpop.permute.xlu0 %1249  ;;  %6221 = vst [vmem:[#allocation80_spill] sm:$0xff] %v5497_v37 }
 0x330   : > { %3896 = vpow2.f32 %v1454_v19  ;;  %v1368_v39 = vsub.f32 %v6207_v7, %v1250_v40  ;;  %v1369_v63 = vsub.f32 %v6208_v22, %v1250_v40  ;;  %v1050_v54 = vpop.xlane.xlu1 %1049  ;;  %v5504_v40 = vpop.eup %3884 }
 0x331   : > { %3898 = vpow2.f32 %v1456_v4  ;;  %v5475_v35 = vmax.f32 %v5461_v26, %v1050_v54  ;;  %v6223_v4 = vld [vmem:[#allocation42_spill] sm:$0xff]  ;;  %6224 = vst [vmem:[#allocation82_spill] sm:$0xff] %v5504_v40  ;;  %v6226_v54 = vld [vmem:[#allocation39_spill] sm:$0xff] }
 0x332   : > { %3900 = vpow2.f32 %v1160_v9  ;;  %v1458_v61 = vmul.f32 1.442695, %v1368_v39  ;;  %v1460_v42 = vmul.f32 1.442695, %v1369_v63  ;;  %1808 = vperm.xlu1 %3757, %v5444_v49   ;;  %v6222_v9 = vld [vmem:[#allocation41_spill] sm:$0xff]  ;;  %v5507_v63 = vpop.eup %3886 }
 0x333   : > { %3902 = vpow2.f32 %v1162_v60  ;;  %2398 = vst.msk [vmem:[#allocation2 + $0xf0] sm:$0xff] %vm1726_vm1, %v5475_v35  ;;  %1334 = vperm.xlu0 %3756, %v5475_v35   ;;  %v1255_v29 = vpop.permute.xlu0 %1254  ;;  %6225 = vst [vmem:[#allocation83_spill] sm:$0xff] %v5507_v63 }
 0x334   : > { %3904 = vpow2.f32 %v1458_v61  ;;  %v1370_v0 = vsub.f32 %v6219_v3, %v1255_v29  ;;  %v1371_v45 = vsub.f32 %v6220_v58, %v1255_v29  ;;  %v1265_v57 = vpop.permute.xlu1 %1264  ;;  %v5511_v61 = vpop.eup %3888 }
 0x335   : > { %3906 = vpow2.f32 %v1460_v42  ;;  %v1374_v19 = vsub.f32 %v6222_v9, %v1265_v57  ;;  %v1375_v50 = vsub.f32 %v6223_v4, %v1265_v57  ;;  %6228 = vst [vmem:[#allocation84_spill] sm:$0xff] %v5511_v61  ;;  %v6229_v42 = vld [vmem:[#allocation51_spill] sm:$0xff] }
 0x336   : > { %3908 = vpow2.f32 %v1164_v2  ;;  %v1462_v59 = vmul.f32 1.442695, %v1370_v0  ;;  %v1464_v60 = vmul.f32 1.442695, %v1371_v45  ;;  %1818 = vperm.xlu1 %3757, %v5453_v28  }
 0x337   : > { %3910 = vpow2.f32 %v1168_v15  ;;  %v1470_v7 = vmul.f32 1.442695, %v1374_v19  ;;  %v1472_v39 = vmul.f32 1.442695, %v1375_v50  ;;  %1798 = vperm.xlu0 %3756, %v5433_v46   ;;  %v1260_v22 = vpop.permute.xlu0 %1259  ;;  %v5515_v15 = vpop.eup %3890  ;;  %v6233_v19 = vld [vmem:[#allocation43_spill] sm:$0xff]  ;;  %v6234_v50 = vld [vmem:[#allocation44_spill] sm:$0xff] }
 0x338   : > { %3912 = vpow2.f32 %v1462_v59  ;;  %v1372_v36 = vsub.f32 %v6226_v54, %v1260_v22  ;;  %v1373_v17 = vsub.f32 %v6227_v1, %v1260_v22  ;;  %v1290_v2 = vpop.permute.xlu1 %1289  ;;  %v5518_v0 = vpop.eup %3892  ;;  %v6235_v22 = vld [vmem:[#allocation55_spill] sm:$0xff] }
 0x339   : > { %3914 = vpow2.f32 %v1464_v60  ;;  %v1384_v33 = vsub.f32 %v6229_v42, %v1290_v2  ;;  %v1385_v21 = vsub.f32 %v6230_v14, %v1290_v2  ;;  %6231 = vst [vmem:[#allocation85_spill] sm:$0xff] %v5518_v0  ;;  %v5521_v9 = vpop.eup %3894 }
 0x33a   : > { %3916 = vpow2.f32 %v1470_v7  ;;  %v1466_v29 = vmul.f32 1.442695, %v1372_v36  ;;  %v1468_v3 = vmul.f32 1.442695, %v1373_v17  ;;  %1828 = vperm.xlu1 %3757, %v5463_v6   ;;  %6232 = vst [vmem:[#allocation86_spill] sm:$0xff] %v5521_v9  ;;  %v6236_v36 = vld [vmem:[#allocation56_spill] sm:$0xff] }
 0x33b   : > { %3918 = vpow2.f32 %v1472_v39  ;;  %v1490_v58 = vmul.f32 1.442695, %v1384_v33  ;;  %v1492_v45 = vmul.f32 1.442695, %v1385_v21  ;;  %1813 = vperm.xlu0 %3756, %v5449_v18   ;;  %v1270_v57 = vpop.permute.xlu0 %1269 }
 0x33c   : > { %3920 = vpow2.f32 %v1466_v29  ;;  %v1376_v4 = vsub.f32 %v6233_v19, %v1270_v57  ;;  %v1377_v59 = vsub.f32 %v6234_v50, %v1270_v57  ;;  %v1300_v60 = vpop.permute.xlu1 %1299  ;;  %v6239_v57 = vld [vmem:[#allocation45_spill] sm:$0xff] }
 0x33d   : > { %v3897_v7 = vpop.eup %3896  ;;  %3922 = vpow2.f32 %v1468_v3  ;;  %v1388_v54 = vsub.f32 %v6235_v22, %v1300_v60  ;;  %v1389_v1 = vsub.f32 %v6236_v36, %v1300_v60  ;;  %v6241_v60 = vld [vmem:[#allocation59_spill] sm:$0xff] }
 0x33e   : > { %v3899_v39 = vpop.eup %3898  ;;  %3924 = vpow2.f32 %v1490_v58  ;;  %v1474_v17 = vmul.f32 1.442695, %v1376_v4  ;;  %v1476_v2 = vmul.f32 1.442695, %v1377_v59  ;;  %1838 = vperm.xlu1 %3757, %v5472_v43   ;;  %v6240_v58 = vld [vmem:[#allocation46_spill] sm:$0xff] }
 0x33f   : > { %v5528_v42 = vpop.eup %3900  ;;  %3926 = vpow2.f32 %v1492_v45  ;;  %v1498_v33 = vmul.f32 1.442695, %v1388_v54  ;;  %v1500_v14 = vmul.f32 1.442695, %v1389_v1  ;;  %1823 = vperm.xlu0 %3756, %v5458_v31   ;;  %v1275_v21 = vpop.permute.xlu0 %1274  ;;  %v5531_v29 = vadd.f32 %v3899_v39, %v3897_v7  ;;  %v6242_v45 = vld [vmem:[#allocation60_spill] sm:$0xff] }
 0x340   : > { %6237 = vst [vmem:[#allocation87_spill] sm:$0xff] %v5528_v42  ;;  %v5533_v3 = vpop.eup %3902  ;;  %3928 = vpow2.f32 %v1474_v17  ;;  %v1378_v19 = vsub.f32 %v6239_v57, %v1275_v21  ;;  %v1379_v4 = vsub.f32 %v6240_v58, %v1275_v21  ;;  %v1310_v50 = vpop.permute.xlu1 %1309 }
 0x341   : > { %6238 = vst [vmem:[#allocation88_spill] sm:$0xff] %v5533_v3  ;;  %v3905_v59 = vpop.eup %3904  ;;  %3930 = vpow2.f32 %v1476_v2  ;;  %v1392_v22 = vsub.f32 %v6241_v60, %v1310_v50  ;;  %v1393_v54 = vsub.f32 %v6242_v45, %v1310_v50  ;;  %v6245_v50 = vld [vmem:[#allocation47_spill] sm:$0xff] }
 0x342   : > { %v3907_v36 = vpop.eup %3906  ;;  %3932 = vpow2.f32 %v1498_v33  ;;  %v1478_v1 = vmul.f32 1.442695, %v1378_v19  ;;  %v1480_v47 = vmul.f32 1.442695, %v1379_v4  ;;  %1848 = vperm.xlu1 %3757, %v5483_v12   ;;  %v1995_v53 = vpack.c.bf16 %v3905_v59, %v3897_v7  ;;  %v6246_v33 = vld [vmem:[#allocation48_spill] sm:$0xff]  ;;  %v6247_v12 = vld [vmem:[#allocation63_spill] sm:$0xff] }
 0x343   : > { %v5540_v43 = vpop.eup %3908  ;;  %3934 = vpow2.f32 %v1500_v14  ;;  %v1506_v17 = vmul.f32 1.442695, %v1392_v22  ;;  %v1508_v57 = vmul.f32 1.442695, %v1393_v54  ;;  %1833 = vperm.xlu0 %3756, %v5468_v8   ;;  %v1280_v21 = vpop.permute.xlu0 %1279  ;;  %v1996_v2 = vpack.c.bf16 %v3907_v36, %v3899_v39  ;;  %v6248_v22 = vld [vmem:[#allocation64_spill] sm:$0xff] }
 0x344   : > { %6243 = vst [vmem:[#allocation33_spill] sm:$0xff] %v5540_v43  ;;  %v5543_v58 = vpop.eup %3910  ;;  %3936 = vpow2.f32 %v1478_v1  ;;  %v1380_v60 = vsub.f32 %v6245_v50, %v1280_v21  ;;  %v1381_v19 = vsub.f32 %v6246_v33, %v1280_v21  ;;  %v1320_v4 = vpop.permute.xlu1 %1319  ;;  %v5547_v45 = vadd.f32 %v3907_v36, %v3905_v59 }
 0x345   : > { %6244 = vst [vmem:[#allocation34_spill] sm:$0xff] %v5543_v58  ;;  %v3913_v7 = vpop.eup %3912  ;;  %3938 = vpow2.f32 %v1480_v47  ;;  %v1396_v14 = vsub.f32 %v6247_v12, %v1320_v4  ;;  %v1397_v54 = vsub.f32 %v6248_v22, %v1320_v4  ;;  %2223 = vmatprep.mubr.bf16.mxu1 %v1996_v2  ;;  %v6249_v2 = vld [vmem:[#allocation49_spill] sm:$0xff]  ;;  %v6252_v22 = vld [vmem:[#allocation68_spill] sm:$0xff] }
 0x346   : > { %v3915_v6 = vpop.eup %3914  ;;  %3940 = vpow2.f32 %v1506_v17  ;;  %v1482_v39 = vmul.f32 1.442695, %v1380_v60  ;;  %v1484_v28 = vmul.f32 1.442695, %v1381_v19  ;;  %2224 = vmatmul.mubr.bf16.gmra.mxu1 %v1995_v53  ;;  %1858 = vperm.xlu1 %3757, %v5497_v37   ;;  %v6250_v17 = vld [vmem:[#allocation50_spill] sm:$0xff]  ;;  %v6251_v19 = vld [vmem:[#allocation67_spill] sm:$0xff] }
 0x347   : > { %v5552_v1 = vpop.eup %3916  ;;  %3942 = vpow2.f32 %v1508_v57  ;;  %v1514_v21 = vmul.f32 1.442695, %v1396_v14  ;;  %v1516_v59 = vmul.f32 1.442695, %v1397_v54  ;;  %1843 = vperm.xlu0 %3756, %v5477_v30   ;;  %v1285_v47 = vpop.permute.xlu0 %1284  ;;  %v5555_v36 = vadd.f32 %v3915_v6, %v3913_v7 }
 0x348   : > { %v3919_v12 = vpop.eup %3918  ;;  %3944 = vpow2.f32 %v1482_v39  ;;  %v1382_v50 = vsub.f32 %v6249_v2, %v1285_v47  ;;  %v1383_v60 = vsub.f32 %v6250_v17, %v1285_v47  ;;  %v1330_v33 = vpop.permute.xlu1 %1329 }
 0x349   : > { %v3921_v53 = vpop.eup %3920  ;;  %3946 = vpow2.f32 %v1484_v28  ;;  %v1400_v4 = vsub.f32 %v6251_v19, %v1330_v33  ;;  %v1401_v57 = vsub.f32 %v6252_v22, %v1330_v33  ;;  %v5562_v14 = vadd.f32 %v3919_v12, %v5552_v1  ;;  %v6253_v22 = vld [vmem:[#allocation53_spill] sm:$0xff] }
 0x34a   : > { %v3923_v54 = vpop.eup %3922  ;;  %3948 = vpow2.f32 %v1514_v21  ;;  %v1486_v37 = vmul.f32 1.442695, %v1382_v50  ;;  %v1488_v30 = vmul.f32 1.442695, %v1383_v60  ;;  %1868 = vperm.xlu1 %3757, %v5504_v40   ;;  %v1997_v39 = vpack.c.bf16 %v3921_v53, %v3913_v7  ;;  %v6254_v21 = vld [vmem:[#allocation54_spill] sm:$0xff] }
 0x34b   : > { %v5565_v2 = vpop.eup %3924  ;;  %3950 = vpow2.f32 %v1516_v59  ;;  %v1522_v47 = vmul.f32 1.442695, %v1400_v4  ;;  %v1524_v17 = vmul.f32 1.442695, %v1401_v57  ;;  %1853 = vperm.xlu0 %3756, %v5493_v11   ;;  %v1295_v28 = vpop.permute.xlu0 %1294  ;;  %v1998_v19 = vpack.c.bf16 %v3923_v54, %v3915_v6  ;;  %v6255_v4 = vld [vmem:[#allocation95_spill] sm:$0xff] }
 0x34c   : > { %v5568_v33 = vpop.eup %3926  ;;  %3952 = vpow2.f32 %v1486_v37  ;;  %v1386_v8 = vsub.f32 %v6253_v22, %v1295_v28  ;;  %v1387_v50 = vsub.f32 %v6254_v21, %v1295_v28  ;;  %v5572_v60 = vadd.f32 %v3923_v54, %v3921_v53  ;;  %v6257_v54 = vld [vmem:[#allocation99_spill] sm:$0xff] }
 0x34d   : > { %v3929_v40 = vpop.eup %3928  ;;  %3954 = vpow2.f32 %v1488_v30  ;;  %2231 = vmatprep.mubr.bf16.mxu1 %v1998_v19  ;;  %v5576_v7 = vadd.f32 %v5568_v33, %v5565_v2  ;;  %v6256_v6 = vsub.f32 %v6255_v4, %v5252_v55  ;;  %v6258_v30 = vld [vmem:[#allocation100_spill] sm:$0xff] }
 0x34e   : > { %v3931_v59 = vpop.eup %3930  ;;  %3956 = vpow2.f32 %v1522_v47  ;;  %v1494_v37 = vmul.f32 1.442695, %v1386_v8  ;;  %v1496_v11 = vmul.f32 1.442695, %v1387_v50  ;;  %2232 = vmatmul.mubr.bf16.gmra.mxu1 %v1997_v39  ;;  %1878 = vperm.xlu1 %3757, %v5511_v61   ;;  %v6259_v28 = vsub.f32 %v6257_v54, %v6258_v30  ;;  %v6260_v8 = vld [vmem:[#allocation57_spill] sm:$0xff]  ;;  %v6261_v47 = vld [vmem:[#allocation58_spill] sm:$0xff] }
 0x34f   : > { %v1166_v57 = vmul.f32 1.442695, %v6256_v6  ;;  %v5582_v53 = vpop.eup %3932  ;;  %3958 = vpow2.f32 %v1524_v17  ;;  %1863 = vperm.xlu0 %3756, %v5501_v5   ;;  %v1305_v22 = vpop.permute.xlu0 %1304  ;;  %v2000_v21 = vpack.c.bf16 %v3931_v59, %v3919_v12  ;;  %v5588_v49 = vadd.f32 %v3931_v59, %v3929_v40  ;;  %v6262_v54 = vld [vmem:[#allocation98_spill] sm:$0xff] }
 0x350   : > { %v1172_v19 = vmul.f32 1.442695, %v6259_v28  ;;  %v5590_v55 = vpop.eup %3934  ;;  %3960 = vpow2.f32 %v1494_v37  ;;  %v1390_v39 = vsub.f32 %v6260_v8, %v1305_v22  ;;  %v1391_v50 = vsub.f32 %v6261_v47, %v1305_v22  ;;  %v6264_v22 = vld [vmem:[#allocation102_spill] sm:$0xff] }
 0x351   : > { %v3937_v4 = vpop.eup %3936  ;;  %3962 = vpow2.f32 %v1496_v11  ;;  %2239 = vmatprep.mubr.bf16.mxu1 %v2000_v21  ;;  %v5596_v6 = vadd.f32 %v5590_v55, %v5582_v53  ;;  %v6263_v12 = vsub.f32 %v6262_v54, %v5274_v13  ;;  %v6265_v11 = vld [vmem:[#allocation103_spill] sm:$0xff]  ;;  %v6267_v13 = vld [vmem:[#allocation61_spill] sm:$0xff] }
 0x352   : > { %v3939_v17 = vpop.eup %3938  ;;  %3964 = vpow2.f32 %v1166_v57  ;;  %v1502_v30 = vmul.f32 1.442695, %v1390_v39  ;;  %v1504_v28 = vmul.f32 1.442695, %v1391_v50  ;;  %1888 = vperm.xlu1 %3757, %v5518_v0   ;;  %v6266_v21 = vsub.f32 %v6264_v22, %v6265_v11  ;;  %v6268_v50 = vld [vmem:[#allocation62_spill] sm:$0xff] }
 0x353   : > { %v1170_v59 = vmul.f32 1.442695, %v6263_v12  ;;  %v5602_v37 = vpop.eup %3940  ;;  %3966 = vpow2.f32 %v1172_v19  ;;  %1873 = vperm.xlu0 %3756, %v5507_v63   ;;  %v1315_v47 = vpop.permute.xlu0 %1314  ;;  %v5608_v61 = vadd.f32 %v3939_v17, %v3937_v4  ;;  %v1999_v12 = vpack.c.bf16 %v3929_v40, %v5552_v1 }
 0x354   : > { %v1176_v8 = vmul.f32 1.442695, %v6266_v21  ;;  %v5610_v57 = vpop.eup %3942  ;;  %3968 = vpow2.f32 %v1502_v30  ;;  %v1394_v39 = vsub.f32 %v6267_v13, %v1315_v47  ;;  %v1395_v54 = vsub.f32 %v6268_v50, %v1315_v47  ;;  %v6269_v13 = vld [vmem:[#allocation101_spill] sm:$0xff] }
 0x355   : > { %v3945_v0 = vpop.eup %3944  ;;  %3970 = vpow2.f32 %v1504_v28  ;;  %v5617_v19 = vadd.f32 %v5610_v57, %v5602_v37  ;;  %v6270_v47 = vsub.f32 %v6269_v13, %v5296_v16 }
 0x356   : > { %v3947_v22 = vpop.eup %3946  ;;  %3972 = vpow2.f32 %v1170_v59  ;;  %v1510_v11 = vmul.f32 1.442695, %v1394_v39  ;;  %v1512_v21 = vmul.f32 1.442695, %v1395_v54  ;;  %2240 = vmatmul.mubr.bf16.gmra.mxu1 %v1999_v12  ;;  %1898 = vperm.xlu1 %3757, %v5528_v42   ;;  %v6271_v59 = vld [vmem:[#allocation65_spill] sm:$0xff]  ;;  %v6272_v54 = vld [vmem:[#allocation66_spill] sm:$0xff] }
 0x357   : > { %v5620_v30 = vpop.eup %3948  ;;  %3974 = vpow2.f32 %v1176_v8  ;;  %v1174_v40 = vmul.f32 1.442695, %v6270_v47  ;;  %1883 = vperm.xlu0 %3756, %v5515_v15   ;;  %v1325_v1 = vpop.permute.xlu0 %1324  ;;  %v2002_v28 = vpack.c.bf16 %v3947_v22, %v3939_v17  ;;  %v5626_v50 = vadd.f32 %v3947_v22, %v3945_v0 }
 0x358   : > { %v3951_v63 = vpop.eup %3950  ;;  %3976 = vpow2.f32 %v1510_v11  ;;  %v1398_v39 = vsub.f32 %v6271_v59, %v1325_v1  ;;  %v1399_v12 = vsub.f32 %v6272_v54, %v1325_v1  ;;  %v2001_v1 = vpack.c.bf16 %v3945_v0, %v3937_v4 }
 0x359   : > { %v3953_v42 = vpop.eup %3952  ;;  %3978 = vpow2.f32 %v1512_v21  ;;  %2247 = vmatprep.mubr.bf16.mxu1 %v2002_v28  ;;  %v5631_v8 = vadd.f32 %v3951_v63, %v5620_v30 }
 0x35a   : > { %v3955_v16 = vpop.eup %3954  ;;  %v1518_v13 = vmul.f32 1.442695, %v1398_v39  ;;  %v1520_v47 = vmul.f32 1.442695, %v1399_v12  ;;  %1908 = vperm.xlu1 %3757, %v5540_v43   ;;  %3980 = vpow2.f32 %v1174_v40 }
 0x35b   : > { %v3957_v17 = vpop.eup %3956  ;;  %1893 = vperm.xlu0 %3756, %v5521_v9   ;;  %v5635_v22 = vadd.f32 %v3955_v16, %v3953_v42  ;;  %v2004_v21 = vpack.c.bf16 %v5568_v33, %v3955_v16 }
 0x35c   : > { %v3959_v11 = vpop.eup %3958  ;;  %3982 = vpow2.f32 %v1518_v13 }
 0x35d   : > { %v3961_v59 = vpop.eup %3960  ;;  %3984 = vpow2.f32 %v1520_v47  ;;  %v5638_v28 = vadd.f32 %v3959_v11, %v3957_v17  ;;  %v2003_v47 = vpack.c.bf16 %v5565_v2, %v3953_v42 }
 0x35e   : > { %v3963_v54 = vpop.eup %3962  ;;  %2248 = vmatmul.mubr.bf16.gmra.mxu1 %v2001_v1  ;;  %1918 = vperm.xlu1 %3757, %v5543_v58   ;;  %v2005_v42 = vpack.c.bf16 %v5582_v53, %v3961_v59 }
 0x35f   : > { %v5641_v39 = vpop.eup %3964  ;;  %2255 = vmatprep.mubr.bf16.mxu1 %v2004_v21  ;;  %1903 = vperm.xlu0 %3756, %v5533_v3   ;;  %v5644_v40 = vadd.f32 %v3963_v54, %v3961_v59  ;;  %v2006_v21 = vpack.c.bf16 %v5590_v55, %v3963_v54 }
 0x360   : > { %6273 = vst [vmem:[#allocation89_spill] sm:$0xff] %v5641_v39  ;;  %v5646_v12 = vpop.eup %3966 }
 0x361   : > { %6274 = vst [vmem:[#allocation90_spill] sm:$0xff] %v5646_v12  ;;  %v3969_v0 = vpop.eup %3968 }
 0x362   : > { %v3971_v4 = vpop.eup %3970  ;;  %1928 = vperm.xlu1 %3757, %v5646_v12   ;;  %v2007_v55 = vpack.c.bf16 %v5602_v37, %v3969_v0 }
 0x363   : > { %v5649_v33 = vpop.eup %3972  ;;  %1913 = vperm.xlu0 %3756, %v5641_v39   ;;  %v5652_v16 = vadd.f32 %v3971_v4, %v3969_v0  ;;  %v2008_v2 = vpack.c.bf16 %v5610_v57, %v3971_v4 }
 0x364   : > { %v5654_v13 = vpop.eup %3974 }
 0x365   : > { %6275 = vst [vmem:[#allocation91_spill] sm:$0xff] %v5654_v13  ;;  %v3977_v1 = vpop.eup %3976 }
 0x366   : > { %v3979_v58 = vpop.eup %3978  ;;  %2256 = vmatmul.mubr.bf16.gmra.mxu1 %v2003_v47  ;;  %1938 = vperm.xlu1 %3757, %v5654_v13   ;;  %v2009_v47 = vpack.c.bf16 %v5620_v30, %v3977_v1 }
 0x367   : > { %2263 = vmatprep.mubr.bf16.mxu1 %v2006_v21  ;;  %1923 = vperm.xlu0 %3756, %v5649_v33   ;;  %v5660_v12 = vadd.f32 %v3979_v58, %v3977_v1  ;;  %v5662_v43 = vpop.eup %3980  ;;  %v2010_v54 = vpack.c.bf16 %v3951_v63, %v3979_v58  ;;  %v6278_v63 = vld [vmem:[#allocation74_spill] sm:$0xff] }
 0x369   : > { %v3983_v39 = vpop.eup %3982 }
 0x36a   : > { %v3985_v3 = vpop.eup %3984  ;;  %v2011_v13 = vpack.c.bf16 %v3957_v17, %v3983_v39 }
 0x36b   : > { %1933 = vperm.xlu0 %3756, %v5662_v43   ;;  %v5665_v9 = vadd.f32 %v3985_v3, %v3983_v39  ;;  %v2012_v21 = vpack.c.bf16 %v3959_v11, %v3985_v3  ;;  %v6279_v3 = vld [vmem:[#allocation77_spill] sm:$0xff]  ;;  %v1761_v11 = vld [vmem:[#allocation4 + $0xd8] sm:$0xff] }
 0x36e   : > { %2264 = vmatmul.mubr.bf16.gmra.mxu1 %v2005_v42 }
 0x36f   : > { %2271 = vmatprep.mubr.bf16.mxu1 %v2008_v2 }
 0x376   : > { %2272 = vmatmul.mubr.bf16.gmra.mxu1 %v2007_v55 }
 0x377   : > { %2279 = vmatprep.mubr.bf16.mxu1 %v2010_v54 }
 0x37e   : > { %2280 = vmatmul.mubr.bf16.gmra.mxu1 %v2009_v47  ;;  %v1763_v47 = vld [vmem:[#allocation4 + $0x50] sm:$0xff] }
 0x37f   : > { %2287 = vmatprep.mubr.bf16.mxu1 %v2012_v21 }
 0x386   : > { %2288 = vmatmul.mubr.bf16.gmra.mxu1 %v2011_v13 }
 0x38a   : > { %1599 = vadd.xlane.f32.xlu0 %v5329_v34  ;;  %1602 = vadd.xlane.f32.xlu1 %v5333_v38  ;;  %v6276_v38 = vld [vmem:[#allocation79_spill] sm:$0xff] }
 0x38e   : > { %1605 = vadd.xlane.f32.xlu0 %v5337_v52  ;;  %1611 = vadd.xlane.f32.xlu1 %v5345_v23 }
 0x392   : > { %1608 = vadd.xlane.f32.xlu0 %v5341_v10  ;;  %1617 = vadd.xlane.f32.xlu1 %v5353_v44  ;;  %v6277_v10 = vld [vmem:[#allocation81_spill] sm:$0xff]  ;;  %v1759_v44 = vld [vmem:[#allocation4 + $0xb0] sm:$0xff] }
 0x396   : > { %1614 = vadd.xlane.f32.xlu0 %v5349_v24  ;;  %1623 = vadd.xlane.f32.xlu1 %v5359_v20 }
 0x39a   : > { %1620 = vadd.xlane.f32.xlu0 %v5357_v48  ;;  %1629 = vadd.xlane.f32.xlu1 %v5363_v41 }
 0x39e   : > { %1626 = vadd.xlane.f32.xlu0 %v5361_v51  ;;  %1635 = vadd.xlane.f32.xlu1 %v5531_v29 }
 0x3a1   : > { %v1340_v34 = vpop.permute.xlu1 %1339 }
 0x3a2   : > { %1632 = vadd.xlane.f32.xlu0 %v5365_v62  ;;  %1641 = vadd.xlane.f32.xlu1 %v5555_v36  ;;  %v1404_v52 = vsub.f32 %v6276_v38, %v1340_v34  ;;  %v1405_v23 = vsub.f32 %v6277_v10, %v1340_v34 }
 0x3a4   : > { %v1530_v24 = vmul.f32 1.442695, %v1404_v52  ;;  %v1532_v51 = vmul.f32 1.442695, %v1405_v23 }
 0x3a5   : > { %v1794_v48 = vpop.permute.xlu1 %1793 }
 0x3a6   : > { %1638 = vadd.xlane.f32.xlu0 %v5547_v45  ;;  %1647 = vadd.xlane.f32.xlu1 %v5562_v14  ;;  %v1951_v45 = vmul.f32 %v1794_v48, %v1759_v44  ;;  %v1760_v14 = vld [vmem:[#allocation4] sm:$0xff]  ;;  %3986 = vpow2.f32 %v1530_v24  ;;  %v1764_v24 = vld [vmem:[#allocation4 + $0x68] sm:$0xff] }
 0x3a7   : > { %3988 = vpow2.f32 %v1532_v51 }
 0x3a9   : > { %v1804_v57 = vpop.permute.xlu1 %1803 }
 0x3aa   : > { %1644 = vadd.xlane.f32.xlu0 %v5572_v60  ;;  %1653 = vadd.xlane.f32.xlu1 %v5608_v61  ;;  %v1953_v4 = vmul.f32 %v1804_v57, %v1761_v11 }
 0x3ad   : > { %v3519_v20 = vpop.f32.mrf.mxu1  ;;  %v1809_v13 = vpop.permute.xlu1 %1808 }
 0x3ae   : > { %1650 = vadd.xlane.f32.xlu0 %v5588_v49  ;;  %1659 = vadd.xlane.f32.xlu1 %v5635_v22  ;;  %v1335_v41 = vpop.permute.xlu0 %1334 }
 0x3af   : > { %v3520_v62 = vpop.f32.mrf.mxu1  ;;  %v1402_v29 = vsub.f32 %v6278_v63, %v1335_v41  ;;  %v1403_v58 = vsub.f32 %v6279_v3, %v1335_v41 }
 0x3b0   : > { %v3521_v36 = vadd.f32 %v3520_v62, %v3519_v20 }
 0x3b1   : > { %v1526_v61 = vmul.f32 1.442695, %v1402_v29  ;;  %v1528_v60 = vmul.f32 1.442695, %v1403_v58  ;;  %v3522_v53 = vpop.f32.mrf.mxu1  ;;  %v1819_v44 = vpop.permute.xlu1 %1818  ;;  %v1765_v58 = vld [vmem:[#allocation4 + $0x30] sm:$0xff] }
 0x3b2   : > { %v2304_v37 = vadd.f32 %v3521_v36, %v1951_v45  ;;  %1656 = vadd.xlane.f32.xlu0 %v5626_v50  ;;  %1665 = vadd.xlane.f32.xlu1 %v5644_v40  ;;  %v1799_v49 = vpop.permute.xlu0 %1798  ;;  %v1762_v40 = vld [vmem:[#allocation4 + $0x18] sm:$0xff]  ;;  %v1956_v29 = vmul.f32 %v1819_v44, %v1764_v24 }
 0x3b3   : > { %3990 = vpow2.f32 %v1526_v61  ;;  %v3523_v30 = vpop.f32.mrf.mxu1  ;;  %v1952_v17 = vmul.f32 %v1799_v49, %v1760_v14  ;;  %v1954_v55 = vmul.f32 %v1809_v13, %v1762_v40  ;;  %v1768_v13 = vld [vmem:[#allocation4 + $0x88] sm:$0xff] }
 0x3b4   : > { %2336 = vst [vmem:[#allocation4 + $0xb0] sm:$0xff] %v2304_v37  ;;  %3992 = vpow2.f32 %v1528_v60  ;;  %v3524_v22 = vadd.f32 %v3523_v30, %v3522_v53 }
 0x3b5   : > { %v3525_v59 = vpop.f32.mrf.mxu1  ;;  %v1829_v53 = vpop.permute.xlu1 %1828 }
 0x3b6   : > { %v2305_v39 = vadd.f32 %v3524_v22, %v1952_v17  ;;  %1662 = vadd.xlane.f32.xlu0 %v5576_v7  ;;  %1671 = vadd.xlane.f32.xlu1 %v5652_v16  ;;  %v1814_v7 = vpop.permute.xlu0 %1813  ;;  %v3987_v16 = vpop.eup %3986  ;;  %v1767_v22 = vld [vmem:[#allocation4 + $0x80] sm:$0xff] }
 0x3b7   : > { %v3526_v0 = vpop.f32.mrf.mxu1  ;;  %v3989_v38 = vpop.eup %3988  ;;  %v1955_v23 = vmul.f32 %v1814_v7, %v1763_v47 }
 0x3b8   : > { %2337 = vst [vmem:[#allocation4] sm:$0xff] %v2305_v39  ;;  %v3527_v50 = vadd.f32 %v3526_v0, %v3525_v59 }
 0x3b9   : > { %v3528_v1 = vpop.f32.mrf.mxu1 }
 0x3ba   : > { %v2306_v42 = vadd.f32 %v3527_v50, %v1953_v4  ;;  %1668 = vadd.xlane.f32.xlu0 %v5596_v6  ;;  %1677 = vadd.xlane.f32.xlu1 %v5660_v12  ;;  %v1824_v45 = vpop.permute.xlu0 %1823 }
 0x3bb   : > { %v3529_v2 = vpop.f32.mrf.mxu1  ;;  %v1957_v61 = vmul.f32 %v1824_v45, %v1765_v58 }
 0x3bc   : > { %2338 = vst [vmem:[#allocation4 + $0xd8] sm:$0xff] %v2306_v42  ;;  %v3530_v54 = vadd.f32 %v3529_v2, %v3528_v1  ;;  %v1839_v1 = vpop.permute.xlu1 %1838 }
 0x3bd   : > { %v3531_v21 = vpop.f32.mrf.mxu1  ;;  %v1960_v47 = vmul.f32 %v1839_v1, %v1768_v13  ;;  %v1535_v1 = vld [vmem:[#allocation3 + $0x8] sm:$0xff] }
 0x3be   : > { %v2307_v34 = vadd.f32 %v3530_v54, %v1954_v55  ;;  %1674 = vadd.xlane.f32.xlu0 %v5617_v19  ;;  %1683 = vadd.xlane.f32.xlu1 %v5665_v9  ;;  %v6280_v19 = vsub.f32 %v5400_v32, %v5412_v25  ;;  %v1691_v32 = vadd.f32 %v3989_v38, %v3987_v16  ;;  %v1766_v25 = vld [vmem:[#allocation4 + $0x48] sm:$0xff]  ;;  %v1834_v11 = vpop.permute.xlu0 %1833 }
 0x3bf   : > { %v3532_v52 = vpop.f32.mrf.mxu1  ;;  %v1958_v30 = vmul.f32 %v1829_v53, %v1766_v25  ;;  %v1959_v50 = vmul.f32 %v1834_v11, %v1767_v22 }
 0x3c0   : > { %v3991_v10 = vpop.eup %3990  ;;  %2339 = vst [vmem:[#allocation4 + $0x18] sm:$0xff] %v2307_v34  ;;  %v3533_v6 = vadd.f32 %v3532_v52, %v3531_v21  ;;  %v1180_v9 = vmul.f32 1.442695, %v6280_v19  ;;  %v1769_v21 = vld [vmem:[#allocation4 + $0xe8] sm:$0xff] }
 0x3c1   : > { %v3993_v12 = vpop.eup %3992  ;;  %v3534_v48 = vpop.f32.mrf.mxu1  ;;  %v2013_v20 = vpack.c.bf16 %v3987_v16, %v3991_v10 }
 0x3c2   : > { %v2308_v51 = vadd.f32 %v3533_v6, %v1955_v23  ;;  %1680 = vadd.xlane.f32.xlu0 %v5631_v8  ;;  %v2014_v41 = vpack.c.bf16 %v3989_v38, %v3993_v12  ;;  %v1688_v62 = vadd.f32 %v3993_v12, %v3991_v10  ;;  %3994 = vpow2.f32 %v1180_v9  ;;  %v1844_v16 = vpop.permute.xlu0 %1843  ;;  %v1770_v10 = vld [vmem:[#allocation4 + $0xb8] sm:$0xff]  ;;  %v1849_v23 = vpop.permute.xlu1 %1848 }
 0x3c3   : > { %v3535_v63 = vpop.f32.mrf.mxu1  ;;  %v1961_v38 = vmul.f32 %v1844_v16, %v1769_v21  ;;  %v1962_v44 = vmul.f32 %v1849_v23, %v1770_v10  ;;  %v1567_v16 = vmul.f32 %v5433_v46, %v1535_v1  ;;  %v1536_v10 = vld [vmem:[#allocation3 + $0x10] sm:$0xff] }
 0x3c4   : > { %2340 = vst [vmem:[#allocation4 + $0x50] sm:$0xff] %v2308_v51  ;;  %v3536_v3 = vadd.f32 %v3535_v63, %v3534_v48  ;;  %2295 = vmatprep.mubr.bf16.mxu1 %v2014_v41  ;;  %1689 = vadd.xlane.f32.xlu1 %v1688_v62 }
 0x3c5   : > { %v3537_v36 = vpop.f32.mrf.mxu1  ;;  %2296 = vmatmul.mubr.bf16.gmra.mxu1 %v2013_v20 }
 0x3c6   : > { %v2309_v14 = vadd.f32 %v3536_v3, %v1956_v29  ;;  %1686 = vadd.xlane.f32.xlu0 %v5638_v28  ;;  %v6281_v28 = vsub.f32 %v5461_v26, %v5475_v35  ;;  %v1859_v41 = vpop.permute.xlu1 %1858  ;;  %v1854_v62 = vpop.permute.xlu0 %1853 }
 0x3c7   : > { %v3538_v8 = vpop.f32.mrf.mxu1 }
 0x3c8   : > { %2341 = vst [vmem:[#allocation4 + $0x68] sm:$0xff] %v2309_v14  ;;  %v3539_v60 = vadd.f32 %v3538_v8, %v3537_v36  ;;  %v1178_v39 = vmul.f32 1.442695, %v6281_v28 }
 0x3c9   : > { %v3540_v37 = vpop.f32.mrf.mxu1 }
 0x3ca   : > { %v2310_v49 = vadd.f32 %v3539_v60, %v1957_v61  ;;  %1692 = vadd.xlane.f32.xlu0 %v1691_v32  ;;  %3996 = vpow2.f32 %v1178_v39  ;;  %v1869_v19 = vpop.permute.xlu1 %1868  ;;  %v1864_v9 = vpop.permute.xlu0 %1863  ;;  %v1771_v32 = vld [vmem:[#allocation4 + $0x60] sm:$0xff] }
 0x3cb   : > { %v3541_v57 = vpop.f32.mrf.mxu1 }
 0x3cc   : > { %2342 = vst [vmem:[#allocation4 + $0x30] sm:$0xff] %v2310_v49  ;;  %v3542_v17 = vadd.f32 %v3541_v57, %v3540_v37  ;;  %v1963_v37 = vmul.f32 %v1854_v62, %v1771_v32  ;;  %v1540_v32 = vld [vmem:[#allocation3 + $0x30] sm:$0xff] }
 0x3cd   : > { %v3543_v59 = vpop.f32.mrf.mxu1 }
 0x3ce   : > { %v2311_v0 = vadd.f32 %v3542_v17, %v1958_v30  ;;  %v5717_v63 = vpop.permute.xlu1 %1878  ;;  %v5719_v29 = vpop.permute.xlu0 %1873  ;;  %v1772_v17 = vld [vmem:[#allocation4 + $0xf0] sm:$0xff] }
 0x3cf   : > { %v3544_v4 = vpop.f32.mrf.mxu1  ;;  %v5711_v54 = vpop.eup %3994  ;;  %v1964_v28 = vmul.f32 %v1859_v41, %v1772_v17 }
 0x3d0   : > { %2343 = vst [vmem:[#allocation4 + $0x48] sm:$0xff] %v2311_v0  ;;  %v3545_v40 = vadd.f32 %v3544_v4, %v3543_v59  ;;  %v1773_v0 = vld [vmem:[#allocation4 + $0x8] sm:$0xff] }
 0x3d1   : > { %v3546_v42 = vpop.f32.mrf.mxu1 }
 0x3d2   : > { %v2312_v2 = vadd.f32 %v3545_v40, %v1959_v50  ;;  %v5721_v3 = vpop.permute.xlu1 %1888  ;;  %v5723_v58 = vpop.permute.xlu0 %1883 }
 0x3d3   : > { %v3547_v55 = vpop.f32.mrf.mxu1 }
 0x3d4   : > { %2344 = vst [vmem:[#allocation4 + $0x80] sm:$0xff] %v2312_v2  ;;  %v3548_v7 = vadd.f32 %v3547_v55, %v3546_v42  ;;  %v1534_v42 = vld [vmem:[#allocation3] sm:$0xff]  ;;  %v1965_v55 = vmul.f32 %v1864_v9, %v1773_v0 }
 0x3d5   : > { %v3549_v26 = vpop.f32.mrf.mxu1  ;;  %1948 = vperm.xlu1 %3757, %v5711_v54  }
 0x3d6   : > { %v2313_v35 = vadd.f32 %v3548_v7, %v1960_v47  ;;  %v5725_v45 = vpop.permute.xlu1 %1898  ;;  %v5727_v36 = vpop.permute.xlu0 %1893  ;;  %v1774_v7 = vld [vmem:[#allocation4 + $0x78] sm:$0xff] }
 0x3d7   : > { %v3550_v34 = vpop.f32.mrf.mxu1  ;;  %v5714_v51 = vpop.eup %3996 }
 0x3d8   : > { %2345 = vst [vmem:[#allocation4 + $0x88] sm:$0xff] %v2313_v35  ;;  %v3551_v52 = vadd.f32 %v3550_v34, %v3549_v26  ;;  %v1566_v26 = vmul.f32 %v5428_v27, %v1534_v42  ;;  %v1568_v27 = vmul.f32 %v5438_v56, %v1536_v10  ;;  %v1572_v56 = vmul.f32 %v5458_v31, %v1540_v32  ;;  %v1541_v10 = vld [vmem:[#allocation3 + $0x38] sm:$0xff] }
 0x3d9   : > { %v3552_v6 = vpop.f32.mrf.mxu1 }
 0x3da   : > { %v2314_v12 = vadd.f32 %v3551_v52, %v1961_v38  ;;  %v5729_v14 = vpop.permute.xlu1 %1908  ;;  %v5731_v8 = vpop.permute.xlu0 %1903  ;;  %v1538_v52 = vld [vmem:[#allocation3 + $0x20] sm:$0xff] }
 0x3db   : > { %v3553_v24 = vpop.f32.mrf.mxu1  ;;  %v1570_v46 = vmul.f32 %v5449_v18, %v1538_v52  ;;  %v1544_v52 = vld [vmem:[#allocation3 + $0x50] sm:$0xff] }
 0x3dc   : > { %2346 = vst [vmem:[#allocation4 + $0xe8] sm:$0xff] %v2314_v12  ;;  %v3554_v48 = vadd.f32 %v3553_v24, %v3552_v6  ;;  %v1966_v24 = vmul.f32 %v1869_v19, %v1774_v7  ;;  %v6283_v7 = vld [vmem:[#allocation72_spill] sm:$0xff] }
 0x3de   : > { %v2315_v20 = vadd.f32 %v3554_v48, %v1962_v44  ;;  %v5733_v61 = vpop.permute.xlu1 %1918  ;;  %v5735_v60 = vpop.permute.xlu0 %1913  ;;  %v1775_v48 = vld [vmem:[#allocation4 + $0x38] sm:$0xff] }
 0x3e0   : > { %2347 = vst [vmem:[#allocation4 + $0xb8] sm:$0xff] %v2315_v20  ;;  %1943 = vperm.xlu0 %3756, %v5714_v51  }
 0x3e2   : > { %v5737_v49 = vpop.permute.xlu1 %1928  ;;  %v5739_v57 = vpop.permute.xlu0 %1923 }
 0x3e6   : > { %v5741_v50 = vpop.permute.xlu1 %1938  ;;  %v5743_v40 = vpop.permute.xlu0 %1933 }
 0x406   : > { %v3555_v25 = vpop.f32.mrf.mxu1 }
 0x408   : > { %v3556_v53 = vpop.f32.mrf.mxu1 }
 0x409   : > { %v3557_v30 = vadd.f32 %v3556_v53, %v3555_v25  ;;  %v1537_v25 = vld [vmem:[#allocation3 + $0x18] sm:$0xff] }
 0x40a   : > { %v3558_v22 = vpop.f32.mrf.mxu1 }
 0x40b   : > { %v2316_v11 = vadd.f32 %v3557_v30, %v1963_v37  ;;  %v1967_v30 = vmul.f32 %v5719_v29, %v1775_v48 }
 0x40c   : > { %v3559_v59 = vpop.f32.mrf.mxu1 }
 0x40d   : > { %2348 = vst [vmem:[#allocation4 + $0x60] sm:$0xff] %v2316_v11  ;;  %v3560_v39 = vadd.f32 %v3559_v59, %v3558_v22  ;;  %v1776_v22 = vld [vmem:[#allocation4 + $0x58] sm:$0xff]  ;;  %v6282_v11 = vld [vmem:[#allocation69_spill] sm:$0xff] }
 0x40e   : > { %v3561_v4 = vpop.f32.mrf.mxu1  ;;  %v1569_v59 = vmul.f32 %v6282_v11, %v1537_v25  ;;  %v1546_v25 = vld [vmem:[#allocation3 + $0x60] sm:$0xff] }
 0x40f   : > { %v2317_v13 = vadd.f32 %v3560_v39, %v1964_v28 }
 0x410   : > { %v3562_v2 = vpop.f32.mrf.mxu1 }
 0x411   : > { %2349 = vst [vmem:[#allocation4 + $0xf0] sm:$0xff] %v2317_v13  ;;  %v3563_v47 = vadd.f32 %v3562_v2, %v3561_v4  ;;  %v1542_v4 = vld [vmem:[#allocation3 + $0x40] sm:$0xff]  ;;  %v1539_v13 = vld [vmem:[#allocation3 + $0x28] sm:$0xff]  ;;  %v1968_v2 = vmul.f32 %v5717_v63, %v1776_v22 }
 0x412   : > { %v3564_v21 = vpop.f32.mrf.mxu1  ;;  %v1779_v22 = vld [vmem:[#allocation4 + $0xe0] sm:$0xff] }
 0x413   : > { %v2318_v35 = vadd.f32 %v3563_v47, %v1965_v55  ;;  %v1603_v34 = vpop.xlane.xlu1 %1602  ;;  %v1600_v38 = vpop.xlane.xlu0 %1599  ;;  %v1777_v47 = vld [vmem:[#allocation4 + $0x40] sm:$0xff] }
 0x414   : > { %v1695_v23 = vadd.f32 %v1603_v34, %v1567_v16  ;;  %v3565_v6 = vpop.f32.mrf.mxu1  ;;  %v1694_v12 = vadd.f32 %v1600_v38, %v1566_v26  ;;  %v6284_v16 = vld [vmem:[#allocation70_spill] sm:$0xff] }
 0x415   : > { %2350 = vst [vmem:[#allocation4 + $0x8] sm:$0xff] %v2318_v35  ;;  %v3566_v44 = vadd.f32 %v3565_v6, %v3564_v21  ;;  %v1574_v21 = vmul.f32 %v6283_v7, %v1542_v4  ;;  %v1571_v26 = vmul.f32 %v6284_v16, %v1539_v13  ;;  %v1548_v13 = vld [vmem:[#allocation3 + $0x70] sm:$0xff] }
 0x416   : > { %1728 = vst.msk [vmem:[#allocation3 + $0x8] sm:$0xff] %vm1726_vm1, %v1695_v23  ;;  %1727 = vst.msk [vmem:[#allocation3] sm:$0xff] %vm1726_vm1, %v1694_v12  ;;  %v3567_v20 = vpop.f32.mrf.mxu1  ;;  %v1969_v12 = vmul.f32 %v5723_v58, %v1777_v47  ;;  %v1780_v47 = vld [vmem:[#allocation4 + $0x90] sm:$0xff]  ;;  %v1580_v7 = vmul.f32 %v5501_v5, %v1548_v13 }
 0x417   : > { %v2319_v41 = vadd.f32 %v3566_v44, %v1966_v24  ;;  %v1612_v62 = vpop.xlane.xlu1 %1611  ;;  %v1606_v9 = vpop.xlane.xlu0 %1605  ;;  %v1778_v44 = vld [vmem:[#allocation4 + $0xc8] sm:$0xff] }
 0x418   : > { %v1698_v53 = vadd.f32 %v1612_v62, %v1570_v46  ;;  %v3568_v37 = vpop.f32.mrf.mxu1  ;;  %v1696_v19 = vadd.f32 %v1606_v9, %v1568_v27  ;;  %v6286_v27 = vld [vmem:[#allocation71_spill] sm:$0xff] }
 0x419   : > { %2351 = vst [vmem:[#allocation4 + $0x78] sm:$0xff] %v2319_v41  ;;  %v3569_v17 = vadd.f32 %v3568_v37, %v3567_v20  ;;  %v6285_v20 = vld [vmem:[#allocation75_spill] sm:$0xff]  ;;  %v1573_v41 = vmul.f32 %v6286_v27, %v1541_v10 }
 0x41a   : > { %1731 = vst.msk [vmem:[#allocation3 + $0x20] sm:$0xff] %vm1726_vm1, %v1698_v53  ;;  %1729 = vst.msk [vmem:[#allocation3 + $0x10] sm:$0xff] %vm1726_vm1, %v1696_v19  ;;  %v3570_v18 = vpop.f32.mrf.mxu1  ;;  %v1576_v46 = vmul.f32 %v6285_v20, %v1544_v52  ;;  %v1543_v53 = vld [vmem:[#allocation3 + $0x48] sm:$0xff] }
 0x41b   : > { %v2320_v28 = vadd.f32 %v3569_v17, %v1967_v30  ;;  %v1618_v39 = vpop.xlane.xlu1 %1617  ;;  %v1609_v0 = vpop.xlane.xlu0 %1608  ;;  %v1970_v30 = vmul.f32 %v5721_v3, %v1778_v44  ;;  %v1547_v52 = vld [vmem:[#allocation3 + $0x68] sm:$0xff] }
 0x41c   : > { %v1700_v1 = vadd.f32 %v1618_v39, %v1572_v56  ;;  %v3571_v42 = vpop.f32.mrf.mxu1  ;;  %v1697_v29 = vadd.f32 %v1609_v0, %v1569_v59  ;;  %v6287_v56 = vld [vmem:[#allocation78_spill] sm:$0xff]  ;;  %v6288_v59 = vld [vmem:[#allocation73_spill] sm:$0xff] }
 0x41d   : > { %2352 = vst [vmem:[#allocation4 + $0x38] sm:$0xff] %v2320_v28  ;;  %v3572_v55 = vadd.f32 %v3571_v42, %v3570_v18  ;;  %v1578_v11 = vmul.f32 %v6287_v56, %v1546_v25  ;;  %v1575_v28 = vmul.f32 %v6288_v59, %v1543_v53  ;;  %v1554_v59 = vld [vmem:[#allocation3 + $0xa0] sm:$0xff] }
 0x41e   : > { %1733 = vst.msk [vmem:[#allocation3 + $0x30] sm:$0xff] %vm1726_vm1, %v1700_v1  ;;  %1730 = vst.msk [vmem:[#allocation3 + $0x18] sm:$0xff] %vm1726_vm1, %v1697_v29  ;;  %v3573_v31 = vpop.f32.mrf.mxu1  ;;  %v1545_v1 = vld [vmem:[#allocation3 + $0x58] sm:$0xff] }
 0x41f   : > { %v2321_v35 = vadd.f32 %v3572_v55, %v1968_v2  ;;  %v1624_v34 = vpop.xlane.xlu1 %1623  ;;  %v1615_v38 = vpop.xlane.xlu0 %1614  ;;  %v1971_v2 = vmul.f32 %v5727_v36, %v1779_v22 }
 0x420   : > { %v1702_v23 = vadd.f32 %v1624_v34, %v1574_v21  ;;  %v3574_v6 = vpop.f32.mrf.mxu1  ;;  %v1699_v63 = vadd.f32 %v1615_v38, %v1571_v26  ;;  %v6289_v21 = vld [vmem:[#allocation76_spill] sm:$0xff]  ;;  %v1550_v38 = vld [vmem:[#allocation3 + $0x80] sm:$0xff] }
 0x421   : > { %2353 = vst [vmem:[#allocation4 + $0x58] sm:$0xff] %v2321_v35  ;;  %v3575_v24 = vadd.f32 %v3574_v6, %v3573_v31  ;;  %v1577_v16 = vmul.f32 %v6289_v21, %v1545_v1  ;;  %v1972_v6 = vmul.f32 %v5725_v45, %v1780_v47  ;;  %v1783_v1 = vld [vmem:[#allocation4 + $0xa8] sm:$0xff]  ;;  %v1553_v21 = vld [vmem:[#allocation3 + $0x98] sm:$0xff] }
 0x422   : > { %1735 = vst.msk [vmem:[#allocation3 + $0x40] sm:$0xff] %vm1726_vm1, %v1702_v23  ;;  %1732 = vst.msk [vmem:[#allocation3 + $0x28] sm:$0xff] %vm1726_vm1, %v1699_v63  ;;  %v3576_v48 = vpop.f32.mrf.mxu1 }
 0x423   : > { %v2322_v62 = vadd.f32 %v3575_v24, %v1969_v12  ;;  %v1630_v9 = vpop.xlane.xlu1 %1629  ;;  %v1621_v32 = vpop.xlane.xlu0 %1620  ;;  %v1781_v12 = vld [vmem:[#allocation4 + $0x70] sm:$0xff] }
 0x424   : > { %v1704_v37 = vadd.f32 %v1630_v9, %v1576_v46  ;;  %v3577_v19 = vpop.f32.mrf.mxu1  ;;  %v1701_v58 = vadd.f32 %v1621_v32, %v1573_v41  ;;  %v6290_v24 = vld [vmem:[#allocation83_spill] sm:$0xff]  ;;  %v1549_v9 = vld [vmem:[#allocation3 + $0x78] sm:$0xff]  ;;  %v1973_v53 = vmul.f32 %v5731_v8, %v1781_v12 }
 0x425   : > { %2354 = vst [vmem:[#allocation4 + $0x40] sm:$0xff] %v2322_v62  ;;  %v3578_v17 = vadd.f32 %v3577_v19, %v3576_v48  ;;  %v1582_v44 = vmul.f32 %v6290_v24, %v1550_v38  ;;  %v6291_v48 = vld [vmem:[#allocation80_spill] sm:$0xff]  ;;  %v1552_v62 = vld [vmem:[#allocation3 + $0x90] sm:$0xff]  ;;  %v1782_v19 = vld [vmem:[#allocation4 + $0xc0] sm:$0xff] }
 0x426   : > { %1737 = vst.msk [vmem:[#allocation3 + $0x50] sm:$0xff] %vm1726_vm1, %v1704_v37  ;;  %1734 = vst.msk [vmem:[#allocation3 + $0x38] sm:$0xff] %vm1726_vm1, %v1701_v58  ;;  %v3579_v18 = vpop.f32.mrf.mxu1  ;;  %v1579_v20 = vmul.f32 %v6291_v48, %v1547_v52  ;;  %v1784_v38 = vld [vmem:[#allocation4 + $0xd0] sm:$0xff]  ;;  %v1558_v24 = vld [vmem:[#allocation3 + $0xc0] sm:$0xff] }
 0x427   : > { %v2323_v39 = vadd.f32 %v3578_v17, %v1970_v30  ;;  %v1636_v0 = vpop.xlane.xlu1 %1635  ;;  %v1627_v4 = vpop.xlane.xlu0 %1626  ;;  %v1584_v30 = vmul.f32 %v5515_v15, %v1552_v62  ;;  %v6292_v17 = vld [vmem:[#allocation82_spill] sm:$0xff] }
 0x428   : > { %v1706_v42 = vadd.f32 %v1636_v0, %v1578_v11  ;;  %v3580_v29 = vpop.f32.mrf.mxu1  ;;  %v1703_v3 = vadd.f32 %v1627_v4, %v1575_v28  ;;  %v1581_v22 = vmul.f32 %v6292_v17, %v1549_v9  ;;  %v1551_v28 = vld [vmem:[#allocation3 + $0x88] sm:$0xff]  ;;  %v1974_v4 = vmul.f32 %v5729_v14, %v1782_v19  ;;  %v6297_v9 = vld [vmem:[#allocation89_spill] sm:$0xff] }
 0x429   : > { %2355 = vst [vmem:[#allocation4 + $0xc8] sm:$0xff] %v2323_v39  ;;  %v3581_v55 = vadd.f32 %v3580_v29, %v3579_v18 }
 0x42a   : > { %1739 = vst.msk [vmem:[#allocation3 + $0x60] sm:$0xff] %vm1726_vm1, %v1706_v42  ;;  %1736 = vst.msk [vmem:[#allocation3 + $0x48] sm:$0xff] %vm1726_vm1, %v1703_v3  ;;  %v3582_v31 = vpop.f32.mrf.mxu1  ;;  %v6293_v42 = vld [vmem:[#allocation86_spill] sm:$0xff]  ;;  %v6294_v3 = vld [vmem:[#allocation84_spill] sm:$0xff] }
 0x42b   : > { %v2324_v26 = vadd.f32 %v3581_v55, %v1971_v2  ;;  %v1642_v35 = vpop.xlane.xlu1 %1641  ;;  %v1633_v34 = vpop.xlane.xlu0 %1632  ;;  %v1586_v29 = vmul.f32 %v6293_v42, %v1554_v59  ;;  %v1583_v2 = vmul.f32 %v6294_v3, %v1551_v28 }
 0x42c   : > { %v1708_v10 = vadd.f32 %v1642_v35, %v1580_v7  ;;  %v3583_v23 = vpop.f32.mrf.mxu1  ;;  %v1705_v36 = vadd.f32 %v1633_v34, %v1577_v16  ;;  %v1556_v7 = vld [vmem:[#allocation3 + $0xb0] sm:$0xff]  ;;  %v1975_v35 = vmul.f32 %v5735_v60, %v1783_v1  ;;  %v1562_v1 = vld [vmem:[#allocation3 + $0xe0] sm:$0xff] }
 0x42d   : > { %2356 = vst [vmem:[#allocation4 + $0xe0] sm:$0xff] %v2324_v26  ;;  %v3584_v63 = vadd.f32 %v3583_v23, %v3582_v31 }
 0x42e   : > { %1741 = vst.msk [vmem:[#allocation3 + $0x70] sm:$0xff] %vm1726_vm1, %v1708_v10  ;;  %1738 = vst.msk [vmem:[#allocation3 + $0x58] sm:$0xff] %vm1726_vm1, %v1705_v36  ;;  %v3585_v5 = vpop.f32.mrf.mxu1  ;;  %v6295_v10 = vld [vmem:[#allocation88_spill] sm:$0xff]  ;;  %v6296_v36 = vld [vmem:[#allocation85_spill] sm:$0xff] }
 0x42f   : > { %v2325_v46 = vadd.f32 %v3584_v63, %v1972_v6  ;;  %v1648_v27 = vpop.xlane.xlu1 %1647  ;;  %v1639_v41 = vpop.xlane.xlu0 %1638  ;;  %v1588_v23 = vmul.f32 %v6295_v10, %v1556_v7  ;;  %v1585_v6 = vmul.f32 %v6296_v36, %v1553_v21  ;;  %v1564_v10 = vld [vmem:[#allocation3 + $0xf0] sm:$0xff]  ;;  %v6301_v36 = vld [vmem:[#allocation90_spill] sm:$0xff] }
 0x430   : > { %v1710_v32 = vadd.f32 %v1648_v27, %v1582_v44  ;;  %v3586_v25 = vpop.f32.mrf.mxu1  ;;  %v1707_v45 = vadd.f32 %v1639_v41, %v1579_v20  ;;  %v1555_v44 = vld [vmem:[#allocation3 + $0xa8] sm:$0xff]  ;;  %v1785_v41 = vld [vmem:[#allocation4 + $0x10] sm:$0xff] }
 0x431   : > { %2357 = vst [vmem:[#allocation4 + $0x90] sm:$0xff] %v2325_v46  ;;  %v3587_v37 = vadd.f32 %v3586_v25, %v3585_v5  ;;  %v1976_v46 = vmul.f32 %v5733_v61, %v1784_v38  ;;  %v6298_v25 = vld [vmem:[#allocation87_spill] sm:$0xff] }
 0x432   : > { %1743 = vst.msk [vmem:[#allocation3 + $0x80] sm:$0xff] %vm1726_vm1, %v1710_v32  ;;  %1740 = vst.msk [vmem:[#allocation3 + $0x68] sm:$0xff] %vm1726_vm1, %v1707_v45  ;;  %v3588_v58 = vpop.f32.mrf.mxu1  ;;  %v1590_v32 = vmul.f32 %v6297_v9, %v1558_v24  ;;  %v1587_v45 = vmul.f32 %v6298_v25, %v1555_v44 }
 0x433   : > { %v2326_v18 = vadd.f32 %v3587_v37, %v1973_v53  ;;  %v1654_v56 = vpop.xlane.xlu1 %1653  ;;  %v1645_v11 = vpop.xlane.xlu0 %1644 }
 0x434   : > { %v1712_v39 = vadd.f32 %v1654_v56, %v1584_v30  ;;  %v3589_v0 = vpop.f32.mrf.mxu1  ;;  %v1709_v8 = vadd.f32 %v1645_v11, %v1581_v22  ;;  %v1557_v30 = vld [vmem:[#allocation3 + $0xb8] sm:$0xff]  ;;  %v1786_v11 = vld [vmem:[#allocation4 + $0x28] sm:$0xff] }
 0x435   : > { %2358 = vst [vmem:[#allocation4 + $0x70] sm:$0xff] %v2326_v18  ;;  %v3590_v13 = vadd.f32 %v3589_v0, %v3588_v58  ;;  %v1560_v58 = vld [vmem:[#allocation3 + $0xd0] sm:$0xff]  ;;  %v1977_v18 = vmul.f32 %v5739_v57, %v1785_v41  ;;  %v1978_v3 = vmul.f32 %v5737_v49, %v1786_v11 }
 0x436   : > { %1745 = vst.msk [vmem:[#allocation3 + $0x90] sm:$0xff] %vm1726_vm1, %v1712_v39  ;;  %1742 = vst.msk [vmem:[#allocation3 + $0x78] sm:$0xff] %vm1726_vm1, %v1709_v8  ;;  %v3591_v15 = vpop.f32.mrf.mxu1  ;;  %v1592_v28 = vmul.f32 %v5649_v33, %v1560_v58  ;;  %v6299_v39 = vld [vmem:[#allocation33_spill] sm:$0xff] }
 0x437   : > { %v2327_v55 = vadd.f32 %v3590_v13, %v1974_v4  ;;  %v1660_v47 = vpop.xlane.xlu1 %1659  ;;  %v1651_v31 = vpop.xlane.xlu0 %1650  ;;  %v1589_v0 = vmul.f32 %v6299_v39, %v1557_v30 }
 0x438   : > { %v1714_v16 = vadd.f32 %v1660_v47, %v1586_v29  ;;  %v3592_v26 = vpop.f32.mrf.mxu1  ;;  %v1711_v14 = vadd.f32 %v1651_v31, %v1583_v2  ;;  %v1594_v47 = vmul.f32 %v5662_v43, %v1562_v1  ;;  %v6300_v31 = vld [vmem:[#allocation34_spill] sm:$0xff] }
 0x439   : > { %2359 = vst [vmem:[#allocation4 + $0xc0] sm:$0xff] %v2327_v55  ;;  %v3593_v34 = vadd.f32 %v3592_v26, %v3591_v15  ;;  %v1559_v15 = vld [vmem:[#allocation3 + $0xc8] sm:$0xff]  ;;  %v1787_v55 = vld [vmem:[#allocation4 + $0xa0] sm:$0xff] }
 0x43a   : > { %1747 = vst.msk [vmem:[#allocation3 + $0xa0] sm:$0xff] %vm1726_vm1, %v1714_v16  ;;  %1744 = vst.msk [vmem:[#allocation3 + $0x88] sm:$0xff] %vm1726_vm1, %v1711_v14  ;;  %v3594_v52 = vpop.f32.mrf.mxu1  ;;  %v1591_v7 = vmul.f32 %v6300_v31, %v1559_v15  ;;  %v1561_v14 = vld [vmem:[#allocation3 + $0xd8] sm:$0xff]  ;;  %v1979_v49 = vmul.f32 %v5743_v40, %v1787_v55 }
 0x43b   : > { %v2328_v63 = vadd.f32 %v3593_v34, %v1975_v35  ;;  %v1666_v12 = vpop.xlane.xlu1 %1665  ;;  %v1657_v5 = vpop.xlane.xlu0 %1656 }
 0x43c   : > { %v1716_v48 = vadd.f32 %v1666_v12, %v1588_v23  ;;  %v3595_v20 = vpop.f32.mrf.mxu1  ;;  %v1713_v60 = vadd.f32 %v1657_v5, %v1585_v6  ;;  %v1788_v23 = vld [vmem:[#allocation4 + $0xf8] sm:$0xff]  ;;  %v1593_v6 = vmul.f32 %v6301_v36, %v1561_v14  ;;  %v1563_v5 = vld [vmem:[#allocation3 + $0xe8] sm:$0xff] }
 0x43d   : > { %2360 = vst [vmem:[#allocation4 + $0xa8] sm:$0xff] %v2328_v63  ;;  %v3596_v27 = vadd.f32 %v3595_v20, %v3594_v52  ;;  %v1980_v40 = vmul.f32 %v5741_v50, %v1788_v23 }
 0x43e   : > { %1749 = vst.msk [vmem:[#allocation3 + $0xb0] sm:$0xff] %vm1726_vm1, %v1716_v48  ;;  %1746 = vst.msk [vmem:[#allocation3 + $0x98] sm:$0xff] %vm1726_vm1, %v1713_v60  ;;  %v3597_v62 = vpop.f32.mrf.mxu1  ;;  %v1596_v48 = vmul.f32 %v5714_v51, %v1564_v10 }
 0x43f   : > { %v2329_v53 = vadd.f32 %v3596_v27, %v1976_v46  ;;  %v1672_v37 = vpop.xlane.xlu1 %1671  ;;  %v1663_v19 = vpop.xlane.xlu0 %1662  ;;  %v6302_v27 = vld [vmem:[#allocation91_spill] sm:$0xff] }
 0x440   : > { %v1718_v17 = vadd.f32 %v1672_v37, %v1590_v32  ;;  %v3598_v22 = vpop.f32.mrf.mxu1  ;;  %v1715_v61 = vadd.f32 %v1663_v19, %v1587_v45  ;;  %v1595_v41 = vmul.f32 %v6302_v27, %v1563_v5  ;;  %v1565_v32 = vld [vmem:[#allocation3 + $0xf8] sm:$0xff] }
 0x441   : > { %2361 = vst [vmem:[#allocation4 + $0xd0] sm:$0xff] %v2329_v53  ;;  %v3599_v56 = vadd.f32 %v3598_v22, %v3597_v62  ;;  %v1597_v51 = vmul.f32 %v5711_v54, %v1565_v32  ;;  %v1789_v53 = vld [vmem:[#allocation4 + $0x20] sm:$0xff]  ;;  %v1790_v22 = vld [vmem:[#allocation4 + $0x98] sm:$0xff] }
 0x442   : > { %1751 = vst.msk [vmem:[#allocation3 + $0xc0] sm:$0xff] %vm1726_vm1, %v1718_v17  ;;  %1748 = vst.msk [vmem:[#allocation3 + $0xa8] sm:$0xff] %vm1726_vm1, %v1715_v61  ;;  %v3600_v59 = vpop.f32.mrf.mxu1 }
 0x443   : > { %v2330_v8 = vadd.f32 %v3599_v56, %v1977_v18  ;;  %v1678_v4 = vpop.xlane.xlu1 %1677  ;;  %v1669_v13 = vpop.xlane.xlu0 %1668 }
 0x444   : > { %v3601_v42 = vpop.f32.mrf.mxu1  ;;  %v1720_v29 = vadd.f32 %v1678_v4, %v1592_v28  ;;  %v1717_v57 = vadd.f32 %v1669_v13, %v1589_v0 }
 0x445   : > { %2362 = vst [vmem:[#allocation4 + $0x10] sm:$0xff] %v2330_v8  ;;  %v3602_v2 = vadd.f32 %v3601_v42, %v3600_v59 }
 0x446   : > { %1753 = vst.msk [vmem:[#allocation3 + $0xd0] sm:$0xff] %vm1726_vm1, %v1720_v29  ;;  %1750 = vst.msk [vmem:[#allocation3 + $0xb8] sm:$0xff] %vm1726_vm1, %v1717_v57  ;;  %v3603_v33 = vpop.f32.mrf.mxu1 }
 0x447   : > { %v2331_v21 = vadd.f32 %v3602_v2, %v1978_v3  ;;  %v1684_v16 = vpop.xlane.xlu1 %1683  ;;  %v1675_v26 = vpop.xlane.xlu0 %1674 }
 0x448   : > { %v3604_v35 = vpop.f32.mrf.mxu1  ;;  %v1722_v34 = vadd.f32 %v1684_v16, %v1594_v47  ;;  %v1719_v38 = vadd.f32 %v1675_v26, %v1591_v7 }
 0x449   : > { %2363 = vst [vmem:[#allocation4 + $0x28] sm:$0xff] %v2331_v21  ;;  %v3605_v52 = vadd.f32 %v3604_v35, %v3603_v33 }
 0x44a   : > { %1755 = vst.msk [vmem:[#allocation3 + $0xe0] sm:$0xff] %vm1726_vm1, %v1722_v34  ;;  %1752 = vst.msk [vmem:[#allocation3 + $0xc8] sm:$0xff] %vm1726_vm1, %v1719_v38  ;;  %v3606_v43 = vpop.f32.mrf.mxu1 }
 0x44b   : > { %v2332_v63 = vadd.f32 %v3605_v52, %v1979_v49  ;;  %v1681_v12 = vpop.xlane.xlu0 %1680 }
 0x44c   : > { %v3607_v24 = vpop.f32.mrf.mxu1  ;;  %v1721_v44 = vadd.f32 %v1681_v12, %v1593_v6 }
 0x44d   : > { %2364 = vst [vmem:[#allocation4 + $0xa0] sm:$0xff] %v2332_v63  ;;  %v3608_v20 = vadd.f32 %v3607_v24, %v3606_v43  ;;  %v1690_v60 = vpop.xlane.xlu1 %1689 }
 0x44e   : > { %1754 = vst.msk [vmem:[#allocation3 + $0xd8] sm:$0xff] %vm1726_vm1, %v1721_v44  ;;  %v1724_v46 = vadd.f32 %v1690_v60, %v1596_v48 }
 0x44f   : > { %v2333_v62 = vadd.f32 %v3608_v20, %v1980_v40  ;;  %v1687_v9 = vpop.xlane.xlu0 %1686 }
 0x450   : > { %1757 = vst.msk [vmem:[#allocation3 + $0xf0] sm:$0xff] %vm1726_vm1, %v1724_v46  ;;  %v1723_v25 = vadd.f32 %v1687_v9, %v1595_v41 }
 0x451   : > { %2365 = vst [vmem:[#allocation4 + $0xf8] sm:$0xff] %v2333_v62  ;;  %v1949_v61 = vpop.permute.xlu1 %1948 }
 0x452   : > { %1756 = vst.msk [vmem:[#allocation3 + $0xe8] sm:$0xff] %vm1726_vm1, %v1723_v25  ;;  %v1982_v59 = vmul.f32 %v1949_v61, %v1790_v22 }
 0x453   : > { %v1693_v50 = vpop.xlane.xlu0 %1692 }
 0x454   : > { %v1725_v45 = vadd.f32 %v1693_v50, %v1597_v51 }
 0x456   : > { %1758 = vst.msk [vmem:[#allocation3 + $0xf8] sm:$0xff] %vm1726_vm1, %v1725_v45 }
 0x45b   : > { %v1944_v37 = vpop.permute.xlu0 %1943 }
 0x45c   : > { %v1981_v30 = vmul.f32 %v1944_v37, %v1789_v53 }
 0x485   : > { %v3609_v19 = vpop.f32.mrf.mxu1 }
 0x487   : > { %v3610_v58 = vpop.f32.mrf.mxu1 }
 0x488   : > { %v3611_v17 = vadd.f32 %v3610_v58, %v3609_v19 }
 0x489   : > { %v3612_v18 = vpop.f32.mrf.mxu1 }
 0x48a   : > { %v2334_v56 = vadd.f32 %v3611_v17, %v1981_v30 }
 0x48b   : > { %v3613_v11 = vpop.f32.mrf.mxu1 }
 0x48c   : > { %2366 = vst [vmem:[#allocation4 + $0x20] sm:$0xff] %v2334_v56  ;;  %v3614_v28 = vadd.f32 %v3613_v11, %v3612_v18  ;;  %2403 = sbr.rel (%p3210_p5) target bundleno = 1376 (0x560), region = 60 }
 0x48e   : > { %v2335_v39 = vadd.f32 %v3614_v28, %v1982_v59 }
 0x490   : > { %2367 = vst [vmem:[#allocation4 + $0x98] sm:$0xff] %v2335_v39 }
 0x491   : > { %v2406_v54 = vld [vmem:[#allocation3 + $0x10] sm:$0xff]  ;;  %v2404_v0 = vld [vmem:[#allocation3] sm:$0xff]  ;;  %v2407_v8 = vld [vmem:[#allocation3 + $0x18] sm:$0xff]  ;;  %v4335_v4 = vmov 0  }
 0x492   : > { %3999 = vset.pattern.permute.xlu1 %v4335_v4  ;;  %3998 = vset.pattern.permute.xlu0 %v4335_v4  ;;  %4000 = vrcp.f32 %v2406_v54  ;;  %v2405_v13 = vld [vmem:[#allocation3 + $0x8] sm:$0xff]  ;;  %v2408_v15 = vld [vmem:[#allocation3 + $0x20] sm:$0xff]  ;;  %v2411_v42 = vld [vmem:[#allocation3 + $0x38] sm:$0xff] }
 0x493   : > { %4002 = vrcp.f32 %v2404_v0  ;;  %v2409_v1 = vld [vmem:[#allocation3 + $0x28] sm:$0xff]  ;;  %v2410_v29 = vld [vmem:[#allocation3 + $0x30] sm:$0xff]  ;;  %v2412_v3 = vld [vmem:[#allocation3 + $0x40] sm:$0xff] }
 0x494   : > { %4004 = vrcp.f32 %v2407_v8  ;;  %v2413_v57 = vld [vmem:[#allocation3 + $0x48] sm:$0xff]  ;;  %v2415_v47 = vld [vmem:[#allocation3 + $0x58] sm:$0xff]  ;;  %v2414_v7 = vld [vmem:[#allocation3 + $0x50] sm:$0xff] }
 0x495   : > { %4006 = vrcp.f32 %v2405_v13  ;;  %v2417_v16 = vld [vmem:[#allocation3 + $0x68] sm:$0xff]  ;;  %v2416_v14 = vld [vmem:[#allocation3 + $0x60] sm:$0xff]  ;;  %v2419_v34 = vld [vmem:[#allocation3 + $0x78] sm:$0xff] }
 0x496   : > { %4008 = vrcp.f32 %v2409_v1  ;;  %v2418_v49 = vld [vmem:[#allocation3 + $0x70] sm:$0xff]  ;;  %v2421_v10 = vld [vmem:[#allocation3 + $0x88] sm:$0xff]  ;;  %v2420_v43 = vld [vmem:[#allocation3 + $0x80] sm:$0xff] }
 0x497   : > { %4010 = vrcp.f32 %v2408_v15  ;;  %v2423_v6 = vld [vmem:[#allocation3 + $0x98] sm:$0xff]  ;;  %v2422_v12 = vld [vmem:[#allocation3 + $0x90] sm:$0xff]  ;;  %v2425_v24 = vld [vmem:[#allocation3 + $0xa8] sm:$0xff] }
 0x498   : > { %4012 = vrcp.f32 %v2411_v42  ;;  %v2424_v48 = vld [vmem:[#allocation3 + $0xa0] sm:$0xff]  ;;  %v2427_v20 = vld [vmem:[#allocation3 + $0xb8] sm:$0xff]  ;;  %v2426_v46 = vld [vmem:[#allocation3 + $0xb0] sm:$0xff] }
 0x499   : > { %4014 = vrcp.f32 %v2410_v29  ;;  %v2429_v41 = vld [vmem:[#allocation3 + $0xc8] sm:$0xff]  ;;  %v2428_v9 = vld [vmem:[#allocation3 + $0xc0] sm:$0xff]  ;;  %v2431_v25 = vld [vmem:[#allocation3 + $0xd8] sm:$0xff] }
 0x49a   : > { %4016 = vrcp.f32 %v2413_v57  ;;  %v2430_v50 = vld [vmem:[#allocation3 + $0xd0] sm:$0xff]  ;;  %v2433_v53 = vld [vmem:[#allocation3 + $0xe8] sm:$0xff]  ;;  %v2432_v19 = vld [vmem:[#allocation3 + $0xe0] sm:$0xff] }
 0x49b   : > { %4018 = vrcp.f32 %v2412_v3  ;;  %v2435_v30 = vld [vmem:[#allocation3 + $0xf8] sm:$0xff]  ;;  %v2434_v22 = vld [vmem:[#allocation3 + $0xf0] sm:$0xff]  ;;  %v3425_v8 = vld [vmem:[%s4622_s21 + $0x8] sm:$0xff]  }
 0x49c   : > { %4020 = vrcp.f32 %v2415_v47  ;;  %v2470_v0 = vld [vmem:[#allocation4 + $0xd8] sm:$0xff]  ;;  %v2468_v13 = vld [vmem:[#allocation4 + $0xb0] sm:$0xff]  ;;  %v3282_v1 = vld [vmem:[%s4622_s21] sm:$0xff]   ;;  %v3287_v29 = vunpack.c.l.bf16 %v3425_v8  ;;  %v3288_v3 = vunpack.c.h.bf16 %v3425_v8 }
 0x49d   : > { %4022 = vrcp.f32 %v2414_v7  ;;  %v2471_v42 = vld [vmem:[#allocation4 + $0x18] sm:$0xff]  ;;  %v3426_v7 = vld [vmem:[%s4622_s21 + $0x10] sm:$0xff]  }
 0x49e   : > { %4024 = vrcp.f32 %v2417_v16  ;;  %v3430_v8 = vld [vmem:[%s4622_s21 + $0x30] sm:$0xff]  }
 0x49f   : > { %v4001_v2 = vpop.eup %4000  ;;  %4026 = vrcp.f32 %v2416_v14  ;;  %v2473_v14 = vld [vmem:[#allocation4 + $0x68] sm:$0xff] }
 0x4a0   : > { %v4003_v55 = vpop.eup %4002  ;;  %2512 = vperm.xlu1 %3999, %v4001_v2   ;;  %4028 = vrcp.f32 %v2419_v34  ;;  %v2469_v2 = vld [vmem:[#allocation4] sm:$0xff] }
 0x4a1   : > { %v4005_v33 = vpop.eup %4004  ;;  %2502 = vperm.xlu0 %3998, %v4003_v55   ;;  %4030 = vrcp.f32 %v2418_v49  ;;  %v3283_v55 = vunpack.c.l.bf16 %v3282_v1  ;;  %v2472_v49 = vld [vmem:[#allocation4 + $0x50] sm:$0xff] }
 0x4a2   : > { %v4007_v31 = vpop.eup %4006  ;;  %4032 = vrcp.f32 %v2421_v10 }
 0x4a3   : > { %v4009_v21 = vpop.eup %4008  ;;  %4034 = vrcp.f32 %v2420_v43  ;;  %v3291_v43 = vunpack.c.l.bf16 %v3426_v7 }
 0x4a4   : > { %2517 = vperm.xlu1 %3999, %v4005_v33   ;;  %v4011_v26 = vpop.eup %4010  ;;  %4036 = vrcp.f32 %v2423_v6 }
 0x4a5   : > { %2507 = vperm.xlu0 %3998, %v4007_v31   ;;  %v4013_v35 = vpop.eup %4012  ;;  %4038 = vrcp.f32 %v2422_v12  ;;  %v3284_v31 = vunpack.c.h.bf16 %v3282_v1 }
 0x4a6   : > { %v4015_v38 = vpop.eup %4014  ;;  %4040 = vrcp.f32 %v2425_v24 }
 0x4a7   : > { %v4017_v52 = vpop.eup %4016  ;;  %4042 = vrcp.f32 %v2424_v48 }
 0x4a8   : > { %2527 = vperm.xlu1 %3999, %v4009_v21   ;;  %v4019_v23 = vpop.eup %4018  ;;  %4044 = vrcp.f32 %v2427_v20  ;;  %v2474_v20 = vld [vmem:[#allocation4 + $0x30] sm:$0xff] }
 0x4a9   : > { %2522 = vperm.xlu0 %3998, %v4011_v26   ;;  %v4021_v36 = vpop.eup %4020  ;;  %4046 = vrcp.f32 %v2426_v46 }
 0x4aa   : > { %v4023_v63 = vpop.eup %4022  ;;  %4048 = vrcp.f32 %v2429_v41  ;;  %v3428_v41 = vld [vmem:[%s4622_s21 + $0x20] sm:$0xff]  }
 0x4ab   : > { %v4025_v5 = vpop.eup %4024  ;;  %4050 = vrcp.f32 %v2428_v9 }
 0x4ac   : > { %2537 = vperm.xlu1 %3999, %v4013_v35   ;;  %v4027_v44 = vpop.eup %4026  ;;  %4052 = vrcp.f32 %v2431_v25 }
 0x4ad   : > { %2532 = vperm.xlu0 %3998, %v4015_v38   ;;  %v4029_v40 = vpop.eup %4028  ;;  %4054 = vrcp.f32 %v2430_v50  ;;  %v3292_v38 = vunpack.c.h.bf16 %v3426_v7 }
 0x4ae   : > { %v4031_v60 = vpop.eup %4030  ;;  %4056 = vrcp.f32 %v2433_v53  ;;  %v2476_v53 = vld [vmem:[#allocation4 + $0x80] sm:$0xff] }
 0x4af   : > { %v4033_v27 = vpop.eup %4032  ;;  %4058 = vrcp.f32 %v2432_v19 }
 0x4b0   : > { %2547 = vperm.xlu1 %3999, %v4017_v52   ;;  %v4035_v62 = vpop.eup %4034  ;;  %4060 = vrcp.f32 %v2435_v30  ;;  %v3429_v30 = vld [vmem:[%s4622_s21 + $0x28] sm:$0xff]  }
 0x4b1   : > { %2542 = vperm.xlu0 %3998, %v4019_v23   ;;  %v4037_v32 = vpop.eup %4036  ;;  %4062 = vrcp.f32 %v2434_v22 }
 0x4b2   : > { %v4039_v51 = vpop.eup %4038 }
 0x4b3   : > { %v4041_v45 = vpop.eup %4040 }
 0x4b4   : > { %2557 = vperm.xlu1 %3999, %v4021_v36   ;;  %v4043_v37 = vpop.eup %4042  ;;  %v3427_v36 = vld [vmem:[%s4622_s21 + $0x18] sm:$0xff]  }
 0x4b5   : > { %2552 = vperm.xlu0 %3998, %v4023_v63   ;;  %v4045_v58 = vpop.eup %4044 }
 0x4b6   : > { %v4047_v17 = vpop.eup %4046 }
 0x4b7   : > { %v4049_v61 = vpop.eup %4048 }
 0x4b8   : > { %2567 = vperm.xlu1 %3999, %v4025_v5   ;;  %v4051_v18 = vpop.eup %4050 }
 0x4b9   : > { %2562 = vperm.xlu0 %3998, %v4027_v44   ;;  %v4053_v56 = vpop.eup %4052  ;;  %v2475_v44 = vld [vmem:[#allocation4 + $0x48] sm:$0xff] }
 0x4ba   : > { %v4055_v11 = vpop.eup %4054 }
 0x4bb   : > { %v4057_v59 = vpop.eup %4056 }
 0x4bc   : > { %2577 = vperm.xlu1 %3999, %v4029_v40   ;;  %v4059_v28 = vpop.eup %4058  ;;  %v3296_v40 = vunpack.c.h.bf16 %v3427_v36 }
 0x4bd   : > { %2572 = vperm.xlu0 %3998, %v4031_v60   ;;  %v4061_v39 = vpop.eup %4060 }
 0x4be   : > { %v4063_v54 = vpop.eup %4062 }
 0x4c0   : > { %2587 = vperm.xlu1 %3999, %v4033_v27   ;;  %v3295_v27 = vunpack.c.l.bf16 %v3427_v36 }
 0x4c1   : > { %2582 = vperm.xlu0 %3998, %v4035_v62  }
 0x4c4   : > { %2597 = vperm.xlu1 %3999, %v4037_v32  }
 0x4c5   : > { %2592 = vperm.xlu0 %3998, %v4039_v51   ;;  %v2477_v51 = vld [vmem:[#allocation4 + $0x88] sm:$0xff] }
 0x4c8   : > { %2607 = vperm.xlu1 %3999, %v4041_v45   ;;  %v3300_v45 = vunpack.c.h.bf16 %v3428_v41 }
 0x4c9   : > { %2602 = vperm.xlu0 %3998, %v4043_v37  }
 0x4cc   : > { %2617 = vperm.xlu1 %3999, %v4045_v58   ;;  %v3299_v58 = vunpack.c.l.bf16 %v3428_v41 }
 0x4cd   : > { %2612 = vperm.xlu0 %3998, %v4047_v17  }
 0x4d0   : > { %2627 = vperm.xlu1 %3999, %v4049_v61  }
 0x4d1   : > { %2622 = vperm.xlu0 %3998, %v4051_v18  }
 0x4d4   : > { %2637 = vperm.xlu1 %3999, %v4053_v56   ;;  %v2479_v56 = vld [vmem:[#allocation4 + $0xb8] sm:$0xff] }
 0x4d5   : > { %2632 = vperm.xlu0 %3998, %v4055_v11  }
 0x4d8   : > { %2647 = vperm.xlu1 %3999, %v4057_v59   ;;  %v3304_v59 = vunpack.c.h.bf16 %v3429_v30 }
 0x4d9   : > { %2642 = vperm.xlu0 %3998, %v4059_v28   ;;  %v2478_v28 = vld [vmem:[#allocation4 + $0xe8] sm:$0xff] }
 0x4dc   : > { %2657 = vperm.xlu1 %3999, %v4061_v39  }
 0x4dd   : > { %2652 = vperm.xlu0 %3998, %v4063_v54  }
 0x51b   : > { %v2513_v4 = vpop.permute.xlu1 %2512 }
 0x51c   : > { %v2503_v15 = vpop.permute.xlu0 %2502  ;;  %v2662_v57 = vmul.f32 %v2513_v4, %v2470_v0  ;;  %v3303_v0 = vunpack.c.l.bf16 %v3429_v30 }
 0x51d   : > { %v2660_v33 = vmul.f32 %v2503_v15, %v2468_v13 }
 0x51e   : > { %v2758_v35 = vadd.f32 %v3287_v29, %v2662_v57  ;;  %v3308_v57 = vunpack.c.h.bf16 %v3430_v8 }
 0x51f   : > { %v2518_v47 = vpop.permute.xlu1 %2517  ;;  %v2756_v52 = vadd.f32 %v3283_v55, %v2660_v33  ;;  %v3307_v33 = vunpack.c.l.bf16 %v3430_v8 }
 0x520   : > { %v2663_v21 = vmul.f32 %v2518_v47, %v2471_v42  ;;  %v2508_v16 = vpop.permute.xlu0 %2507  ;;  %v2481_v42 = vld [vmem:[#allocation4 + $0xf0] sm:$0xff]  ;;  %v3431_v47 = vld [vmem:[%s4622_s21 + $0x38] sm:$0xff]  }
 0x521   : > { %v2661_v26 = vmul.f32 %v2508_v16, %v2469_v2 }
 0x522   : > { %v2759_v34 = vadd.f32 %v3288_v3, %v2663_v21  ;;  %v2480_v3 = vld [vmem:[#allocation4 + $0x60] sm:$0xff] }
 0x523   : > { %v2757_v10 = vadd.f32 %v3284_v31, %v2661_v26  ;;  %v2528_v23 = vpop.permute.xlu1 %2527  ;;  %v2483_v26 = vld [vmem:[#allocation4 + $0x78] sm:$0xff] }
 0x524   : > { %v3353_v6 = vpack.c.bf16 %v2759_v34, %v2758_v35  ;;  %v2665_v63 = vmul.f32 %v2528_v23, %v2473_v14  ;;  %v2523_v12 = vpop.permute.xlu0 %2522  ;;  %v3312_v35 = vunpack.c.h.bf16 %v3431_v47  ;;  %v2482_v34 = vld [vmem:[#allocation4 + $0x8] sm:$0xff] }
 0x525   : > { %v3348_v5 = vpack.c.bf16 %v2757_v10, %v2756_v52  ;;  %v2664_v24 = vmul.f32 %v2523_v12, %v2472_v49  ;;  %v3311_v52 = vunpack.c.l.bf16 %v3431_v47  ;;  %v3432_v10 = vld [vmem:[%s4622_s21 + $0x40] sm:$0xff]  }
 0x526   : > { %3440 = vst [vmem:[%s4648_s1 + $0x8] sm:$0xff] %v3353_v6   ;;  %v2761_v48 = vadd.f32 %v3292_v38, %v2665_v63  ;;  %v2485_v63 = vld [vmem:[#allocation4 + $0x58] sm:$0xff] }
 0x527   : > { %3349 = vst [vmem:[%s4648_s1] sm:$0xff] %v3348_v5   ;;  %v2760_v60 = vadd.f32 %v3291_v43, %v2664_v24  ;;  %v2538_v46 = vpop.permute.xlu1 %2537  ;;  %v3316_v5 = vunpack.c.h.bf16 %v3432_v10  ;;  %v2484_v24 = vld [vmem:[#allocation4 + $0x38] sm:$0xff] }
 0x528   : > { %v2667_v62 = vmul.f32 %v2538_v46, %v2475_v44  ;;  %v2533_v9 = vpop.permute.xlu0 %2532 }
 0x529   : > { %v3358_v32 = vpack.c.bf16 %v2761_v48, %v2760_v60  ;;  %v2666_v25 = vmul.f32 %v2533_v9, %v2474_v20  ;;  %v3433_v20 = vld [vmem:[%s4622_s21 + $0x48] sm:$0xff]  }
 0x52a   : > { %v2763_v50 = vadd.f32 %v3296_v40, %v2667_v62  ;;  %v3315_v40 = vunpack.c.l.bf16 %v3432_v10  ;;  %v2487_v62 = vld [vmem:[#allocation4 + $0xc8] sm:$0xff] }
 0x52b   : > { %3441 = vst [vmem:[%s4648_s1 + $0x10] sm:$0xff] %v3358_v32   ;;  %v2762_v37 = vadd.f32 %v3295_v27, %v2666_v25  ;;  %v2548_v19 = vpop.permute.xlu1 %2547  ;;  %v3320_v32 = vunpack.c.h.bf16 %v3433_v20  ;;  %v2486_v25 = vld [vmem:[#allocation4 + $0x40] sm:$0xff] }
 0x52c   : > { %v2669_v17 = vmul.f32 %v2548_v19, %v2477_v51  ;;  %v2543_v22 = vpop.permute.xlu0 %2542 }
 0x52d   : > { %v3363_v61 = vpack.c.bf16 %v2763_v50, %v2762_v37  ;;  %v2668_v18 = vmul.f32 %v2543_v22, %v2476_v53  ;;  %v3434_v53 = vld [vmem:[%s4622_s21 + $0x50] sm:$0xff]  }
 0x52e   : > { %v2765_v11 = vadd.f32 %v3300_v45, %v2669_v17  ;;  %v3319_v45 = vunpack.c.l.bf16 %v3433_v20  ;;  %v2489_v17 = vld [vmem:[#allocation4 + $0x90] sm:$0xff] }
 0x52f   : > { %3442 = vst [vmem:[%s4648_s1 + $0x18] sm:$0xff] %v3363_v61   ;;  %v2764_v39 = vadd.f32 %v3299_v58, %v2668_v18  ;;  %v2558_v54 = vpop.permute.xlu1 %2557  ;;  %v3324_v61 = vunpack.c.h.bf16 %v3434_v53  ;;  %v2488_v18 = vld [vmem:[#allocation4 + $0xe0] sm:$0xff] }
 0x530   : > { %v2671_v4 = vmul.f32 %v2558_v54, %v2479_v56  ;;  %v2553_v13 = vpop.permute.xlu0 %2552 }
 0x531   : > { %v3368_v1 = vpack.c.bf16 %v2765_v11, %v2764_v39  ;;  %v2670_v15 = vmul.f32 %v2553_v13, %v2478_v28  ;;  %v3435_v28 = vld [vmem:[%s4622_s21 + $0x58] sm:$0xff]  }
 0x532   : > { %v2767_v29 = vadd.f32 %v3304_v59, %v2671_v4  ;;  %v3323_v59 = vunpack.c.l.bf16 %v3434_v53  ;;  %v2491_v4 = vld [vmem:[#allocation4 + $0xc0] sm:$0xff] }
 0x533   : > { %3443 = vst [vmem:[%s4648_s1 + $0x20] sm:$0xff] %v3368_v1   ;;  %v2766_v2 = vadd.f32 %v3303_v0, %v2670_v15  ;;  %v2568_v55 = vpop.permute.xlu1 %2567  ;;  %v3328_v1 = vunpack.c.h.bf16 %v3435_v28  ;;  %v2490_v15 = vld [vmem:[#allocation4 + $0x70] sm:$0xff] }
 0x534   : > { %v2673_v31 = vmul.f32 %v2568_v55, %v2481_v42  ;;  %v2563_v7 = vpop.permute.xlu0 %2562 }
 0x535   : > { %v3373_v21 = vpack.c.bf16 %v2767_v29, %v2766_v2  ;;  %v2672_v16 = vmul.f32 %v2563_v7, %v2480_v3  ;;  %v3436_v3 = vld [vmem:[%s4622_s21 + $0x60] sm:$0xff]  }
 0x536   : > { %v2769_v14 = vadd.f32 %v3308_v57, %v2673_v31  ;;  %v3327_v57 = vunpack.c.l.bf16 %v3435_v28  ;;  %v2493_v31 = vld [vmem:[#allocation4 + $0xd0] sm:$0xff] }
 0x537   : > { %3444 = vst [vmem:[%s4648_s1 + $0x28] sm:$0xff] %v3373_v21   ;;  %v2768_v38 = vadd.f32 %v3307_v33, %v2672_v16  ;;  %v2578_v49 = vpop.permute.xlu1 %2577  ;;  %v3332_v21 = vunpack.c.h.bf16 %v3436_v3  ;;  %v2492_v16 = vld [vmem:[#allocation4 + $0xa8] sm:$0xff] }
 0x538   : > { %v2675_v23 = vmul.f32 %v2578_v49, %v2483_v26  ;;  %v2573_v43 = vpop.permute.xlu0 %2572 }
 0x539   : > { %v3378_v36 = vpack.c.bf16 %v2769_v14, %v2768_v38  ;;  %v2674_v6 = vmul.f32 %v2573_v43, %v2482_v34  ;;  %v3437_v34 = vld [vmem:[%s4622_s21 + $0x68] sm:$0xff]  }
 0x53a   : > { %v2771_v12 = vadd.f32 %v3312_v35, %v2675_v23  ;;  %v3331_v35 = vunpack.c.l.bf16 %v3436_v3  ;;  %v2495_v23 = vld [vmem:[#allocation4 + $0x28] sm:$0xff] }
 0x53b   : > { %3445 = vst [vmem:[%s4648_s1 + $0x30] sm:$0xff] %v3378_v36   ;;  %v2770_v44 = vadd.f32 %v3311_v52, %v2674_v6  ;;  %v2588_v48 = vpop.permute.xlu1 %2587  ;;  %v3336_v36 = vunpack.c.h.bf16 %v3437_v34  ;;  %v2494_v6 = vld [vmem:[#allocation4 + $0x10] sm:$0xff] }
 0x53c   : > { %v2677_v60 = vmul.f32 %v2588_v48, %v2485_v63  ;;  %v2583_v46 = vpop.permute.xlu0 %2582 }
 0x53d   : > { %v3383_v27 = vpack.c.bf16 %v2771_v12, %v2770_v44  ;;  %v2676_v41 = vmul.f32 %v2583_v46, %v2484_v24  ;;  %v3438_v24 = vld [vmem:[%s4622_s21 + $0x70] sm:$0xff]  }
 0x53e   : > { %v2773_v9 = vadd.f32 %v3316_v5, %v2677_v60  ;;  %v3335_v5 = vunpack.c.l.bf16 %v3437_v34  ;;  %v2497_v60 = vld [vmem:[#allocation4 + $0xf8] sm:$0xff] }
 0x53f   : > { %3446 = vst [vmem:[%s4648_s1 + $0x38] sm:$0xff] %v3383_v27   ;;  %v2772_v51 = vadd.f32 %v3315_v40, %v2676_v41  ;;  %v2598_v50 = vpop.permute.xlu1 %2597  ;;  %v3340_v27 = vunpack.c.h.bf16 %v3438_v24  ;;  %v2496_v41 = vld [vmem:[#allocation4 + $0xa0] sm:$0xff] }
 0x540   : > { %v2679_v37 = vmul.f32 %v2598_v50, %v2487_v62  ;;  %v2593_v19 = vpop.permute.xlu0 %2592 }
 0x541   : > { %v3388_v58 = vpack.c.bf16 %v2773_v9, %v2772_v51  ;;  %v2678_v30 = vmul.f32 %v2593_v19, %v2486_v25  ;;  %v3439_v25 = vld [vmem:[%s4622_s21 + $0x78] sm:$0xff]  }
 0x542   : > { %v2775_v22 = vadd.f32 %v3320_v32, %v2679_v37  ;;  %v3339_v32 = vunpack.c.l.bf16 %v3438_v24  ;;  %v2499_v37 = vld [vmem:[#allocation4 + $0x98] sm:$0xff] }
 0x543   : > { %3447 = vst [vmem:[%s4648_s1 + $0x40] sm:$0xff] %v3388_v58   ;;  %v2774_v56 = vadd.f32 %v3319_v45, %v2678_v30  ;;  %v2608_v11 = vpop.permute.xlu1 %2607  ;;  %v3344_v58 = vunpack.c.h.bf16 %v3439_v25  ;;  %v2498_v30 = vld [vmem:[#allocation4 + $0x20] sm:$0xff] }
 0x544   : > { %v2681_v39 = vmul.f32 %v2608_v11, %v2489_v17  ;;  %v2603_v54 = vpop.permute.xlu0 %2602 }
 0x545   : > { %v3393_v0 = vpack.c.bf16 %v2775_v22, %v2774_v56  ;;  %v2680_v8 = vmul.f32 %v2603_v54, %v2488_v18 }
 0x546   : > { %v2777_v13 = vadd.f32 %v3324_v61, %v2681_v39  ;;  %v3343_v61 = vunpack.c.l.bf16 %v3439_v25 }
 0x547   : > { %3448 = vst [vmem:[%s4648_s1 + $0x48] sm:$0xff] %v3393_v0   ;;  %v2776_v42 = vadd.f32 %v3323_v59, %v2680_v8  ;;  %v2618_v29 = vpop.permute.xlu1 %2617 }
 0x548   : > { %v2683_v2 = vmul.f32 %v2618_v29, %v2491_v4  ;;  %v2613_v55 = vpop.permute.xlu0 %2612 }
 0x549   : > { %v3398_v33 = vpack.c.bf16 %v2777_v13, %v2776_v42  ;;  %v2682_v47 = vmul.f32 %v2613_v55, %v2490_v15 }
 0x54a   : > { %v2779_v7 = vadd.f32 %v3328_v1, %v2683_v2 }
 0x54b   : > { %3449 = vst [vmem:[%s4648_s1 + $0x50] sm:$0xff] %v3398_v33   ;;  %v2778_v26 = vadd.f32 %v3327_v57, %v2682_v47  ;;  %v2628_v14 = vpop.permute.xlu1 %2627 }
 0x54c   : > { %v2685_v38 = vmul.f32 %v2628_v14, %v2493_v31  ;;  %v2623_v49 = vpop.permute.xlu0 %2622 }
 0x54d   : > { %v3403_v52 = vpack.c.bf16 %v2779_v7, %v2778_v26  ;;  %v2684_v10 = vmul.f32 %v2623_v49, %v2492_v16 }
 0x54e   : > { %v2781_v43 = vadd.f32 %v3332_v21, %v2685_v38 }
 0x54f   : > { %3450 = vst [vmem:[%s4648_s1 + $0x58] sm:$0xff] %v3403_v52   ;;  %v2780_v63 = vadd.f32 %v3331_v35, %v2684_v10  ;;  %v2638_v12 = vpop.permute.xlu1 %2637 }
 0x550   : > { %v2687_v44 = vmul.f32 %v2638_v12, %v2495_v23  ;;  %v2633_v48 = vpop.permute.xlu0 %2632 }
 0x551   : > { %v3408_v40 = vpack.c.bf16 %v2781_v43, %v2780_v63  ;;  %v2686_v20 = vmul.f32 %v2633_v48, %v2494_v6 }
 0x552   : > { %v2783_v46 = vadd.f32 %v3336_v36, %v2687_v44 }
 0x553   : > { %3451 = vst [vmem:[%s4648_s1 + $0x60] sm:$0xff] %v3408_v40   ;;  %v2782_v62 = vadd.f32 %v3335_v5, %v2686_v20  ;;  %v2648_v9 = vpop.permute.xlu1 %2647 }
 0x554   : > { %v2689_v51 = vmul.f32 %v2648_v9, %v2497_v60  ;;  %v2643_v50 = vpop.permute.xlu0 %2642 }
 0x555   : > { %v3413_v45 = vpack.c.bf16 %v2783_v46, %v2782_v62  ;;  %v2688_v53 = vmul.f32 %v2643_v50, %v2496_v41 }
 0x556   : > { %v2785_v19 = vadd.f32 %v3340_v27, %v2689_v51 }
 0x557   : > { %3452 = vst [vmem:[%s4648_s1 + $0x68] sm:$0xff] %v3413_v45   ;;  %v2784_v17 = vadd.f32 %v3339_v32, %v2688_v53  ;;  %v2658_v22 = vpop.permute.xlu1 %2657 }
 0x558   : > { %v2691_v18 = vmul.f32 %v2658_v22, %v2499_v37  ;;  %v2653_v56 = vpop.permute.xlu0 %2652 }
 0x559   : > { %v3418_v11 = vpack.c.bf16 %v2785_v19, %v2784_v17  ;;  %v2690_v59 = vmul.f32 %v2653_v56, %v2498_v30 }
 0x55a   : > { %v2787_v28 = vadd.f32 %v3344_v58, %v2691_v18 }
 0x55b   : > { %3453 = vst [vmem:[%s4648_s1 + $0x70] sm:$0xff] %v3418_v11   ;;  %v2786_v39 = vadd.f32 %v3343_v61, %v2690_v59 }
 0x55d   : > { %v3423_v54 = vpack.c.bf16 %v2787_v28, %v2786_v39 }
 0x55f   : > { %3454 = vst [vmem:[%s4648_s1 + $0x78] sm:$0xff] %v3423_v54  }
 0x560 PF: > { %s6304_s9 = sld [smem:[#allocation21_spill]]  ;;  %s2964_s10 = sshll.u32 %s4648_s1, 4  ;;  %s5859_s10 = int_to_ptr.vmem [resolvable:$true] %s2964_s10 }
 0x561   : > { %s6305_s5 = sld [smem:[#allocation22_spill]]  ;;  %s2949_s23 = scalar_lea.sflag [#allocation7], %s4618_s8 }
 0x562   : > { %s6307_s21 = sld [smem:[#allocation106_spill]]  ;;  %s4176_s24 = scalar_lea.vmem %s5859_s10, 2048 }
 0x563   : > { %p4177_p0 = scmp.ne.s32.totalorder %s5859_s10, %s4176_s24  ;;  %s4336_s29 = smov [#allocation13]  }
 0x564   : > { %s4180_s13 = sshll.u32 %s4336_s29, 4  ;;  %s4181_s13 = int_to_ptr.vmem [resolvable:$false] %s4180_s13 }
 0x565   : > { %p4178_p6 = pnand %p4177_p0, %p4477_p11  ;;  %s4182_s28 = scalar_lea.vmem %s4181_s13, 4096 }
 0x566   : > { %s3244_s7 = sshll.u32 %s6304_s9, 5  ;;  %p4183_p13 = scmp.lt.s32.totalorder %s5859_s10, %s4181_s13 }
 0x567   : > { %s3245_s14 = sshll.u32 %s6305_s5, 6  ;;  %p4179_p4 = pneg %p4178_p6 }
 0x568   : > { %s2961_s30 = sadd.s32 %s3245_s14, %s3244_s7  ;;  %s6308_s6 = smov %s6307_s21 }
 0x569   : > { %s3246_s25 = sshll.u32 %s2961_s30, 6  ;;  %p4184_p2 = scmp.lt.s32.totalorder %s4182_s28, %s4176_s24 }
 0x56a   : > { %s5864_s26 = scalar_lea.hbm %s6307_s21, %s3246_s25 }
 0x56b   : > { %p4185_p3 = por %p4184_p2, %p4183_p13 }
 0x56d   : > { %p4186_p8 = pnand %p4185_p3, %p4179_p4 }
 0x56f   : > { %4189 = shalt.err (!%p4186_p8)
}
 0x570   : > { %s4190_s4 = scalar_lea.hbm %s5864_s26, 2048  ;;  %s4194_s12 = scalar_lea.hbm %s6308_s6, 8192 }
 0x571   : > { %p4191_p9 = scmp.ne.s32.totalorder %s5864_s26, %s4190_s4  ;;  %p4195_p7 = scmp.lt.s32.totalorder %s5864_s26, %s6308_s6 }
 0x572   : > { %p4196_p5 = scmp.lt.s32.totalorder %s4194_s12, %s4190_s4 }
 0x573   : > { %p4192_p10 = pnand %p4191_p9, %p4477_p11 }
 0x574   : > { %p4197_p0 = por %p4196_p5, %p4195_p7 }
 0x575   : > { %p4193_p1 = pneg %p4192_p10 }
 0x577   : > { %p4198_p6 = pnand %p4197_p0, %p4193_p1 }
 0x579   : > { %4201 = shalt.err (!%p4198_p6)
}
 0x57a   : > { %s4337_s7 = smov 64   ;;  %s4338_s14 = smov 4  }
 0x57b   : > { %3623 = dma.vmem_to_hbm [thread:$0]  (%p4477_p11), %s5859_s10, 2048, %s5864_s26, %s2949_s23, %s4337_s7, %s4337_s7, %s4338_s14  }
 0x57c PF: > { %s6309_s30 = sld [smem:[#allocation19_spill]]  ;;  %p3643_p4 = scmp.ge.s32.totalorder %s4324_s27, 2 }
 0x57e   : > { %p3639_p13 = pnand %p3643_p4, %p4484_p12 }
 0x580   : > { %p3640_p2 = pneg %p3639_p13 }
 0x582   : > { %s2979_s22 = sand.u32 1, %s6309_s30  }
 0x583   : > { %s2980_s0 = scalar_lea.sflag [#allocation7], %s2979_s22 }
 0x584   : > { %4271 = dma.done.wait (%p3640_p2), %s2980_s0, 2048  }
 0x585   : > { %4273 = vsyncadd (%p3640_p2), %s2980_s0, 4294965248  ;;  %s26_s27 = sadd.s32 1, %s4324_s27   ;;  %s6312_s8 = sld [smem:[#allocation32_spill]] }
 0x586   : > { %p5894_p3 = scmp.ge.s32.totalorder %s26_s27, 10   ;;  %s6313_s10 = sld [smem:[#allocation23_spill]] }
 0x587   : > { %s6314_s22 = sld [smem:[#allocation24_spill]]  ;;  %s6320_s15 = smov %s4280_s16 }
 0x588   : > { %s6315_s23 = sld [smem:[#allocation25_spill]]  ;;  %s6321_s16 = smov %s4284_s17 }
 0x589   : > { %s6316_s24 = sld [smem:[#allocation26_spill]]  ;;  %s6322_s17 = smov %s4565_s18 }
 0x58a   : > { %s6317_s25 = sld [smem:[#allocation27_spill]]  ;;  %s6323_s18 = smov %s4292_s19 }
 0x58b   : > { %s6318_s26 = sld [smem:[#allocation29_spill]]  ;;  %s6324_s19 = smov %s4296_s20 }
 0x58c   : > { %s6325_s20 = smov %s6312_s8  ;;  %s6326_s21 = smov %s6313_s10 }
 0x58d   :  { %25 = sbr.rel (!%p5894_p3) target bundleno = 18 (0x12), region = 126 }
 0x592   :  { %2985 = vsyncpa [#allocation6], 1 }
 0x593   :  { %2987 = vsyncpa [#allocation6 + $0x1], 1 }
 0x594   :  { %2988 = vsyncpa [#allocation9], 1 }
 0x595   :  { %2990 = vsyncpa [#allocation9 + $0x1], 1 }
 0x596   :  { %2991 = vsyncpa [#allocation12], 1 }
 0x597   :  { %2993 = vsyncpa [#allocation12 + $0x1], 1 }
 0x598   :  { %2994 = vsyncpa [#allocation7], 1 }
 0x599   :  { %2996 = vsyncpa [#allocation7 + $0x1], 1 }

</bundles_post_ra>
